<compile_context>
chip_gen: v5e
topology: v5e:2x2
jax: 0.10.0
libtpu: 0.0.40
codegen_flags: <defaults>
</compile_context>

<pallas_src>
import math

import jax
import jax.numpy as jnp
from jax.experimental import pallas as pl
from jax.experimental.pallas import tpu as pltpu

# ----------------------------- model config ---------------------------------
IMG = 16
PATCH = 4
IN_CH = 3
DIM = 32
DEPTH = 2
HIDDEN_C = 32          # hidden of the patch-mixing MLP (MLPblock)
HIDDEN_S = 32          # hidden of the channel-mixing MLP (TokenMixer)
NUM_CLASSES = 10
NUM_BRANCH = 5
NUM_PATCH = (IMG // PATCH) ** 2      # 16
BATCH = 2

K_IN = IN_CH * PATCH * PATCH         # 48
BN = BATCH * NUM_PATCH               # 32  rows of the batched activation
BHC = BATCH * HIDDEN_C               # 64

# ---- bf16 weight slab #1 (width D=32): embed + per-layer [fc1T_blk, fc3, fc4]
W32_EMBED = 0                                    # 48 rows
W32_LAYER0 = K_IN                                # 48
W32_FC1T = 0                                     # B*Hc rows (block-diag fc1^T)
W32_FC3 = BHC                                    # D rows
W32_FC4 = BHC + DIM                              # Hs rows
W32_LAYER_STRIDE = BHC + DIM + HIDDEN_S          # 128  (all offsets 16-aligned)
W32_ROWS = W32_LAYER0 + DEPTH * W32_LAYER_STRIDE # 304

# ---- bf16 weight slab #2 (width B*Hc=64): per-layer block-diag fc2^T --------
W64_ROWS = DEPTH * BN                            # 64

# ---- f32 parameter slab (width D=32), 8-row aligned big blocks --------------
P_EMBED_B = 0
P_SN0_W = 1
P_SN0_B = 2
P_LAYER0 = 8
PL_LN1_W, PL_LN1_B, PL_LN2_W, PL_LN2_B, PL_B3, PL_B4 = 0, 1, 2, 3, 4, 5
PL_B1 = 8                                        # B*Hc rows (fc1 bias, bcast)
PL_B2 = PL_B1 + BHC                              # B*N rows (fc2 bias, bcast)
P_LAYER_STRIDE = ((PL_B2 + BN + 7) // 8) * 8     # 104
P_DN_W = P_LAYER0 + DEPTH * P_LAYER_STRIDE       # 216, 5 rows
P_DN_B = P_DN_W + 8                              # 224, 5 rows
P_ROWS = P_DN_B + 8                              # 232


# --------------------------- shared numeric helpers --------------------------
def _mm(a, b):
    """bf16-operand, f32-accumulate matmul (used by the pure-JAX reference)."""
    return jnp.dot(a.astype(jnp.bfloat16), b.astype(jnp.bfloat16),
                   preferred_element_type=jnp.float32)


def _layernorm(x, w, b, axes=(-1,), eps=1e-5):
    """PyTorch nn.LayerNorm semantics (biased variance, eps inside sqrt)."""
    mean = jnp.mean(x, axis=axes, keepdims=True)
    var = jnp.mean(jnp.square(x - mean), axis=axes, keepdims=True)
    return (x - mean) * jax.lax.rsqrt(var + eps) * w + b


def _erf(x):
    # Abramowitz & Stegun 7.1.26 polynomial erf (|err| < 1.5e-7 ~ f32 eps),
    # built only from exp/abs/where so it always lowers on Mosaic.
    a1, a2, a3, a4, a5 = 0.254829592, -0.284496736, 1.421413741, -1.453152027, 1.061405429
    p = 0.3275911
    ax = jnp.abs(x)
    t = 1.0 / (1.0 + p * ax)
    poly = ((((a5 * t + a4) * t + a3) * t + a2) * t + a1) * t
    y = 1.0 - poly * jnp.exp(-ax * ax)
    return jnp.where(x >= 0, y, -y)


def _gelu(x):
    # exact (erf-based) GELU, matching PyTorch F.gelu default.
    return 0.5 * x * (1.0 + _erf(x * 0.7071067811865476))


# ----------------------------- fused Pallas kernel ---------------------------
def dmixnet_kernel(patches_ref,   # (B*N, K)  bf16
                   w32_ref,       # (W32_ROWS, D)   bf16 weight slab
                   w64_ref,       # (W64_ROWS, B*Hc) bf16 weight slab
                   p32_ref,       # (P_ROWS, D)     f32 parameter slab
                   swsb_ref,      # (2, O, M, D)    f32 DNM synapse params
                   o_ref):        # (B, O)          f32
    bf16 = jnp.bfloat16
    f32 = jnp.float32

    # ----------------------------- patch embedding --------------------------
    emb_w = w32_ref[W32_EMBED:W32_EMBED + K_IN, :]                    # (K, D)
    x = jnp.dot(patches_ref[...], emb_w, preferred_element_type=f32)  # (B*N, D)
    x = x + p32_ref[P_EMBED_B:P_EMBED_B + 1, :]

    # ------------------------ Mixer backbone (batched) -----------------------
    for l in range(DEPTH):
        wb = W32_LAYER0 + l * W32_LAYER_STRIDE
        pb = P_LAYER0 + l * P_LAYER_STRIDE

        # --- MLPblock (mixes patches): block-diagonal, transpose-free -------
        #   r_s = W2 @ gelu(W1 @ ln(x_s) + b1_col) + b2_col    (per sample s)
        # realized for the whole batch with block-diag(W1), block-diag(W2).
        u = _layernorm(x, p32_ref[pb + PL_LN1_W:pb + PL_LN1_W + 1, :],
                          p32_ref[pb + PL_LN1_B:pb + PL_LN1_B + 1, :])
        fc1t = w32_ref[wb + W32_FC1T:wb + W32_FC1T + BHC, :]          # (B*Hc, B*N)
        v = jnp.dot(fc1t, u.astype(bf16), preferred_element_type=f32)  # (B*Hc, D)
        v = _gelu(v + p32_ref[pb + PL_B1:pb + PL_B1 + BHC, :])
        fc2t = w64_ref[l * BN:(l + 1) * BN, :]                         # (B*N, B*Hc)
        r = jnp.dot(fc2t, v.astype(bf16), preferred_element_type=f32)  # (B*N, D)
        x = x + r + p32_ref[pb + PL_B2:pb + PL_B2 + BN, :]

        # --- TokenMixer (mixes channels): naturally batched on rows ---------
        u = _layernorm(x, p32_ref[pb + PL_LN2_W:pb + PL_LN2_W + 1, :],
                          p32_ref[pb + PL_LN2_B:pb + PL_LN2_B + 1, :])
        fc3 = w32_ref[wb + W32_FC3:wb + W32_FC3 + DIM, :]              # (D, Hs)
        h = jnp.dot(u.astype(bf16), fc3, preferred_element_type=f32)   # (B*N, Hs)
        h = _gelu(h + p32_ref[pb + PL_B3:pb + PL_B3 + 1, :])
        fc4 = w32_ref[wb + W32_FC4:wb + W32_FC4 + HIDDEN_S, :]         # (Hs, D)
        x = (x + jnp.dot(h.astype(bf16), fc4, preferred_element_type=f32)
               + p32_ref[pb + PL_B4:pb + PL_B4 + 1, :])

    # ------------------------- global average pooling ------------------------
    pooled = jnp.mean(x.reshape(BATCH, NUM_PATCH, DIM), axis=1)        # (B, D)

    # -------------------------------- DNM head -------------------------------
    xb = _layernorm(pooled, p32_ref[P_SN0_W:P_SN0_W + 1, :],
                            p32_ref[P_SN0_B:P_SN0_B + 1, :])           # (B, D)

    sw = swsb_ref[0]                                                   # (O, M, D)
    sb = swsb_ref[1]
    z = jax.nn.sigmoid(sw[None] * xb[:, None, None, :] + sb[None])     # (B, O, M, D)

    # nn.LayerNorm([M, D]) — stepwise lane-reduce then sublane-reduce.
    cnt = float(NUM_BRANCH * DIM)
    s = jnp.sum(jnp.sum(z, axis=-1, keepdims=True), axis=-2, keepdims=True)
    mean = s / cnt
    zc = z - mean
    sv = jnp.sum(jnp.sum(zc * zc, axis=-1, keepdims=True), axis=-2, keepdims=True)
    inv = jax.lax.rsqrt(sv / cnt + 1e-5)
    dn_w = p32_ref[P_DN_W:P_DN_W + NUM_BRANCH, :]                      # (M, D)
    dn_b = p32_ref[P_DN_B:P_DN_B + NUM_BRANCH, :]                      # (M, D)
    zn = zc * inv * dn_w[None, None] + dn_b[None, None]

    # per-branch sum over D, dendritic sigmoid, sum over branches.
    # (adaptive_weight=False -> dendritic weights dw skipped, as in PyTorch.)
    branch = jax.nn.sigmoid(jnp.sum(zn, axis=-1))                      # (B, O, M)
    logits = jnp.sum(branch, axis=-1)                                  # (B, O)

    # soma = Softmax(dim=1)
    logits = logits - jnp.max(logits, axis=-1, keepdims=True)
    e = jnp.exp(logits)
    o_ref[...] = e / jnp.sum(e, axis=-1, keepdims=True)


# ------------------------------ JAX glue / wrapper ----------------------------
def patchify(img, p):
    """NCHW image -> (B, N, C*p*p) patches, flattened in (c, ph, pw) order,
    matching Conv2d(patch, stride=patch) + Rearrange('b c h w -> b (h w) c')."""
    B, C, H, W = img.shape
    Hp, Wp = H // p, W // p
    x = img.reshape(B, C, Hp, p, Wp, p)
    x = x.transpose(0, 2, 4, 1, 3, 5)          # (B, Hp, Wp, C, p, p)
    return x.reshape(B, Hp * Wp, C * p * p)


def dmixnet_forward(img, pk):
    """Single fused pallas_call for the whole forward pass (no grid: every
    operand is a whole-array VMEM block; model + activations ~90 KB).  At B=2
    a batch grid / v7x dual-TC split would only duplicate weight DMAs."""
    patches = patchify(img, PATCH).reshape(BATCH * NUM_PATCH, K_IN)
    patches = patches.astype(jnp.bfloat16)
    vmem = lambda: pl.BlockSpec(memory_space=pltpu.MemorySpace.VMEM)
    return pl.pallas_call(
        dmixnet_kernel,
        out_shape=jax.ShapeDtypeStruct((BATCH, NUM_CLASSES), jnp.float32),
        in_specs=[vmem() for _ in range(5)],
        out_specs=vmem(),
        cost_estimate=pl.CostEstimate(flops=900_000, transcendentals=10_000,
                                      bytes_accessed=75_000),
    )(patches, pk["w32"], pk["w64"], pk["p32"], pk["swsb"])


# -------------------------- deterministic init -------------------------------
def _xavier_normal(key, shape, fan_in, fan_out):
    std = math.sqrt(2.0 / (fan_in + fan_out))
    return std * jax.random.normal(key, shape, dtype=jnp.float32)


def init_params(key):
    keys = iter(jax.random.split(key, 64))
    nk = lambda: next(keys)

    params = {
        # Conv2d(in_ch, dim, patch, patch): xavier_normal, bias=0
        "embed_w": _xavier_normal(nk(), (K_IN, DIM),
                                  fan_in=K_IN, fan_out=DIM * PATCH * PATCH),
        "embed_b": jnp.zeros((1, DIM), jnp.float32),
        "layers": [],
    }
    for _ in range(DEPTH):
        params["layers"].append({
            # MLPblock (mixes patches)
            "ln1_w": jnp.ones((1, DIM), jnp.float32),
            "ln1_b": jnp.zeros((1, DIM), jnp.float32),
            "fc1_w": _xavier_normal(nk(), (NUM_PATCH, HIDDEN_C), NUM_PATCH, HIDDEN_C),
            "fc1_b": jnp.zeros((1, HIDDEN_C), jnp.float32),
            "fc2_w": _xavier_normal(nk(), (HIDDEN_C, NUM_PATCH), HIDDEN_C, NUM_PATCH),
            "fc2_b": jnp.zeros((1, NUM_PATCH), jnp.float32),
            # TokenMixer (mixes channels)
            "ln2_w": jnp.ones((1, DIM), jnp.float32),
            "ln2_b": jnp.zeros((1, DIM), jnp.float32),
            "fc3_w": _xavier_normal(nk(), (DIM, HIDDEN_S), DIM, HIDDEN_S),
            "fc3_b": jnp.zeros((1, HIDDEN_S), jnp.float32),
            "fc4_w": _xavier_normal(nk(), (HIDDEN_S, DIM), HIDDEN_S, DIM),
            "fc4_b": jnp.zeros((1, DIM), jnp.float32),
        })
    params["head"] = {
        "sn0_w": jnp.ones((1, DIM), jnp.float32),
        "sn0_b": jnp.zeros((1, DIM), jnp.float32),
        "sw": jax.random.normal(nk(), (NUM_CLASSES, NUM_BRANCH, DIM), jnp.float32),
        "sb": jax.random.normal(nk(), (NUM_CLASSES, NUM_BRANCH, DIM), jnp.float32),
        "dn_w": jnp.ones((NUM_BRANCH, DIM), jnp.float32),
        "dn_b": jnp.zeros((NUM_BRANCH, DIM), jnp.float32),
    }
    return params


def pack_params(params):
    """One-time packing: pre-transpose + block-diagonalize the patch-mixing
    weights, pre-cast all matmul weights to bf16, pre-broadcast per-row biases
    to full (rows, D) tiles, and merge everything into a few aligned slabs."""
    B = BATCH
    L = params["layers"]
    hp = params["head"]
    eye = jnp.eye(B, dtype=jnp.float32)

    # bf16 weight slabs (all row offsets multiples of 16 -> aligned bf16 tiles)
    w32_parts = [params["embed_w"]]
    w64_parts = []
    for l in L:
        w32_parts += [jnp.kron(eye, l["fc1_w"].T),      # (B*Hc, B*N) block-diag
                      l["fc3_w"], l["fc4_w"]]
        w64_parts.append(jnp.kron(eye, l["fc2_w"].T))   # (B*N, B*Hc) block-diag
    w32 = jnp.concatenate(w32_parts, axis=0).astype(jnp.bfloat16)
    w64 = jnp.concatenate(w64_parts, axis=0).astype(jnp.bfloat16)
    assert w32.shape == (W32_ROWS, DIM) and w64.shape == (W64_ROWS, BHC)

    # f32 parameter slab (width D)
    p32 = jnp.zeros((P_ROWS, DIM), jnp.float32)

    def put(slab, row, block):
        return slab.at[row:row + block.shape[0]].set(block)

    p32 = put(p32, P_EMBED_B, params["embed_b"])
    p32 = put(p32, P_SN0_W, hp["sn0_w"])
    p32 = put(p32, P_SN0_B, hp["sn0_b"])
    for i, l in enumerate(L):
        pb = P_LAYER0 + i * P_LAYER_STRIDE
        p32 = put(p32, pb + PL_LN1_W, l["ln1_w"])
        p32 = put(p32, pb + PL_LN1_B, l["ln1_b"])
        p32 = put(p32, pb + PL_LN2_W, l["ln2_w"])
        p32 = put(p32, pb + PL_LN2_B, l["ln2_b"])
        p32 = put(p32, pb + PL_B3, l["fc3_b"])
        p32 = put(p32, pb + PL_B4, l["fc4_b"])
        b1 = jnp.broadcast_to(jnp.tile(l["fc1_b"].reshape(-1, 1), (B, 1)), (BHC, DIM))
        b2 = jnp.broadcast_to(jnp.tile(l["fc2_b"].reshape(-1, 1), (B, 1)), (BN, DIM))
        p32 = put(p32, pb + PL_B1, b1)
        p32 = put(p32, pb + PL_B2, b2)
    p32 = put(p32, P_DN_W, hp["dn_w"])
    p32 = put(p32, P_DN_B, hp["dn_b"])

    swsb = jnp.stack([hp["sw"], hp["sb"]], axis=0)      # (2, O, M, D)
    return {"w32": w32, "w64": w64, "p32": p32, "swsb": swsb}


# ------------------------- pure-JAX reference (check) ------------------------
def reference_forward(img, params):
    x = _mm(patchify(img, PATCH), params["embed_w"]) + params["embed_b"]
    for p in params["layers"]:
        h = _layernorm(x, p["ln1_w"], p["ln1_b"])
        h = jnp.transpose(h, (0, 2, 1))
        h = jax.nn.gelu(_mm(h, p["fc1_w"]) + p["fc1_b"], approximate=False)
        h = _mm(h, p["fc2_w"]) + p["fc2_b"]
        x = x + jnp.transpose(h, (0, 2, 1))
        h = _layernorm(x, p["ln2_w"], p["ln2_b"])
        h = jax.nn.gelu(_mm(h, p["fc3_w"]) + p["fc3_b"], approximate=False)
        x = x + (_mm(h, p["fc4_w"]) + p["fc4_b"])
    x = x.mean(axis=1)
    hp = params["head"]
    x = _layernorm(x, hp["sn0_w"], hp["sn0_b"])
    z = hp["sw"][None] * x[:, None, None, :] + hp["sb"][None]
    z = jax.nn.sigmoid(z)
    z = _layernorm(z, hp["dn_w"][None, None], hp["dn_b"][None, None], axes=(-2, -1))
    z = jax.nn.sigmoid(jnp.sum(z, axis=-1))
    z = jnp.sum(z, axis=-1)
    return jax.nn.softmax(z, axis=-1)


# ----------------------------------- main ------------------------------------
if __name__ == "__main__":
    root = jax.random.PRNGKey(0)
    k_img, k_params = jax.random.split(root)

    img = jax.random.normal(k_img, (BATCH, IN_CH, IMG, IMG), dtype=jnp.float32)
    params = init_params(k_params)
    packed = pack_params(params)

    out = jax.jit(dmixnet_forward)(img, packed)
    out = jax.block_until_ready(out)

    assert out.shape == (BATCH, NUM_CLASSES), out.shape
    ref = reference_forward(img, params)
    assert jnp.allclose(out, ref, rtol=2e-3, atol=2e-4), (out, ref)
    assert jnp.allclose(jnp.sum(out, axis=-1), 1.0, atol=1e-5)  # softmax rows

    print("KERNEL_OK")
</pallas_src>

<mosaic_0001>
module attributes {stable_mosaic.version = 11 : i64} {
  func.func @dmixnet_kernel(%arg0: memref<32x48xbf16, #tpu.memory_space<vmem>>, %arg1: memref<304x32xbf16, #tpu.memory_space<vmem>>, %arg2: memref<64x64xbf16, #tpu.memory_space<vmem>>, %arg3: memref<232x32xf32, #tpu.memory_space<vmem>>, %arg4: memref<2x10x5x32xf32, #tpu.memory_space<vmem>>, %arg5: memref<2x10xf32, #tpu.memory_space<vmem>>) attributes {dimension_semantics = [], scalar_prefetch = 0 : i64, scratch_operands = 0 : i64, tpu.core_type = #tpu.core_type<tc>} {
    %c0 = arith.constant 0 : index
    %c0_0 = arith.constant 0 : index
    %0 = vector.load %arg1[%c0, %c0_0] : memref<304x32xbf16, #tpu.memory_space<vmem>>, vector<48x32xbf16>
    %c0_1 = arith.constant 0 : index
    %c0_2 = arith.constant 0 : index
    %1 = vector.load %arg0[%c0_1, %c0_2] : memref<32x48xbf16, #tpu.memory_space<vmem>>, vector<32x48xbf16>
    %cst = arith.constant dense<0.000000e+00> : vector<32x32xf32>
    %2 = tpu.matmul %1, %0, %cst {dimension_numbers = #tpu.dot_dimension_numbers<[1], [0], [0], [1], [0, 0, 1, 1], [], []>} : vector<32x48xbf16>, vector<48x32xbf16>, vector<32x32xf32> -> vector<32x32xf32>
    %c0_3 = arith.constant 0 : index
    %c0_4 = arith.constant 0 : index
    %3 = vector.load %arg3[%c0_3, %c0_4] : memref<232x32xf32, #tpu.memory_space<vmem>>, vector<1x32xf32>
    %4 = vector.broadcast %3 : vector<1x32xf32> to vector<32x32xf32>
    %5 = arith.addf %2, %4 : vector<32x32xf32>
    %c8 = arith.constant 8 : index
    %c0_5 = arith.constant 0 : index
    %6 = vector.load %arg3[%c8, %c0_5] : memref<232x32xf32, #tpu.memory_space<vmem>>, vector<1x32xf32>
    %c9 = arith.constant 9 : index
    %c0_6 = arith.constant 0 : index
    %7 = vector.load %arg3[%c9, %c0_6] : memref<232x32xf32, #tpu.memory_space<vmem>>, vector<1x32xf32>
    %cst_7 = arith.constant dense<0.000000e+00> : vector<32xf32>
    %8 = vector.multi_reduction <add>, %5, %cst_7 [1] : vector<32x32xf32> to vector<32xf32>
    %9 = vector.shape_cast %8 : vector<32xf32> to vector<32x1xf32>
    %cst_8 = arith.constant 3.200000e+01 : f32
    %10 = vector.broadcast %cst_8 : f32 to vector<32x1xf32>
    %11 = arith.divf %9, %10 : vector<32x1xf32>
    %12 = vector.broadcast %11 : vector<32x1xf32> to vector<32x32xf32>
    %13 = arith.subf %5, %12 : vector<32x32xf32>
    %14 = arith.mulf %13, %13 : vector<32x32xf32>
    %cst_9 = arith.constant dense<0.000000e+00> : vector<32xf32>
    %15 = vector.multi_reduction <add>, %14, %cst_9 [1] : vector<32x32xf32> to vector<32xf32>
    %16 = vector.shape_cast %15 : vector<32xf32> to vector<32x1xf32>
    %cst_10 = arith.constant 3.200000e+01 : f32
    %17 = vector.broadcast %cst_10 : f32 to vector<32x1xf32>
    %18 = arith.divf %16, %17 : vector<32x1xf32>
    %19 = vector.broadcast %11 : vector<32x1xf32> to vector<32x32xf32>
    %20 = arith.subf %5, %19 : vector<32x32xf32>
    %cst_11 = arith.constant 9.99999974E-6 : f32
    %21 = vector.broadcast %cst_11 : f32 to vector<32x1xf32>
    %22 = arith.addf %18, %21 : vector<32x1xf32>
    %23 = math.rsqrt %22 : vector<32x1xf32>
    %24 = vector.broadcast %23 : vector<32x1xf32> to vector<32x32xf32>
    %25 = arith.mulf %20, %24 : vector<32x32xf32>
    %26 = vector.broadcast %6 : vector<1x32xf32> to vector<32x32xf32>
    %27 = arith.mulf %25, %26 : vector<32x32xf32>
    %28 = vector.broadcast %7 : vector<1x32xf32> to vector<32x32xf32>
    %29 = arith.addf %27, %28 : vector<32x32xf32>
    %c48 = arith.constant 48 : index
    %c0_12 = arith.constant 0 : index
    %30 = vector.load %arg1[%c48, %c0_12] : memref<304x32xbf16, #tpu.memory_space<vmem>>, vector<64x32xbf16>
    %31 = arith.truncf %29 : vector<32x32xf32> to vector<32x32xbf16>
    %cst_13 = arith.constant dense<0.000000e+00> : vector<64x32xf32>
    %32 = tpu.matmul %30, %31, %cst_13 {dimension_numbers = #tpu.dot_dimension_numbers<[1], [0], [0], [1], [0, 0, 1, 1], [], []>} : vector<64x32xbf16>, vector<32x32xbf16>, vector<64x32xf32> -> vector<64x32xf32>
    %c16 = arith.constant 16 : index
    %c0_14 = arith.constant 0 : index
    %33 = vector.load %arg3[%c16, %c0_14] : memref<232x32xf32, #tpu.memory_space<vmem>>, vector<64x32xf32>
    %34 = arith.addf %32, %33 : vector<64x32xf32>
    %cst_15 = arith.constant 5.000000e-01 : f32
    %35 = vector.broadcast %cst_15 : f32 to vector<64x32xf32>
    %36 = arith.mulf %35, %34 : vector<64x32xf32>
    %cst_16 = arith.constant 0.707106769 : f32
    %37 = vector.broadcast %cst_16 : f32 to vector<64x32xf32>
    %38 = arith.mulf %34, %37 : vector<64x32xf32>
    %39 = math.absf %38 : vector<64x32xf32>
    %cst_17 = arith.constant 0.327591091 : f32
    %40 = vector.broadcast %cst_17 : f32 to vector<64x32xf32>
    %41 = arith.mulf %40, %39 : vector<64x32xf32>
    %cst_18 = arith.constant 1.000000e+00 : f32
    %42 = vector.broadcast %cst_18 : f32 to vector<64x32xf32>
    %43 = arith.addf %42, %41 : vector<64x32xf32>
    %cst_19 = arith.constant 1.000000e+00 : f32
    %44 = vector.broadcast %cst_19 : f32 to vector<64x32xf32>
    %45 = arith.divf %44, %43 : vector<64x32xf32>
    %cst_20 = arith.constant 1.06140542 : f32
    %46 = vector.broadcast %cst_20 : f32 to vector<64x32xf32>
    %47 = arith.mulf %46, %45 : vector<64x32xf32>
    %cst_21 = arith.constant -1.45315206 : f32
    %48 = vector.broadcast %cst_21 : f32 to vector<64x32xf32>
    %49 = arith.addf %47, %48 : vector<64x32xf32>
    %50 = arith.mulf %49, %45 : vector<64x32xf32>
    %cst_22 = arith.constant 1.42141378 : f32
    %51 = vector.broadcast %cst_22 : f32 to vector<64x32xf32>
    %52 = arith.addf %50, %51 : vector<64x32xf32>
    %53 = arith.mulf %52, %45 : vector<64x32xf32>
    %cst_23 = arith.constant -0.284496725 : f32
    %54 = vector.broadcast %cst_23 : f32 to vector<64x32xf32>
    %55 = arith.addf %53, %54 : vector<64x32xf32>
    %56 = arith.mulf %55, %45 : vector<64x32xf32>
    %cst_24 = arith.constant 0.254829586 : f32
    %57 = vector.broadcast %cst_24 : f32 to vector<64x32xf32>
    %58 = arith.addf %56, %57 : vector<64x32xf32>
    %59 = arith.mulf %58, %45 : vector<64x32xf32>
    %cst_25 = arith.constant 0.000000e+00 : f32
    %60 = vector.broadcast %cst_25 : f32 to vector<64x32xf32>
    %61 = arith.subf %60, %39 : vector<64x32xf32>
    %62 = arith.mulf %61, %39 : vector<64x32xf32>
    %63 = math.exp %62 : vector<64x32xf32>
    %64 = arith.mulf %59, %63 : vector<64x32xf32>
    %cst_26 = arith.constant 1.000000e+00 : f32
    %65 = vector.broadcast %cst_26 : f32 to vector<64x32xf32>
    %66 = arith.subf %65, %64 : vector<64x32xf32>
    %cst_27 = arith.constant 0.000000e+00 : f32
    %67 = vector.broadcast %cst_27 : f32 to vector<64x32xf32>
    %68 = arith.cmpf oge, %38, %67 : vector<64x32xf32>
    %cst_28 = arith.constant 0.000000e+00 : f32
    %69 = vector.broadcast %cst_28 : f32 to vector<64x32xf32>
    %70 = arith.subf %69, %66 : vector<64x32xf32>
    %71 = arith.select %68, %66, %70 : vector<64x32xi1>, vector<64x32xf32>
    %cst_29 = arith.constant 1.000000e+00 : f32
    %72 = vector.broadcast %cst_29 : f32 to vector<64x32xf32>
    %73 = arith.addf %72, %71 : vector<64x32xf32>
    %74 = arith.mulf %36, %73 : vector<64x32xf32>
    %c0_30 = arith.constant 0 : index
    %c0_31 = arith.constant 0 : index
    %75 = vector.load %arg2[%c0_30, %c0_31] : memref<64x64xbf16, #tpu.memory_space<vmem>>, vector<32x64xbf16>
    %76 = arith.truncf %74 : vector<64x32xf32> to vector<64x32xbf16>
    %cst_32 = arith.constant dense<0.000000e+00> : vector<32x32xf32>
    %77 = tpu.matmul %75, %76, %cst_32 {dimension_numbers = #tpu.dot_dimension_numbers<[1], [0], [0], [1], [0, 0, 1, 1], [], []>} : vector<32x64xbf16>, vector<64x32xbf16>, vector<32x32xf32> -> vector<32x32xf32>
    %78 = arith.addf %5, %77 : vector<32x32xf32>
    %c80 = arith.constant 80 : index
    %c0_33 = arith.constant 0 : index
    %79 = vector.load %arg3[%c80, %c0_33] : memref<232x32xf32, #tpu.memory_space<vmem>>, vector<32x32xf32>
    %80 = arith.addf %78, %79 : vector<32x32xf32>
    %c10 = arith.constant 10 : index
    %c0_34 = arith.constant 0 : index
    %81 = vector.load %arg3[%c10, %c0_34] : memref<232x32xf32, #tpu.memory_space<vmem>>, vector<1x32xf32>
    %c11 = arith.constant 11 : index
    %c0_35 = arith.constant 0 : index
    %82 = vector.load %arg3[%c11, %c0_35] : memref<232x32xf32, #tpu.memory_space<vmem>>, vector<1x32xf32>
    %cst_36 = arith.constant dense<0.000000e+00> : vector<32xf32>
    %83 = vector.multi_reduction <add>, %80, %cst_36 [1] : vector<32x32xf32> to vector<32xf32>
    %84 = vector.shape_cast %83 : vector<32xf32> to vector<32x1xf32>
    %cst_37 = arith.constant 3.200000e+01 : f32
    %85 = vector.broadcast %cst_37 : f32 to vector<32x1xf32>
    %86 = arith.divf %84, %85 : vector<32x1xf32>
    %87 = vector.broadcast %86 : vector<32x1xf32> to vector<32x32xf32>
    %88 = arith.subf %80, %87 : vector<32x32xf32>
    %89 = arith.mulf %88, %88 : vector<32x32xf32>
    %cst_38 = arith.constant dense<0.000000e+00> : vector<32xf32>
    %90 = vector.multi_reduction <add>, %89, %cst_38 [1] : vector<32x32xf32> to vector<32xf32>
    %91 = vector.shape_cast %90 : vector<32xf32> to vector<32x1xf32>
    %cst_39 = arith.constant 3.200000e+01 : f32
    %92 = vector.broadcast %cst_39 : f32 to vector<32x1xf32>
    %93 = arith.divf %91, %92 : vector<32x1xf32>
    %94 = vector.broadcast %86 : vector<32x1xf32> to vector<32x32xf32>
    %95 = arith.subf %80, %94 : vector<32x32xf32>
    %cst_40 = arith.constant 9.99999974E-6 : f32
    %96 = vector.broadcast %cst_40 : f32 to vector<32x1xf32>
    %97 = arith.addf %93, %96 : vector<32x1xf32>
    %98 = math.rsqrt %97 : vector<32x1xf32>
    %99 = vector.broadcast %98 : vector<32x1xf32> to vector<32x32xf32>
    %100 = arith.mulf %95, %99 : vector<32x32xf32>
    %101 = vector.broadcast %81 : vector<1x32xf32> to vector<32x32xf32>
    %102 = arith.mulf %100, %101 : vector<32x32xf32>
    %103 = vector.broadcast %82 : vector<1x32xf32> to vector<32x32xf32>
    %104 = arith.addf %102, %103 : vector<32x32xf32>
    %c112 = arith.constant 112 : index
    %c0_41 = arith.constant 0 : index
    %105 = vector.load %arg1[%c112, %c0_41] : memref<304x32xbf16, #tpu.memory_space<vmem>>, vector<32x32xbf16>
    %106 = arith.truncf %104 : vector<32x32xf32> to vector<32x32xbf16>
    %cst_42 = arith.constant dense<0.000000e+00> : vector<32x32xf32>
    %107 = tpu.matmul %106, %105, %cst_42 {dimension_numbers = #tpu.dot_dimension_numbers<[1], [0], [0], [1], [0, 0, 1, 1], [], []>} : vector<32x32xbf16>, vector<32x32xbf16>, vector<32x32xf32> -> vector<32x32xf32>
    %c12 = arith.constant 12 : index
    %c0_43 = arith.constant 0 : index
    %108 = vector.load %arg3[%c12, %c0_43] : memref<232x32xf32, #tpu.memory_space<vmem>>, vector<1x32xf32>
    %109 = vector.broadcast %108 : vector<1x32xf32> to vector<32x32xf32>
    %110 = arith.addf %107, %109 : vector<32x32xf32>
    %cst_44 = arith.constant 5.000000e-01 : f32
    %111 = vector.broadcast %cst_44 : f32 to vector<32x32xf32>
    %112 = arith.mulf %111, %110 : vector<32x32xf32>
    %cst_45 = arith.constant 0.707106769 : f32
    %113 = vector.broadcast %cst_45 : f32 to vector<32x32xf32>
    %114 = arith.mulf %110, %113 : vector<32x32xf32>
    %115 = math.absf %114 : vector<32x32xf32>
    %cst_46 = arith.constant 0.327591091 : f32
    %116 = vector.broadcast %cst_46 : f32 to vector<32x32xf32>
    %117 = arith.mulf %116, %115 : vector<32x32xf32>
    %cst_47 = arith.constant 1.000000e+00 : f32
    %118 = vector.broadcast %cst_47 : f32 to vector<32x32xf32>
    %119 = arith.addf %118, %117 : vector<32x32xf32>
    %cst_48 = arith.constant 1.000000e+00 : f32
    %120 = vector.broadcast %cst_48 : f32 to vector<32x32xf32>
    %121 = arith.divf %120, %119 : vector<32x32xf32>
    %cst_49 = arith.constant 1.06140542 : f32
    %122 = vector.broadcast %cst_49 : f32 to vector<32x32xf32>
    %123 = arith.mulf %122, %121 : vector<32x32xf32>
    %cst_50 = arith.constant -1.45315206 : f32
    %124 = vector.broadcast %cst_50 : f32 to vector<32x32xf32>
    %125 = arith.addf %123, %124 : vector<32x32xf32>
    %126 = arith.mulf %125, %121 : vector<32x32xf32>
    %cst_51 = arith.constant 1.42141378 : f32
    %127 = vector.broadcast %cst_51 : f32 to vector<32x32xf32>
    %128 = arith.addf %126, %127 : vector<32x32xf32>
    %129 = arith.mulf %128, %121 : vector<32x32xf32>
    %cst_52 = arith.constant -0.284496725 : f32
    %130 = vector.broadcast %cst_52 : f32 to vector<32x32xf32>
    %131 = arith.addf %129, %130 : vector<32x32xf32>
    %132 = arith.mulf %131, %121 : vector<32x32xf32>
    %cst_53 = arith.constant 0.254829586 : f32
    %133 = vector.broadcast %cst_53 : f32 to vector<32x32xf32>
    %134 = arith.addf %132, %133 : vector<32x32xf32>
    %135 = arith.mulf %134, %121 : vector<32x32xf32>
    %cst_54 = arith.constant 0.000000e+00 : f32
    %136 = vector.broadcast %cst_54 : f32 to vector<32x32xf32>
    %137 = arith.subf %136, %115 : vector<32x32xf32>
    %138 = arith.mulf %137, %115 : vector<32x32xf32>
    %139 = math.exp %138 : vector<32x32xf32>
    %140 = arith.mulf %135, %139 : vector<32x32xf32>
    %cst_55 = arith.constant 1.000000e+00 : f32
    %141 = vector.broadcast %cst_55 : f32 to vector<32x32xf32>
    %142 = arith.subf %141, %140 : vector<32x32xf32>
    %cst_56 = arith.constant 0.000000e+00 : f32
    %143 = vector.broadcast %cst_56 : f32 to vector<32x32xf32>
    %144 = arith.cmpf oge, %114, %143 : vector<32x32xf32>
    %cst_57 = arith.constant 0.000000e+00 : f32
    %145 = vector.broadcast %cst_57 : f32 to vector<32x32xf32>
    %146 = arith.subf %145, %142 : vector<32x32xf32>
    %147 = arith.select %144, %142, %146 : vector<32x32xi1>, vector<32x32xf32>
    %cst_58 = arith.constant 1.000000e+00 : f32
    %148 = vector.broadcast %cst_58 : f32 to vector<32x32xf32>
    %149 = arith.addf %148, %147 : vector<32x32xf32>
    %150 = arith.mulf %112, %149 : vector<32x32xf32>
    %c144 = arith.constant 144 : index
    %c0_59 = arith.constant 0 : index
    %151 = vector.load %arg1[%c144, %c0_59] : memref<304x32xbf16, #tpu.memory_space<vmem>>, vector<32x32xbf16>
    %152 = arith.truncf %150 : vector<32x32xf32> to vector<32x32xbf16>
    %cst_60 = arith.constant dense<0.000000e+00> : vector<32x32xf32>
    %153 = tpu.matmul %152, %151, %cst_60 {dimension_numbers = #tpu.dot_dimension_numbers<[1], [0], [0], [1], [0, 0, 1, 1], [], []>} : vector<32x32xbf16>, vector<32x32xbf16>, vector<32x32xf32> -> vector<32x32xf32>
    %154 = arith.addf %80, %153 : vector<32x32xf32>
    %c13 = arith.constant 13 : index
    %c0_61 = arith.constant 0 : index
    %155 = vector.load %arg3[%c13, %c0_61] : memref<232x32xf32, #tpu.memory_space<vmem>>, vector<1x32xf32>
    %156 = vector.broadcast %155 : vector<1x32xf32> to vector<32x32xf32>
    %157 = arith.addf %154, %156 : vector<32x32xf32>
    %c112_62 = arith.constant 112 : index
    %c0_63 = arith.constant 0 : index
    %158 = vector.load %arg3[%c112_62, %c0_63] : memref<232x32xf32, #tpu.memory_space<vmem>>, vector<1x32xf32>
    %c113 = arith.constant 113 : index
    %c0_64 = arith.constant 0 : index
    %159 = vector.load %arg3[%c113, %c0_64] : memref<232x32xf32, #tpu.memory_space<vmem>>, vector<1x32xf32>
    %cst_65 = arith.constant dense<0.000000e+00> : vector<32xf32>
    %160 = vector.multi_reduction <add>, %157, %cst_65 [1] : vector<32x32xf32> to vector<32xf32>
    %161 = vector.shape_cast %160 : vector<32xf32> to vector<32x1xf32>
    %cst_66 = arith.constant 3.200000e+01 : f32
    %162 = vector.broadcast %cst_66 : f32 to vector<32x1xf32>
    %163 = arith.divf %161, %162 : vector<32x1xf32>
    %164 = vector.broadcast %163 : vector<32x1xf32> to vector<32x32xf32>
    %165 = arith.subf %157, %164 : vector<32x32xf32>
    %166 = arith.mulf %165, %165 : vector<32x32xf32>
    %cst_67 = arith.constant dense<0.000000e+00> : vector<32xf32>
    %167 = vector.multi_reduction <add>, %166, %cst_67 [1] : vector<32x32xf32> to vector<32xf32>
    %168 = vector.shape_cast %167 : vector<32xf32> to vector<32x1xf32>
    %cst_68 = arith.constant 3.200000e+01 : f32
    %169 = vector.broadcast %cst_68 : f32 to vector<32x1xf32>
    %170 = arith.divf %168, %169 : vector<32x1xf32>
    %171 = vector.broadcast %163 : vector<32x1xf32> to vector<32x32xf32>
    %172 = arith.subf %157, %171 : vector<32x32xf32>
    %cst_69 = arith.constant 9.99999974E-6 : f32
    %173 = vector.broadcast %cst_69 : f32 to vector<32x1xf32>
    %174 = arith.addf %170, %173 : vector<32x1xf32>
    %175 = math.rsqrt %174 : vector<32x1xf32>
    %176 = vector.broadcast %175 : vector<32x1xf32> to vector<32x32xf32>
    %177 = arith.mulf %172, %176 : vector<32x32xf32>
    %178 = vector.broadcast %158 : vector<1x32xf32> to vector<32x32xf32>
    %179 = arith.mulf %177, %178 : vector<32x32xf32>
    %180 = vector.broadcast %159 : vector<1x32xf32> to vector<32x32xf32>
    %181 = arith.addf %179, %180 : vector<32x32xf32>
    %c176 = arith.constant 176 : index
    %c0_70 = arith.constant 0 : index
    %182 = vector.load %arg1[%c176, %c0_70] : memref<304x32xbf16, #tpu.memory_space<vmem>>, vector<64x32xbf16>
    %183 = arith.truncf %181 : vector<32x32xf32> to vector<32x32xbf16>
    %cst_71 = arith.constant dense<0.000000e+00> : vector<64x32xf32>
    %184 = tpu.matmul %182, %183, %cst_71 {dimension_numbers = #tpu.dot_dimension_numbers<[1], [0], [0], [1], [0, 0, 1, 1], [], []>} : vector<64x32xbf16>, vector<32x32xbf16>, vector<64x32xf32> -> vector<64x32xf32>
    %c120 = arith.constant 120 : index
    %c0_72 = arith.constant 0 : index
    %185 = vector.load %arg3[%c120, %c0_72] : memref<232x32xf32, #tpu.memory_space<vmem>>, vector<64x32xf32>
    %186 = arith.addf %184, %185 : vector<64x32xf32>
    %cst_73 = arith.constant 5.000000e-01 : f32
    %187 = vector.broadcast %cst_73 : f32 to vector<64x32xf32>
    %188 = arith.mulf %187, %186 : vector<64x32xf32>
    %cst_74 = arith.constant 0.707106769 : f32
    %189 = vector.broadcast %cst_74 : f32 to vector<64x32xf32>
    %190 = arith.mulf %186, %189 : vector<64x32xf32>
    %191 = math.absf %190 : vector<64x32xf32>
    %cst_75 = arith.constant 0.327591091 : f32
    %192 = vector.broadcast %cst_75 : f32 to vector<64x32xf32>
    %193 = arith.mulf %192, %191 : vector<64x32xf32>
    %cst_76 = arith.constant 1.000000e+00 : f32
    %194 = vector.broadcast %cst_76 : f32 to vector<64x32xf32>
    %195 = arith.addf %194, %193 : vector<64x32xf32>
    %cst_77 = arith.constant 1.000000e+00 : f32
    %196 = vector.broadcast %cst_77 : f32 to vector<64x32xf32>
    %197 = arith.divf %196, %195 : vector<64x32xf32>
    %cst_78 = arith.constant 1.06140542 : f32
    %198 = vector.broadcast %cst_78 : f32 to vector<64x32xf32>
    %199 = arith.mulf %198, %197 : vector<64x32xf32>
    %cst_79 = arith.constant -1.45315206 : f32
    %200 = vector.broadcast %cst_79 : f32 to vector<64x32xf32>
    %201 = arith.addf %199, %200 : vector<64x32xf32>
    %202 = arith.mulf %201, %197 : vector<64x32xf32>
    %cst_80 = arith.constant 1.42141378 : f32
    %203 = vector.broadcast %cst_80 : f32 to vector<64x32xf32>
    %204 = arith.addf %202, %203 : vector<64x32xf32>
    %205 = arith.mulf %204, %197 : vector<64x32xf32>
    %cst_81 = arith.constant -0.284496725 : f32
    %206 = vector.broadcast %cst_81 : f32 to vector<64x32xf32>
    %207 = arith.addf %205, %206 : vector<64x32xf32>
    %208 = arith.mulf %207, %197 : vector<64x32xf32>
    %cst_82 = arith.constant 0.254829586 : f32
    %209 = vector.broadcast %cst_82 : f32 to vector<64x32xf32>
    %210 = arith.addf %208, %209 : vector<64x32xf32>
    %211 = arith.mulf %210, %197 : vector<64x32xf32>
    %cst_83 = arith.constant 0.000000e+00 : f32
    %212 = vector.broadcast %cst_83 : f32 to vector<64x32xf32>
    %213 = arith.subf %212, %191 : vector<64x32xf32>
    %214 = arith.mulf %213, %191 : vector<64x32xf32>
    %215 = math.exp %214 : vector<64x32xf32>
    %216 = arith.mulf %211, %215 : vector<64x32xf32>
    %cst_84 = arith.constant 1.000000e+00 : f32
    %217 = vector.broadcast %cst_84 : f32 to vector<64x32xf32>
    %218 = arith.subf %217, %216 : vector<64x32xf32>
    %cst_85 = arith.constant 0.000000e+00 : f32
    %219 = vector.broadcast %cst_85 : f32 to vector<64x32xf32>
    %220 = arith.cmpf oge, %190, %219 : vector<64x32xf32>
    %cst_86 = arith.constant 0.000000e+00 : f32
    %221 = vector.broadcast %cst_86 : f32 to vector<64x32xf32>
    %222 = arith.subf %221, %218 : vector<64x32xf32>
    %223 = arith.select %220, %218, %222 : vector<64x32xi1>, vector<64x32xf32>
    %cst_87 = arith.constant 1.000000e+00 : f32
    %224 = vector.broadcast %cst_87 : f32 to vector<64x32xf32>
    %225 = arith.addf %224, %223 : vector<64x32xf32>
    %226 = arith.mulf %188, %225 : vector<64x32xf32>
    %c32 = arith.constant 32 : index
    %c0_88 = arith.constant 0 : index
    %227 = vector.load %arg2[%c32, %c0_88] : memref<64x64xbf16, #tpu.memory_space<vmem>>, vector<32x64xbf16>
    %228 = arith.truncf %226 : vector<64x32xf32> to vector<64x32xbf16>
    %cst_89 = arith.constant dense<0.000000e+00> : vector<32x32xf32>
    %229 = tpu.matmul %227, %228, %cst_89 {dimension_numbers = #tpu.dot_dimension_numbers<[1], [0], [0], [1], [0, 0, 1, 1], [], []>} : vector<32x64xbf16>, vector<64x32xbf16>, vector<32x32xf32> -> vector<32x32xf32>
    %230 = arith.addf %157, %229 : vector<32x32xf32>
    %c184 = arith.constant 184 : index
    %c0_90 = arith.constant 0 : index
    %231 = vector.load %arg3[%c184, %c0_90] : memref<232x32xf32, #tpu.memory_space<vmem>>, vector<32x32xf32>
    %232 = arith.addf %230, %231 : vector<32x32xf32>
    %c114 = arith.constant 114 : index
    %c0_91 = arith.constant 0 : index
    %233 = vector.load %arg3[%c114, %c0_91] : memref<232x32xf32, #tpu.memory_space<vmem>>, vector<1x32xf32>
    %c115 = arith.constant 115 : index
    %c0_92 = arith.constant 0 : index
    %234 = vector.load %arg3[%c115, %c0_92] : memref<232x32xf32, #tpu.memory_space<vmem>>, vector<1x32xf32>
    %cst_93 = arith.constant dense<0.000000e+00> : vector<32xf32>
    %235 = vector.multi_reduction <add>, %232, %cst_93 [1] : vector<32x32xf32> to vector<32xf32>
    %236 = vector.shape_cast %235 : vector<32xf32> to vector<32x1xf32>
    %cst_94 = arith.constant 3.200000e+01 : f32
    %237 = vector.broadcast %cst_94 : f32 to vector<32x1xf32>
    %238 = arith.divf %236, %237 : vector<32x1xf32>
    %239 = vector.broadcast %238 : vector<32x1xf32> to vector<32x32xf32>
    %240 = arith.subf %232, %239 : vector<32x32xf32>
    %241 = arith.mulf %240, %240 : vector<32x32xf32>
    %cst_95 = arith.constant dense<0.000000e+00> : vector<32xf32>
    %242 = vector.multi_reduction <add>, %241, %cst_95 [1] : vector<32x32xf32> to vector<32xf32>
    %243 = vector.shape_cast %242 : vector<32xf32> to vector<32x1xf32>
    %cst_96 = arith.constant 3.200000e+01 : f32
    %244 = vector.broadcast %cst_96 : f32 to vector<32x1xf32>
    %245 = arith.divf %243, %244 : vector<32x1xf32>
    %246 = vector.broadcast %238 : vector<32x1xf32> to vector<32x32xf32>
    %247 = arith.subf %232, %246 : vector<32x32xf32>
    %cst_97 = arith.constant 9.99999974E-6 : f32
    %248 = vector.broadcast %cst_97 : f32 to vector<32x1xf32>
    %249 = arith.addf %245, %248 : vector<32x1xf32>
    %250 = math.rsqrt %249 : vector<32x1xf32>
    %251 = vector.broadcast %250 : vector<32x1xf32> to vector<32x32xf32>
    %252 = arith.mulf %247, %251 : vector<32x32xf32>
    %253 = vector.broadcast %233 : vector<1x32xf32> to vector<32x32xf32>
    %254 = arith.mulf %252, %253 : vector<32x32xf32>
    %255 = vector.broadcast %234 : vector<1x32xf32> to vector<32x32xf32>
    %256 = arith.addf %254, %255 : vector<32x32xf32>
    %c240 = arith.constant 240 : index
    %c0_98 = arith.constant 0 : index
    %257 = vector.load %arg1[%c240, %c0_98] : memref<304x32xbf16, #tpu.memory_space<vmem>>, vector<32x32xbf16>
    %258 = arith.truncf %256 : vector<32x32xf32> to vector<32x32xbf16>
    %cst_99 = arith.constant dense<0.000000e+00> : vector<32x32xf32>
    %259 = tpu.matmul %258, %257, %cst_99 {dimension_numbers = #tpu.dot_dimension_numbers<[1], [0], [0], [1], [0, 0, 1, 1], [], []>} : vector<32x32xbf16>, vector<32x32xbf16>, vector<32x32xf32> -> vector<32x32xf32>
    %c116 = arith.constant 116 : index
    %c0_100 = arith.constant 0 : index
    %260 = vector.load %arg3[%c116, %c0_100] : memref<232x32xf32, #tpu.memory_space<vmem>>, vector<1x32xf32>
    %261 = vector.broadcast %260 : vector<1x32xf32> to vector<32x32xf32>
    %262 = arith.addf %259, %261 : vector<32x32xf32>
    %cst_101 = arith.constant 5.000000e-01 : f32
    %263 = vector.broadcast %cst_101 : f32 to vector<32x32xf32>
    %264 = arith.mulf %263, %262 : vector<32x32xf32>
    %cst_102 = arith.constant 0.707106769 : f32
    %265 = vector.broadcast %cst_102 : f32 to vector<32x32xf32>
    %266 = arith.mulf %262, %265 : vector<32x32xf32>
    %267 = math.absf %266 : vector<32x32xf32>
    %cst_103 = arith.constant 0.327591091 : f32
    %268 = vector.broadcast %cst_103 : f32 to vector<32x32xf32>
    %269 = arith.mulf %268, %267 : vector<32x32xf32>
    %cst_104 = arith.constant 1.000000e+00 : f32
    %270 = vector.broadcast %cst_104 : f32 to vector<32x32xf32>
    %271 = arith.addf %270, %269 : vector<32x32xf32>
    %cst_105 = arith.constant 1.000000e+00 : f32
    %272 = vector.broadcast %cst_105 : f32 to vector<32x32xf32>
    %273 = arith.divf %272, %271 : vector<32x32xf32>
    %cst_106 = arith.constant 1.06140542 : f32
    %274 = vector.broadcast %cst_106 : f32 to vector<32x32xf32>
    %275 = arith.mulf %274, %273 : vector<32x32xf32>
    %cst_107 = arith.constant -1.45315206 : f32
    %276 = vector.broadcast %cst_107 : f32 to vector<32x32xf32>
    %277 = arith.addf %275, %276 : vector<32x32xf32>
    %278 = arith.mulf %277, %273 : vector<32x32xf32>
    %cst_108 = arith.constant 1.42141378 : f32
    %279 = vector.broadcast %cst_108 : f32 to vector<32x32xf32>
    %280 = arith.addf %278, %279 : vector<32x32xf32>
    %281 = arith.mulf %280, %273 : vector<32x32xf32>
    %cst_109 = arith.constant -0.284496725 : f32
    %282 = vector.broadcast %cst_109 : f32 to vector<32x32xf32>
    %283 = arith.addf %281, %282 : vector<32x32xf32>
    %284 = arith.mulf %283, %273 : vector<32x32xf32>
    %cst_110 = arith.constant 0.254829586 : f32
    %285 = vector.broadcast %cst_110 : f32 to vector<32x32xf32>
    %286 = arith.addf %284, %285 : vector<32x32xf32>
    %287 = arith.mulf %286, %273 : vector<32x32xf32>
    %cst_111 = arith.constant 0.000000e+00 : f32
    %288 = vector.broadcast %cst_111 : f32 to vector<32x32xf32>
    %289 = arith.subf %288, %267 : vector<32x32xf32>
    %290 = arith.mulf %289, %267 : vector<32x32xf32>
    %291 = math.exp %290 : vector<32x32xf32>
    %292 = arith.mulf %287, %291 : vector<32x32xf32>
    %cst_112 = arith.constant 1.000000e+00 : f32
    %293 = vector.broadcast %cst_112 : f32 to vector<32x32xf32>
    %294 = arith.subf %293, %292 : vector<32x32xf32>
    %cst_113 = arith.constant 0.000000e+00 : f32
    %295 = vector.broadcast %cst_113 : f32 to vector<32x32xf32>
    %296 = arith.cmpf oge, %266, %295 : vector<32x32xf32>
    %cst_114 = arith.constant 0.000000e+00 : f32
    %297 = vector.broadcast %cst_114 : f32 to vector<32x32xf32>
    %298 = arith.subf %297, %294 : vector<32x32xf32>
    %299 = arith.select %296, %294, %298 : vector<32x32xi1>, vector<32x32xf32>
    %cst_115 = arith.constant 1.000000e+00 : f32
    %300 = vector.broadcast %cst_115 : f32 to vector<32x32xf32>
    %301 = arith.addf %300, %299 : vector<32x32xf32>
    %302 = arith.mulf %264, %301 : vector<32x32xf32>
    %c272 = arith.constant 272 : index
    %c0_116 = arith.constant 0 : index
    %303 = vector.load %arg1[%c272, %c0_116] : memref<304x32xbf16, #tpu.memory_space<vmem>>, vector<32x32xbf16>
    %304 = arith.truncf %302 : vector<32x32xf32> to vector<32x32xbf16>
    %cst_117 = arith.constant dense<0.000000e+00> : vector<32x32xf32>
    %305 = tpu.matmul %304, %303, %cst_117 {dimension_numbers = #tpu.dot_dimension_numbers<[1], [0], [0], [1], [0, 0, 1, 1], [], []>} : vector<32x32xbf16>, vector<32x32xbf16>, vector<32x32xf32> -> vector<32x32xf32>
    %306 = arith.addf %232, %305 : vector<32x32xf32>
    %c117 = arith.constant 117 : index
    %c0_118 = arith.constant 0 : index
    %307 = vector.load %arg3[%c117, %c0_118] : memref<232x32xf32, #tpu.memory_space<vmem>>, vector<1x32xf32>
    %308 = vector.broadcast %307 : vector<1x32xf32> to vector<32x32xf32>
    %309 = arith.addf %306, %308 : vector<32x32xf32>
    %310 = vector.shape_cast %309 : vector<32x32xf32> to vector<2x16x32xf32>
    %cst_119 = arith.constant dense<0.000000e+00> : vector<2x32xf32>
    %311 = vector.multi_reduction <add>, %310, %cst_119 [1] : vector<2x16x32xf32> to vector<2x32xf32>
    %cst_120 = arith.constant 1.600000e+01 : f32
    %312 = vector.broadcast %cst_120 : f32 to vector<2x32xf32>
    %313 = arith.divf %311, %312 : vector<2x32xf32>
    %c1 = arith.constant 1 : index
    %c0_121 = arith.constant 0 : index
    %314 = vector.load %arg3[%c1, %c0_121] : memref<232x32xf32, #tpu.memory_space<vmem>>, vector<1x32xf32>
    %c2 = arith.constant 2 : index
    %c0_122 = arith.constant 0 : index
    %315 = vector.load %arg3[%c2, %c0_122] : memref<232x32xf32, #tpu.memory_space<vmem>>, vector<1x32xf32>
    %cst_123 = arith.constant dense<0.000000e+00> : vector<2xf32>
    %316 = vector.multi_reduction <add>, %313, %cst_123 [1] : vector<2x32xf32> to vector<2xf32>
    %317 = vector.shape_cast %316 : vector<2xf32> to vector<2x1xf32>
    %cst_124 = arith.constant 3.200000e+01 : f32
    %318 = vector.broadcast %cst_124 : f32 to vector<2x1xf32>
    %319 = arith.divf %317, %318 : vector<2x1xf32>
    %320 = vector.broadcast %319 : vector<2x1xf32> to vector<2x32xf32>
    %321 = arith.subf %313, %320 : vector<2x32xf32>
    %322 = arith.mulf %321, %321 : vector<2x32xf32>
    %cst_125 = arith.constant dense<0.000000e+00> : vector<2xf32>
    %323 = vector.multi_reduction <add>, %322, %cst_125 [1] : vector<2x32xf32> to vector<2xf32>
    %324 = vector.shape_cast %323 : vector<2xf32> to vector<2x1xf32>
    %cst_126 = arith.constant 3.200000e+01 : f32
    %325 = vector.broadcast %cst_126 : f32 to vector<2x1xf32>
    %326 = arith.divf %324, %325 : vector<2x1xf32>
    %327 = vector.broadcast %319 : vector<2x1xf32> to vector<2x32xf32>
    %328 = arith.subf %313, %327 : vector<2x32xf32>
    %cst_127 = arith.constant 9.99999974E-6 : f32
    %329 = vector.broadcast %cst_127 : f32 to vector<2x1xf32>
    %330 = arith.addf %326, %329 : vector<2x1xf32>
    %331 = math.rsqrt %330 : vector<2x1xf32>
    %332 = vector.broadcast %331 : vector<2x1xf32> to vector<2x32xf32>
    %333 = arith.mulf %328, %332 : vector<2x32xf32>
    %334 = vector.broadcast %314 : vector<1x32xf32> to vector<2x32xf32>
    %335 = arith.mulf %333, %334 : vector<2x32xf32>
    %336 = vector.broadcast %315 : vector<1x32xf32> to vector<2x32xf32>
    %337 = arith.addf %335, %336 : vector<2x32xf32>
    %c0_128 = arith.constant 0 : index
    %c0_129 = arith.constant 0 : index
    %c0_130 = arith.constant 0 : index
    %c0_131 = arith.constant 0 : index
    %338 = vector.load %arg4[%c0_128, %c0_129, %c0_130, %c0_131] : memref<2x10x5x32xf32, #tpu.memory_space<vmem>>, vector<1x10x5x32xf32>
    %339 = vector.shape_cast %338 : vector<1x10x5x32xf32> to vector<10x5x32xf32>
    %c1_132 = arith.constant 1 : index
    %c0_133 = arith.constant 0 : index
    %c0_134 = arith.constant 0 : index
    %c0_135 = arith.constant 0 : index
    %340 = vector.load %arg4[%c1_132, %c0_133, %c0_134, %c0_135] : memref<2x10x5x32xf32, #tpu.memory_space<vmem>>, vector<1x10x5x32xf32>
    %341 = vector.shape_cast %340 : vector<1x10x5x32xf32> to vector<10x5x32xf32>
    %342 = vector.shape_cast %339 : vector<10x5x32xf32> to vector<1x10x5x32xf32>
    %343 = vector.shape_cast %337 : vector<2x32xf32> to vector<2x1x1x32xf32>
    %344 = vector.broadcast %342 : vector<1x10x5x32xf32> to vector<2x10x5x32xf32>
    %345 = vector.broadcast %343 : vector<2x1x1x32xf32> to vector<2x10x5x32xf32>
    %346 = arith.mulf %344, %345 : vector<2x10x5x32xf32>
    %347 = vector.shape_cast %341 : vector<10x5x32xf32> to vector<1x10x5x32xf32>
    %348 = vector.broadcast %347 : vector<1x10x5x32xf32> to vector<2x10x5x32xf32>
    %349 = arith.addf %346, %348 : vector<2x10x5x32xf32>
    %350 = arith.negf %349 : vector<2x10x5x32xf32>
    %351 = math.exp %350 : vector<2x10x5x32xf32>
    %cst_136 = arith.constant 1.000000e+00 : f32
    %352 = vector.broadcast %cst_136 : f32 to vector<2x10x5x32xf32>
    %353 = arith.addf %352, %351 : vector<2x10x5x32xf32>
    %354 = arith.divf %352, %353 : vector<2x10x5x32xf32>
    %cst_137 = arith.constant dense<0.000000e+00> : vector<2x10x5xf32>
    %355 = vector.multi_reduction <add>, %354, %cst_137 [3] : vector<2x10x5x32xf32> to vector<2x10x5xf32>
    %356 = vector.shape_cast %355 : vector<2x10x5xf32> to vector<2x10x5x1xf32>
    %cst_138 = arith.constant dense<0.000000e+00> : vector<2x10x1xf32>
    %357 = vector.multi_reduction <add>, %356, %cst_138 [2] : vector<2x10x5x1xf32> to vector<2x10x1xf32>
    %358 = vector.shape_cast %357 : vector<2x10x1xf32> to vector<2x10x1x1xf32>
    %cst_139 = arith.constant 1.600000e+02 : f32
    %359 = vector.broadcast %cst_139 : f32 to vector<2x10x1x1xf32>
    %360 = arith.divf %358, %359 : vector<2x10x1x1xf32>
    %361 = vector.broadcast %360 : vector<2x10x1x1xf32> to vector<2x10x5x32xf32>
    %362 = arith.subf %354, %361 : vector<2x10x5x32xf32>
    %363 = arith.mulf %362, %362 : vector<2x10x5x32xf32>
    %cst_140 = arith.constant dense<0.000000e+00> : vector<2x10x5xf32>
    %364 = vector.multi_reduction <add>, %363, %cst_140 [3] : vector<2x10x5x32xf32> to vector<2x10x5xf32>
    %365 = vector.shape_cast %364 : vector<2x10x5xf32> to vector<2x10x5x1xf32>
    %cst_141 = arith.constant dense<0.000000e+00> : vector<2x10x1xf32>
    %366 = vector.multi_reduction <add>, %365, %cst_141 [2] : vector<2x10x5x1xf32> to vector<2x10x1xf32>
    %367 = vector.shape_cast %366 : vector<2x10x1xf32> to vector<2x10x1x1xf32>
    %cst_142 = arith.constant 1.600000e+02 : f32
    %368 = vector.broadcast %cst_142 : f32 to vector<2x10x1x1xf32>
    %369 = arith.divf %367, %368 : vector<2x10x1x1xf32>
    %cst_143 = arith.constant 9.99999974E-6 : f32
    %370 = vector.broadcast %cst_143 : f32 to vector<2x10x1x1xf32>
    %371 = arith.addf %369, %370 : vector<2x10x1x1xf32>
    %372 = math.rsqrt %371 : vector<2x10x1x1xf32>
    %c216 = arith.constant 216 : index
    %c0_144 = arith.constant 0 : index
    %373 = vector.load %arg3[%c216, %c0_144] : memref<232x32xf32, #tpu.memory_space<vmem>>, vector<5x32xf32>
    %c224 = arith.constant 224 : index
    %c0_145 = arith.constant 0 : index
    %374 = vector.load %arg3[%c224, %c0_145] : memref<232x32xf32, #tpu.memory_space<vmem>>, vector<5x32xf32>
    %375 = vector.broadcast %372 : vector<2x10x1x1xf32> to vector<2x10x5x32xf32>
    %376 = arith.mulf %362, %375 : vector<2x10x5x32xf32>
    %377 = vector.shape_cast %373 : vector<5x32xf32> to vector<1x1x5x32xf32>
    %378 = vector.broadcast %377 : vector<1x1x5x32xf32> to vector<2x10x5x32xf32>
    %379 = arith.mulf %376, %378 : vector<2x10x5x32xf32>
    %380 = vector.shape_cast %374 : vector<5x32xf32> to vector<1x1x5x32xf32>
    %381 = vector.broadcast %380 : vector<1x1x5x32xf32> to vector<2x10x5x32xf32>
    %382 = arith.addf %379, %381 : vector<2x10x5x32xf32>
    %cst_146 = arith.constant dense<0.000000e+00> : vector<2x10x5xf32>
    %383 = vector.multi_reduction <add>, %382, %cst_146 [3] : vector<2x10x5x32xf32> to vector<2x10x5xf32>
    %384 = arith.negf %383 : vector<2x10x5xf32>
    %385 = math.exp %384 : vector<2x10x5xf32>
    %cst_147 = arith.constant 1.000000e+00 : f32
    %386 = vector.broadcast %cst_147 : f32 to vector<2x10x5xf32>
    %387 = arith.addf %386, %385 : vector<2x10x5xf32>
    %388 = arith.divf %386, %387 : vector<2x10x5xf32>
    %cst_148 = arith.constant dense<0.000000e+00> : vector<2x10xf32>
    %389 = vector.multi_reduction <add>, %388, %cst_148 [2] : vector<2x10x5xf32> to vector<2x10xf32>
    %cst_149 = arith.constant dense<0xFF800000> : vector<2xf32>
    %390 = vector.multi_reduction <maximumf>, %389, %cst_149 [1] : vector<2x10xf32> to vector<2xf32>
    %391 = vector.shape_cast %390 : vector<2xf32> to vector<2x1xf32>
    %392 = vector.broadcast %391 : vector<2x1xf32> to vector<2x10xf32>
    %393 = arith.subf %389, %392 : vector<2x10xf32>
    %394 = math.exp %393 : vector<2x10xf32>
    %cst_150 = arith.constant dense<0.000000e+00> : vector<2xf32>
    %395 = vector.multi_reduction <add>, %394, %cst_150 [1] : vector<2x10xf32> to vector<2xf32>
    %396 = vector.shape_cast %395 : vector<2xf32> to vector<2x1xf32>
    %397 = vector.broadcast %396 : vector<2x1xf32> to vector<2x10xf32>
    %398 = arith.divf %394, %397 : vector<2x10xf32>
    %c0_151 = arith.constant 0 : index
    %c0_152 = arith.constant 0 : index
    %399 = vector.load %arg5[%c0_151, %c0_152] : memref<2x10xf32, #tpu.memory_space<vmem>>, vector<2x10xf32>
    tpu.vector_store %arg5[%c0_151, %c0_152], %398 {strides = array<i32>} : memref<2x10xf32, #tpu.memory_space<vmem>>, vector<2x10xf32>,
    return
  }
}

</mosaic_0001>

<bundles_post_ra>
// kernel: dmixnet_forward.1
= control target key start
LH: loop header
LB: loop body
LE: loop exit
PB: predicated region body
PF: predicated region fallthrough
CT: control target
= control target key end

     0   :  { %s7365_s0 = inlined_call_operand.vmem [shape: bf16[32,48], index: 0, kind: input, shape index: {}]   ;;  %s7366_s1 = inlined_call_operand.vmem [shape: bf16[304,32], index: 1, kind: input, shape index: {}]   ;;  %s7367_s2 = inlined_call_operand.vmem [shape: bf16[64,64], index: 2, kind: input, shape index: {}]   ;;  %s7368_s3 = inlined_call_operand.vmem [shape: f32[232,32], index: 3, kind: input, shape index: {}]   ;;  %s7369_s4 = inlined_call_operand.vmem [shape: f32[2,10,5,32], index: 4, kind: input, shape index: {}]   ;;  %s7370_s5 = inlined_call_operand.hbm [shape: f32[2,10], index: 5, kind: output, shape index: {}]  }
   0x1   :  { %v4050_v0 = vld [vmem:[%s7366_s1 + $0x10] sm:$0xff]  ;;  %v4049_v1 = vld [vmem:[%s7366_s1 + $0x8] sm:$0xff]  ;;  %v4048_v2 = vld [vmem:[%s7366_s1] sm:$0xff] }
   0x2   :  { %74 = vmatpush.bf16.msra.mxu0 %v4050_v0  ;;  %4073 = vmatpush.bf16.msra.mxu2 %v4050_v0 }
   0x6   :  { %75 = vmatpush.bf16.msra.mxu0 %v4049_v1  ;;  %4074 = vmatpush.bf16.msra.mxu2 %v4049_v1 }
   0x7   :  { %10 = vsyncpa [#allocation3], 0  ;;  %v4051_v3 = vld [vmem:[%s7365_s0] sm:$0xff]  ;;  %v4052_v4 = vld [vmem:[%s7365_s0 + $0x8] sm:$0xff]  ;;  %vm62_vm0 = vcmask 392192   ;;  %vm90_vm1 = vcmask 261120  }
   0x8   :  { %v4084_v5 = vld [vmem:[%s7368_s3] ss:$0 sm:$0xff]  ;;  %v4473_v18 = vmov 32.0   ;;  %s3867_s30 = sshll.u32 %s7370_s5, 4  ;;  %s3868_s30 = int_to_ptr.hbm [resolvable:$true] %s3867_s30 }
   0x9   :  { %4099 = vrcp.f32 %v4473_v18 }
   0xa   :  { %76 = vmatpush.bf16.msra.mxu0 %v4048_v2  ;;  %4075 = vmatpush.bf16.msra.mxu2 %v4048_v2 }
   0xd   :  { %3896 = vmatmul.msk.bf16.vlgmr.msra.gmra.mxu0 %vm62_vm0, %v4051_v3  ;;  %3897 = vmatmul.msk.bf16.vlgmr.msra.gmra.mxu2 %vm62_vm0, %v4052_v4 }
   0xf   :  { %v4100_v19 = vpop.eup %4099 }
  0x10   :  { %v104_v20 = vmul.f32 32.0, %v4100_v19  ;;  %vm108_vm2 = vweird.f32 %v4100_v19 }
  0x12   :  { %v105_v21 = vsub.f32 1.0, %v104_v20 }
  0x14   :  { %v106_v22 = vmul.f32 %v4100_v19, %v105_v21 }
  0x16   :  { %v107_v23 = vadd.f32 %v4100_v19, %v106_v22 }
  0x18   :  { %v4542_v24 = vsel %vm108_vm2, %v4100_v19, %v107_v23 }
  0x8a   :  { %v78_v6 = vpop.f32.mrf.mxu0 }
  0x8b   :  { %v4526_v7 = vadd.f32 %v4084_v5, %v78_v6 }
  0x8d   :  { %v91_v8 = vsel %vm90_vm1, %v4526_v7, 0.0 }
  0x8e   :  { %92 = vadd.xlane.f32.xlu1 %v91_v8 }
  0x90   :  { %v83_v9 = vpop.f32.mrf.mxu2 }
  0x91   :  { %v4530_v10 = vadd.f32 %v4084_v5, %v83_v9 }
  0x92   :  { %v80_v11 = vpop.f32.mrf.mxu0 }
  0x93   :  { %v4532_v12 = vadd.f32 %v4084_v5, %v80_v11  ;;  %v97_v13 = vsel %vm90_vm1, %v4530_v10, 0.0 }
  0x94   :  { %98 = vadd.xlane.f32.xlu0 %v97_v13 }
  0x95   :  { %v94_v14 = vsel %vm90_vm1, %v4532_v12, 0.0 }
  0x96   :  { %95 = vadd.xlane.f32.xlu1 %v94_v14 }
  0x98   :  { %v85_v15 = vpop.f32.mrf.mxu2 }
  0x99   :  { %v4538_v16 = vadd.f32 %v4084_v5, %v85_v15 }
  0x9b   :  { %v100_v17 = vsel %vm90_vm1, %v4538_v16, 0.0 }
  0x9c   :  { %101 = vadd.xlane.f32.xlu0 %v100_v17 }
 0x101   :  { %v93_v25 = vpop.xlane.xlu1 %92 }
 0x102   :  { %v110_v26 = vmul.f32 %v4542_v24, %v93_v25 }
 0x104   :  { %v4546_v27 = vsub.f32 %v4526_v7, %v110_v26  ;;  %v4085_v26 = vld [vmem:[%s7368_s3 + $0x8] ss:$0 sm:$0xff] }
 0x106   :  { %v118_v28 = vmul.f32 %v4546_v27, %v4546_v27 }
 0x107   :  { %v99_v29 = vpop.xlane.xlu0 %98 }
 0x108   :  { %v112_v30 = vmul.f32 %v4542_v24, %v99_v29  ;;  %v122_v31 = vsel %vm90_vm1, %v118_v28, 0.0 }
 0x109   :  { %123 = vadd.xlane.f32.xlu0 %v122_v31  ;;  %v96_v32 = vpop.xlane.xlu1 %95 }
 0x10a   :  { %v4553_v33 = vsub.f32 %v4530_v10, %v112_v30  ;;  %v111_v34 = vmul.f32 %v4542_v24, %v96_v32 }
 0x10c   :  { %v4557_v35 = vsub.f32 %v4532_v12, %v111_v34  ;;  %v120_v36 = vmul.f32 %v4553_v33, %v4553_v33 }
 0x10e   :  { %v128_v37 = vsel %vm90_vm1, %v120_v36, 0.0  ;;  %v119_v38 = vmul.f32 %v4557_v35, %v4557_v35 }
 0x10f   :  { %129 = vadd.xlane.f32.xlu2 %v128_v37  ;;  %v102_v39 = vpop.xlane.xlu0 %101 }
 0x110   :  { %v113_v40 = vmul.f32 %v4542_v24, %v102_v39  ;;  %v125_v41 = vsel %vm90_vm1, %v119_v38, 0.0 }
 0x111   :  { %126 = vadd.xlane.f32.xlu1 %v125_v41 }
 0x112   :  { %v4567_v42 = vsub.f32 %v4538_v16, %v113_v40 }
 0x114   :  { %v121_v43 = vmul.f32 %v4567_v42, %v4567_v42 }
 0x116   :  { %v131_v44 = vsel %vm90_vm1, %v121_v43, 0.0 }
 0x117   :  { %132 = vadd.xlane.f32.xlu2 %v131_v44  ;;  %v4055_v44 = vld [vmem:[%s7366_s1 + $0x28] sm:$0xff] }
 0x17c   :  { %v124_v45 = vpop.xlane.xlu0 %123 }
 0x17d   :  { %v134_v46 = vmul.f32 %v124_v45, %v4542_v24  ;;  %v4056_v45 = vld [vmem:[%s7366_s1 + $0x30] sm:$0xff] }
 0x17f   :  { %v138_v47 = vadd.f32 1e-05, %v134_v46 }
 0x181   :  { %4101 = vrsqrt.f32 %v138_v47  ;;  %vm148_vm10 = vweird.f32 %v138_v47 }
 0x182   :  { %v130_v48 = vpop.xlane.xlu2 %129 }
 0x183   :  { %v136_v49 = vmul.f32 %v130_v48, %v4542_v24 }
 0x184   :  { %v127_v50 = vpop.xlane.xlu1 %126 }
 0x185   :  { %v140_v51 = vadd.f32 1e-05, %v136_v49  ;;  %v135_v52 = vmul.f32 %v127_v50, %v4542_v24  ;;  %v207_v49 = vld [vmem:[%s7368_s3 + $0x18] sm:$0xff] }
 0x187   :  { %v4102_v53 = vpop.eup %4101  ;;  %4103 = vrsqrt.f32 %v140_v51  ;;  %v139_v54 = vadd.f32 1e-05, %v135_v52  ;;  %vm168_vm4 = vweird.f32 %v140_v51 }
 0x188   :  { %v143_v55 = vmul.f32 %v4102_v53, %v138_v47  ;;  %vm149_vm6 = vweird.f32 %v4102_v53  ;;  %v206_v47 = vld [vmem:[%s7368_s3 + $0x10] sm:$0xff] }
 0x189   :  { %4105 = vrsqrt.f32 %v139_v54  ;;  %vm158_vm8 = vweird.f32 %v139_v54  ;;  %vm150_vm12 = vmor %vm148_vm10, %vm149_vm6 }
 0x18a   :  { %v133_v56 = vpop.xlane.xlu2 %132  ;;  %v144_v59 = vmul.f32 %v4102_v53, %v143_v55 }
 0x18b   :  { %v137_v57 = vmul.f32 %v133_v56, %v4542_v24 }
 0x18c   :  { %v145_v1 = vmul.f32 0.5, %v144_v59 }
 0x18d   :  { %v4104_v58 = vpop.eup %4103  ;;  %v141_v60 = vadd.f32 1e-05, %v137_v57 }
 0x18e   :  { %v163_v61 = vmul.f32 %v4104_v58, %v140_v51  ;;  %v146_v8 = vsub.f32 1.5, %v145_v1  ;;  %vm169_vm3 = vweird.f32 %v4104_v58 }
 0x18f   :  { %v4106_v62 = vpop.eup %4105  ;;  %4107 = vrsqrt.f32 %v141_v60  ;;  %vm170_vm7 = vmor %vm168_vm4, %vm169_vm3  ;;  %vm178_vm13 = vweird.f32 %v141_v60 }
 0x190   :  { %v164_v63 = vmul.f32 %v4104_v58, %v163_v61  ;;  %v153_v0 = vmul.f32 %v4106_v62, %v139_v54  ;;  %vm159_vm5 = vweird.f32 %v4106_v62  ;;  %v147_v17 = vmul.f32 %v4102_v53, %v146_v8  ;;  %v208_v54 = vld [vmem:[%s7368_s3 + $0x20] sm:$0xff] }
 0x191   :  { %vm160_vm9 = vmor %vm158_vm8, %vm159_vm5 }
 0x192   :  { %v165_v2 = vmul.f32 0.5, %v164_v63  ;;  %v154_v3 = vmul.f32 %v4106_v62, %v153_v0  ;;  %v151_v25 = vsel %vm150_vm12, %v4102_v53, %v147_v17  ;;  %v209_v63 = vld [vmem:[%s7368_s3 + $0x28] sm:$0xff] }
 0x193   :  { %v182_v32 = vmul.f32 %v151_v25, %v4546_v27  ;;  %v4054_v27 = vld [vmem:[%s7366_s1 + $0x20] sm:$0xff]  ;;  %v211_v25 = vld [vmem:[%s7368_s3 + $0x38] sm:$0xff] }
 0x194   :  { %v166_v4 = vsub.f32 1.5, %v165_v2  ;;  %v155_v5 = vmul.f32 0.5, %v154_v3 }
 0x195   :  { %v4108_v6 = vpop.eup %4107  ;;  %v187_v39 = vmul.f32 %v4085_v26, %v182_v32 }
 0x196   :  { %v167_v9 = vmul.f32 %v4104_v58, %v166_v4  ;;  %v156_v11 = vsub.f32 1.5, %v155_v5  ;;  %v173_v13 = vmul.f32 %v4108_v6, %v141_v60  ;;  %vm179_vm11 = vweird.f32 %v4108_v6 }
 0x197   :  { %vm180_vm14 = vmor %vm178_vm13, %vm179_vm11 }
 0x198   :  { %v157_v14 = vmul.f32 %v4106_v62, %v156_v11  ;;  %v174_v15 = vmul.f32 %v4108_v6, %v173_v13  ;;  %v171_v19 = vsel %vm170_vm7, %v4104_v58, %v167_v9  ;;  %v210_v9 = vld [vmem:[%s7368_s3 + $0x30] sm:$0xff] }
 0x199   :  { %v184_v22 = vmul.f32 %v171_v19, %v4553_v33  ;;  %v4086_v33 = vld [vmem:[%s7368_s3 + $0x9] ss:$0 sm:$0xff] }
 0x19a   :  { %v175_v18 = vmul.f32 0.5, %v174_v15  ;;  %v161_v21 = vsel %vm160_vm9, %v4106_v62, %v157_v14  ;;  %v192_v43 = vadd.f32 %v4086_v33, %v187_v39 }
 0x19b   :  { %v183_v28 = vmul.f32 %v161_v21, %v4557_v35  ;;  %v189_v31 = vmul.f32 %v4085_v26, %v184_v22 }
 0x19c   :  { %v176_v20 = vsub.f32 1.5, %v175_v18 }
 0x19d   :  { %v188_v36 = vmul.f32 %v4085_v26, %v183_v28  ;;  %v194_v37 = vadd.f32 %v4086_v33, %v189_v31 }
 0x19e   :  { %v177_v23 = vmul.f32 %v4108_v6, %v176_v20 }
 0x19f   :  { %v193_v41 = vadd.f32 %v4086_v33, %v188_v36 }
 0x1a0   :  { %v181_v29 = vsel %vm180_vm14, %v4108_v6, %v177_v23 }
 0x1a1   :  { %v185_v30 = vmul.f32 %v181_v29, %v4567_v42  ;;  %v204_v35 = vpack.c.bf16 %v193_v41, %v192_v43  ;;  %v4053_v42 = vld [vmem:[%s7366_s1 + $0x18] sm:$0xff] }
 0x1a3   :  { %v190_v34 = vmul.f32 %v4085_v26, %v185_v30 }
 0x1a5   :  { %v195_v38 = vadd.f32 %v4086_v33, %v190_v34 }
 0x1a7   :  { %v205_v40 = vpack.c.bf16 %v195_v38, %v194_v37 }
 0x1a9   :  { %252 = vmatpush.bf16.msra.mxu1 %v205_v40 }
 0x1ad   :  { %253 = vmatpush.bf16.msra.mxu1 %v204_v35 }
 0x1b0   :  { %3914 = vmatmul.msk.bf16.vlgmr.msra.gmra.mxu1 %vm90_vm1, %v4053_v42 }
 0x1c0   :  { %3915 = vmatmul.msk.bf16.gmra.mxu1 %vm90_vm1, %v4054_v27 }
 0x1d0   :  { %3916 = vmatmul.msk.bf16.gmra.mxu1 %vm90_vm1, %v4055_v44  ;;  %v212_v44 = vld [vmem:[%s7368_s3 + $0x40] sm:$0xff] }
 0x1e0   :  { %3917 = vmatmul.msk.bf16.gmra.mxu1 %vm90_vm1, %v4056_v45 }
 0x22d   :  { %v255_v46 = vpop.f32.mrf.mxu1 }
 0x22e   :  { %v4605_v48 = vadd.f32 %v255_v46, %v206_v47 }
 0x230   :  { %v4611_v51 = vmul.f32 0.70710677, %v4605_v48 }
 0x232   :  { %v291_v53 = vand.u32 2147483647, %v4611_v51 }
 0x234   :  { %v299_v57 = vmul.f32 0.3275911, %v291_v53  ;;  %v507_v23 = vsub.f32 0.0, %v291_v53 }
 0x235   :  { %v257_v50 = vpop.f32.mrf.mxu1 }
 0x236   :  { %v4613_v52 = vadd.f32 %v257_v50, %v207_v49  ;;  %v307_v61 = vadd.f32 1.0, %v299_v57  ;;  %v515_v36 = vmul.f32 %v507_v23, %v291_v53 }
 0x238   :  { %v4620_v55 = vmul.f32 0.70710677, %v4613_v52  ;;  %4109 = vrcp.f32 %v307_v61  ;;  %v326_v37 = vand.u32 2147483648, %v307_v61  ;;  %v324_v43 = vand.u32 2147483647, %v307_v61 }
 0x239   :  { %vm320_vm0 = vweird.f32 %v307_v61  ;;  %v4704_v47 = vmul.f32 1.442695, %v515_v36 }
 0x23a   :  { %v4625_v59 = vand.u32 2147483647, %v4620_v55  ;;  %v327_v46 = vor.u32 1.1754944e-38, %v326_v37  ;;  %vm4708_vm2 = vcmp.eq.f32.partialorder %v324_v43, 8.507059e+37 }
 0x23c   :  { %v300_v0 = vmul.f32 0.3275911, %v4625_v59 }
 0x23d   :  { %v260_v56 = vpop.f32.mrf.mxu1 }
 0x23e   :  { %v4622_v58 = vadd.f32 %v260_v56, %v208_v54  ;;  %v4640_v4 = vadd.f32 1.0, %v300_v0  ;;  %v4653_v11 = vpop.eup %4109  ;;  %v508_v0 = vsub.f32 0.0, %v4625_v59 }
 0x23f   :  { %v316_v17 = vmul.f32 %v4653_v11, %v307_v61  ;;  %vm321_vm15 = vweird.f32 %v4653_v11 }
 0x240   :  { %v4628_v60 = vmul.f32 0.70710677, %v4622_v58  ;;  %4111 = vrcp.f32 %v4640_v4  ;;  %v341_v42 = vand.u32 2147483648, %v4640_v4  ;;  %v339_v57 = vand.u32 2147483647, %v4640_v4  ;;  %vm4715_vm3 = vmor %vm320_vm0, %vm321_vm15 }
 0x241   :  { %v317_v22 = vsub.f32 1.0, %v316_v17  ;;  %vm335_vm4 = vweird.f32 %v4640_v4 }
 0x242   :  { %v4631_v62 = vand.u32 2147483647, %v4628_v60  ;;  %vm4739_vm7 = vcmp.eq.f32.partialorder %v339_v57, 8.507059e+37 }
 0x243   :  { %v318_v33 = vmul.f32 %v4653_v11, %v317_v22 }
 0x244   :  { %v301_v3 = vmul.f32 0.3275911, %v4631_v62 }
 0x245   :  { %v262_v1 = vpop.f32.mrf.mxu1  ;;  %v319_v45 = vadd.f32 %v4653_v11, %v318_v33 }
 0x246   :  { %v4637_v2 = vadd.f32 %v262_v1, %v209_v63  ;;  %v4645_v6 = vadd.f32 1.0, %v301_v3  ;;  %v4667_v20 = vpop.eup %4111 }
 0x247   :  { %v331_v29 = vmul.f32 %v4667_v20, %v4640_v4  ;;  %v323_v17 = vsel %vm4715_vm3, %v4653_v11, %v319_v45  ;;  %vm336_vm5 = vweird.f32 %v4667_v20 }
 0x248   :  { %v4643_v5 = vmul.f32 0.70710677, %v4637_v2  ;;  %4113 = vrcp.f32 %v4645_v6  ;;  %vm350_vm6 = vweird.f32 %v4645_v6  ;;  %vm4758_vm11 = vmor %vm335_vm4, %vm336_vm5  ;;  %v4786_v61 = vsel %vm4708_vm2, %v327_v46, %v323_v17 }
 0x249   :  { %v332_v40 = vsub.f32 1.0, %v331_v29 }
 0x24a   :  { %v4648_v8 = vand.u32 2147483647, %v4643_v5 }
 0x24b   :  { %v333_v50 = vmul.f32 %v4667_v20, %v332_v40 }
 0x24c   :  { %v302_v13 = vmul.f32 0.3275911, %v4648_v8 }
 0x24d   :  { %v265_v14 = vpop.f32.mrf.mxu1  ;;  %v334_v29 = vadd.f32 %v4667_v20, %v333_v50  ;;  %v354_v50 = vand.u32 2147483647, %v4645_v6 }
 0x24e   :  { %v4657_v15 = vadd.f32 %v265_v14, %v210_v9  ;;  %v4661_v18 = vadd.f32 1.0, %v302_v13  ;;  %v4676_v28 = vpop.eup %4113  ;;  %v342_v9 = vor.u32 1.1754944e-38, %v341_v42 }
 0x24f   :  { %v346_v38 = vmul.f32 %v4676_v28, %v4645_v6  ;;  %vm351_vm8 = vweird.f32 %v4676_v28  ;;  %vm355_vm4 = vcmp.eq.f32.partialorder %v354_v50, 8.507059e+37 }
 0x250   :  { %v4664_v19 = vmul.f32 0.70710677, %v4657_v15  ;;  %4115 = vrcp.f32 %v4661_v18  ;;  %v371_v36 = vand.u32 2147483648, %v4661_v18  ;;  %vm365_vm12 = vweird.f32 %v4661_v18  ;;  %vm4792_vm0 = vmor %vm350_vm6, %vm351_vm8 }
 0x251   :  { %v347_v49 = vsub.f32 1.0, %v346_v38  ;;  %v213_v38 = vld [vmem:[%s7368_s3 + $0x48] sm:$0xff] }
 0x252   :  { %v4670_v21 = vand.u32 2147483647, %v4664_v19 }
 0x253   :  { %v348_v22 = vmul.f32 %v4676_v28, %v347_v49 }
 0x254   :  { %v303_v26 = vmul.f32 0.3275911, %v4670_v21 }
 0x255   :  { %v267_v30 = vpop.f32.mrf.mxu1  ;;  %v349_v42 = vadd.f32 %v4676_v28, %v348_v22 }
 0x256   :  { %v4680_v31 = vadd.f32 1.0, %v303_v26  ;;  %v4682_v32 = vadd.f32 %v267_v30, %v211_v25  ;;  %v4684_v34 = vpop.eup %4115  ;;  %v356_v25 = vand.u32 2147483648, %v4645_v6 }
 0x257   :  { %v361_v39 = vmul.f32 %v4684_v34, %v4661_v18  ;;  %vm366_vm9 = vweird.f32 %v4684_v34  ;;  %v353_v6 = vsel %vm4792_vm0, %v4676_v28, %v349_v42 }
 0x258   :  { %4117 = vrcp.f32 %v4680_v31  ;;  %v4693_v41 = vmul.f32 0.70710677, %v4682_v32  ;;  %v386_v43 = vand.u32 2147483648, %v4680_v31  ;;  %vm4766_vm13 = vmor %vm365_vm12, %vm366_vm9  ;;  %vm380_vm14 = vweird.f32 %v4680_v31 }
 0x259   :  { %v362_v35 = vsub.f32 1.0, %v361_v39  ;;  %v369_v39 = vand.u32 2147483647, %v4661_v18  ;;  %v384_v49 = vand.u32 2147483647, %v4680_v31  ;;  %v357_v17 = vor.u32 1.1754944e-38, %v356_v25 }
 0x25a   :  { %v4698_v27 = vand.u32 2147483647, %v4693_v41  ;;  %v387_v46 = vor.u32 1.1754944e-38, %v386_v43  ;;  %v435_v25 = vmul.f32 1.0614054, %v4786_v61 }
 0x25b   :  { %v363_v1 = vmul.f32 %v4684_v34, %v362_v35  ;;  %vm370_vm3 = vcmp.eq.f32.partialorder %v369_v39, 8.507059e+37  ;;  %vm385_vm2 = vcmp.eq.f32.partialorder %v384_v49, 8.507059e+37  ;;  %v4821_v28 = vsel %vm355_vm4, %v357_v17, %v353_v6 }
 0x25c   :  { %v304_v53 = vmul.f32 0.3275911, %v4698_v27  ;;  %vm558_vm4 = vcmp.ge.f32.partialorder %v4643_v5, 0.0  ;;  %v280_v5 = vmul.f32 0.5, %v4682_v32 }
 0x25d   :  { %v270_v54 = vpop.f32.mrf.mxu1  ;;  %v364_v33 = vadd.f32 %v4684_v34, %v363_v1 }
 0x25e   :  { %v4118_v63 = vpop.eup %4117  ;;  %v4722_v3 = vadd.f32 %v270_v54, %v212_v44  ;;  %v4725_v14 = vadd.f32 1.0, %v304_v53 }
 0x25f   :  { %v376_v13 = vmul.f32 %v4118_v63, %v4680_v31  ;;  %vm381_vm10 = vweird.f32 %v4118_v63  ;;  %v368_v57 = vsel %vm4766_vm13, %v4684_v34, %v364_v33  ;;  %v338_v34 = vsel %vm4758_vm11, %v4667_v20, %v334_v29 }
 0x260   :  { %v4734_v23 = vmul.f32 0.70710677, %v4722_v3  ;;  %4119 = vrcp.f32 %v4725_v14  ;;  %vm4773_vm15 = vmor %vm380_vm14, %vm381_vm10  ;;  %v4815_v20 = vsel %vm4739_vm7, %v342_v9, %v338_v34  ;;  %v401_v29 = vand.u32 2147483648, %v4725_v14 }
 0x261   :  { %v377_v26 = vsub.f32 1.0, %v376_v13  ;;  %v372_v13 = vor.u32 1.1754944e-38, %v371_v36  ;;  %v399_v30 = vand.u32 2147483647, %v4725_v14  ;;  %v436_v43 = vmul.f32 1.0614054, %v4815_v20 }
 0x262   :  { %v4746_v11 = vand.u32 2147483647, %v4734_v23  ;;  %vm395_vm6 = vweird.f32 %v4725_v14  ;;  %v402_v18 = vor.u32 1.1754944e-38, %v401_v29 }
 0x263   :  { %v378_v37 = vmul.f32 %v4118_v63, %v377_v26  ;;  %vm400_vm8 = vcmp.eq.f32.partialorder %v399_v30, 8.507059e+37 }
 0x264   :  { %v305_v35 = vmul.f32 0.3275911, %v4746_v11 }
 0x265   :  { %v272_v45 = vpop.f32.mrf.mxu1  ;;  %v379_v4 = vadd.f32 %v4118_v63, %v378_v37 }
 0x266   :  { %v4777_v53 = vadd.f32 1.0, %v305_v35  ;;  %v4779_v54 = vadd.f32 %v272_v45, %v213_v38  ;;  %v4120_v1 = vpop.eup %4119  ;;  %v437_v45 = vmul.f32 1.0614054, %v4821_v28 }
 0x267   :  { %v383_v22 = vsel %vm4773_vm15, %v4118_v63, %v379_v4  ;;  %v391_v56 = vmul.f32 %v4120_v1, %v4725_v14  ;;  %v4809_v63 = vsel %vm370_vm3, %v372_v13, %v368_v57  ;;  %vm396_vm5 = vweird.f32 %v4120_v1 }
 0x268   :  { %4121 = vrcp.f32 %v4777_v53  ;;  %v4807_v26 = vmul.f32 0.70710677, %v4779_v54  ;;  %v4811_v36 = vsel %vm385_vm2, %v387_v46, %v383_v22  ;;  %v438_v40 = vmul.f32 1.0614054, %v4809_v63  ;;  %vm397_vm7 = vmor %vm395_vm6, %vm396_vm5 }
 0x269   :  { %v392_v33 = vsub.f32 1.0, %v391_v56  ;;  %v439_v39 = vmul.f32 1.0614054, %v4811_v36  ;;  %4123 = vpow2.f32 %v4704_v47  ;;  %v4835_v4 = vmul.f32 %v508_v0, %v4625_v59 }
 0x26a   :  { %v4819_v37 = vand.u32 2147483647, %v4807_v26  ;;  %v510_v47 = vsub.f32 0.0, %v4648_v8  ;;  %v446_v31 = vadd.f32 -1.4531521, %v438_v40  ;;  %v416_v34 = vand.u32 2147483648, %v4777_v53 }
 0x26b   :  { %v393_v38 = vmul.f32 %v4120_v1, %v392_v33  ;;  %v447_v44 = vadd.f32 -1.4531521, %v439_v39  ;;  %v443_v14 = vadd.f32 -1.4531521, %v435_v25  ;;  %v444_v22 = vadd.f32 -1.4531521, %v436_v43 }
 0x26c   :  { %v306_v9 = vmul.f32 0.3275911, %v4819_v37  ;;  %v445_v46 = vadd.f32 -1.4531521, %v437_v45  ;;  %v509_v33 = vsub.f32 0.0, %v4631_v62  ;;  %v518_v29 = vmul.f32 %v510_v47, %v4648_v8 }
 0x26d   :  { %v394_v42 = vadd.f32 %v4120_v1, %v393_v38  ;;  %v455_v0 = vmul.f32 %v447_v44, %v4811_v36  ;;  %v454_v25 = vmul.f32 %v446_v31, %v4809_v63  ;;  %v451_v38 = vmul.f32 %v443_v14, %v4786_v61 }
 0x26e   :  { %v4122_v35 = vpop.eup %4121  ;;  %v4839_v50 = vadd.f32 1.0, %v306_v9  ;;  %v511_v39 = vsub.f32 0.0, %v4670_v21  ;;  %vm410_vm10 = vweird.f32 %v4777_v53  ;;  %v417_v30 = vor.u32 1.1754944e-38, %v416_v34 }
 0x26f   :  { %v406_v49 = vmul.f32 %v4122_v35, %v4777_v53  ;;  %v398_v57 = vsel %vm397_vm7, %v4120_v1, %v394_v42  ;;  %v4846_v56 = vpop.eup %4123  ;;  %vm411_vm9 = vweird.f32 %v4122_v35  ;;  %v414_v1 = vand.u32 2147483647, %v4777_v53 }
 0x270   :  { %4125 = vrcp.f32 %v4839_v50  ;;  %v4843_v59 = vsel %vm400_vm8, %v402_v18, %v398_v57  ;;  %vm412_vm11 = vmor %vm410_vm10, %vm411_vm9  ;;  %v463_v43 = vadd.f32 1.4214138, %v455_v0  ;;  %v453_v42 = vmul.f32 %v445_v46, %v4821_v28 }
 0x271   :  { %v407_v13 = vsub.f32 1.0, %v406_v49  ;;  %v440_v17 = vmul.f32 1.0614054, %v4843_v59  ;;  %v452_v44 = vmul.f32 %v444_v22, %v4815_v20  ;;  %v513_v8 = vsub.f32 0.0, %v4746_v11 }
 0x272   :  { %vm415_vm12 = vcmp.eq.f32.partialorder %v414_v1, 8.507059e+37  ;;  %v462_v53 = vadd.f32 1.4214138, %v454_v25  ;;  %v459_v31 = vadd.f32 1.4214138, %v451_v38  ;;  %v519_v14 = vmul.f32 %v511_v39, %v4670_v21 }
 0x273   :  { %v408_v6 = vmul.f32 %v4122_v35, %v407_v13  ;;  %v448_v9 = vadd.f32 -1.4531521, %v440_v17  ;;  %v512_v13 = vsub.f32 0.0, %v4698_v27  ;;  %v471_v46 = vmul.f32 %v463_v43, %v4811_v36 }
 0x274   :  { %v521_v1 = vmul.f32 %v513_v8, %v4746_v11  ;;  %v431_v17 = vand.u32 2147483648, %v4839_v50  ;;  %v429_v21 = vand.u32 2147483647, %v4839_v50  ;;  %v470_v39 = vmul.f32 %v462_v53, %v4809_v63 }
 0x275   :  { %v409_v40 = vadd.f32 %v4122_v35, %v408_v6  ;;  %v456_v49 = vmul.f32 %v448_v9, %v4843_v59  ;;  %v460_v6 = vadd.f32 1.4214138, %v452_v44  ;;  %v520_v9 = vmul.f32 %v512_v13, %v4698_v27 }
 0x276   :  { %v4126_v45 = vpop.eup %4125  ;;  %vm425_vm14 = vweird.f32 %v4839_v50  ;;  %v479_v44 = vadd.f32 -0.28449672, %v471_v46  ;;  %vm430_vm0 = vcmp.eq.f32.partialorder %v429_v21, 8.507059e+37  ;;  %v478_v13 = vadd.f32 -0.28449672, %v470_v39 }
 0x277   :  { %v413_v47 = vsel %vm412_vm11, %v4122_v35, %v409_v40  ;;  %v421_v18 = vmul.f32 %v4126_v45, %v4839_v50  ;;  %v464_v22 = vadd.f32 1.4214138, %v456_v49  ;;  %v461_v35 = vadd.f32 1.4214138, %v453_v42 }
 0x278   :  { %v4861_v57 = vsel %vm415_vm12, %v417_v30, %v413_v47  ;;  %vm426_vm13 = vweird.f32 %v4126_v45  ;;  %v467_v42 = vmul.f32 %v459_v31, %v4786_v61  ;;  %v535_v47 = vmul.f32 1.442695, %v521_v1 }
 0x279   :  { %v441_v34 = vmul.f32 1.0614054, %v4861_v57  ;;  %v422_v0 = vsub.f32 1.0, %v421_v18  ;;  %v472_v25 = vmul.f32 %v464_v22, %v4843_v59  ;;  %v469_v8 = vmul.f32 %v461_v35, %v4821_v28  ;;  %vm427_vm15 = vmor %vm425_vm14, %vm426_vm13 }
 0x27a   :  { %v432_v49 = vor.u32 1.1754944e-38, %v431_v17  ;;  %v533_v22 = vmul.f32 1.442695, %v520_v9  ;;  %v514_v31 = vsub.f32 0.0, %v4819_v37  ;;  %v529_v46 = vmul.f32 1.442695, %v518_v29 }
 0x27b   :  { %v449_v40 = vadd.f32 -1.4531521, %v441_v34  ;;  %v423_v38 = vmul.f32 %v4126_v45, %v422_v0  ;;  %v480_v43 = vadd.f32 -0.28449672, %v472_v25  ;;  %v468_v34 = vmul.f32 %v460_v6, %v4815_v20 }
 0x27c   :  { %v487_v35 = vmul.f32 %v479_v44, %v4811_v36  ;;  %v477_v1 = vadd.f32 -0.28449672, %v469_v8  ;;  %v517_v6 = vmul.f32 %v509_v33, %v4631_v62  ;;  %4127 = vpow2.f32 %v535_v47 }
 0x27d   :  { %v457_v30 = vmul.f32 %v449_v40, %v4861_v57  ;;  %v424_v11 = vadd.f32 %v4126_v45, %v423_v38  ;;  %v488_v27 = vmul.f32 %v480_v43, %v4843_v59  ;;  %v476_v25 = vadd.f32 -0.28449672, %v468_v34 }
 0x27e   :  { %v486_v39 = vmul.f32 %v478_v13, %v4809_v63  ;;  %4129 = vpow2.f32 %v533_v22  ;;  %v522_v9 = vmul.f32 %v514_v31, %v4819_v37  ;;  %v525_v43 = vmul.f32 1.442695, %v4835_v4 }
 0x27f   :  { %v465_v18 = vadd.f32 1.4214138, %v457_v30  ;;  %v428_v53 = vsel %vm427_vm15, %v4126_v45, %v424_v11  ;;  %v531_v45 = vmul.f32 1.442695, %v519_v14  ;;  %v496_v21 = vadd.f32 0.2548296, %v488_v27 }
 0x280   :  { %v433_v0 = vsel %vm430_vm0, %v432_v49, %v428_v53  ;;  %v475_v30 = vadd.f32 -0.28449672, %v467_v42  ;;  %v495_v44 = vadd.f32 0.2548296, %v487_v35  ;;  %v485_v62 = vmul.f32 %v477_v1, %v4821_v28 }
 0x281   :  { %v473_v50 = vmul.f32 %v465_v18, %v4861_v57  ;;  %v442_v40 = vmul.f32 1.0614054, %v433_v0  ;;  %v527_v33 = vmul.f32 1.442695, %v517_v6  ;;  %4131 = vpow2.f32 %v531_v45 }
 0x282   :  { %v504_v47 = vmul.f32 %v496_v21, %v4843_v59  ;;  %v494_v49 = vadd.f32 0.2548296, %v486_v39  ;;  %v484_v18 = vmul.f32 %v476_v25, %v4815_v20  ;;  %4133 = vpow2.f32 %v529_v46  ;;  %v4128_v4 = vpop.eup %4127 }
 0x283   :  { %v481_v17 = vadd.f32 -0.28449672, %v473_v50  ;;  %v450_v38 = vadd.f32 -1.4531521, %v442_v40  ;;  %v537_v37 = vmul.f32 1.442695, %v522_v9  ;;  %v483_v42 = vmul.f32 %v475_v30, %v4786_v61 }
 0x284   :  { %4135 = vpow2.f32 %v525_v43  ;;  %v503_v27 = vmul.f32 %v495_v44, %v4811_v36  ;;  %v493_v13 = vadd.f32 0.2548296, %v485_v62  ;;  %v4130_v22 = vpop.eup %4129  ;;  %v502_v40 = vmul.f32 %v494_v49, %v4809_v63 }
 0x285   :  { %v489_v29 = vmul.f32 %v481_v17, %v4861_v57  ;;  %v458_v11 = vmul.f32 %v450_v38, %v433_v0  ;;  %4137 = vpow2.f32 %v527_v33  ;;  %v544_v59 = vmul.f32 %v4130_v22, %v504_v47 }
 0x286   :  { %v492_v35 = vadd.f32 0.2548296, %v484_v18  ;;  %4139 = vpow2.f32 %v537_v37  ;;  %v491_v1 = vadd.f32 0.2548296, %v483_v42  ;;  %v501_v17 = vmul.f32 %v493_v13, %v4821_v28 }
 0x287   :  { %v497_v14 = vadd.f32 0.2548296, %v489_v29  ;;  %v466_v8 = vadd.f32 1.4214138, %v458_v11  ;;  %v4132_v46 = vpop.eup %4131  ;;  %v552_v21 = vsub.f32 1.0, %v544_v59  ;;  %vm561_vm3 = vcmp.ge.f32.partialorder %v4734_v23, 0.0 }
 0x288   :  { %v543_v45 = vmul.f32 %v4132_v46, %v503_v27  ;;  %v4134_v25 = vpop.eup %4133  ;;  %v500_v9 = vmul.f32 %v492_v35, %v4815_v20  ;;  %v499_v30 = vmul.f32 %v491_v1, %v4786_v61  ;;  %vm560_vm2 = vcmp.ge.f32.partialorder %v4693_v41, 0.0 }
 0x289   :  { %v505_v34 = vmul.f32 %v497_v14, %v4861_v57  ;;  %v474_v53 = vmul.f32 %v466_v8, %v433_v0  ;;  %v542_v39 = vmul.f32 %v4134_v25, %v502_v40  ;;  %v568_v14 = vsub.f32 0.0, %v552_v21 }
 0x28a   :  { %v4136_v38 = vpop.eup %4135  ;;  %v551_v11 = vsub.f32 1.0, %v543_v45  ;;  %v539_v28 = vmul.f32 %v4846_v56, %v499_v30  ;;  %vm559_vm5 = vcmp.ge.f32.partialorder %v4664_v19, 0.0  ;;  %vm562_vm6 = vcmp.ge.f32.partialorder %v4807_v26, 0.0 }
 0x28b   :  { %v545_v31 = vmul.f32 %v4128_v4, %v505_v34  ;;  %v482_v50 = vadd.f32 -0.28449672, %v474_v53  ;;  %v4138_v29 = vpop.eup %4137  ;;  %v550_v8 = vsub.f32 1.0, %v542_v39  ;;  %v540_v47 = vmul.f32 %v4136_v38, %v500_v9 }
 0x28c   :  { %v541_v44 = vmul.f32 %v4138_v29, %v501_v17  ;;  %v4140_v62 = vpop.eup %4139  ;;  %v567_v37 = vsub.f32 0.0, %v551_v11  ;;  %v547_v27 = vsub.f32 1.0, %v539_v28  ;;  %v281_v13 = vmul.f32 0.5, %v4722_v3  ;;  %v645_v28 = vld [vmem:[%s7368_s3 + $0x60] sm:$0xff] }
 0x28d   :  { %v490_v57 = vmul.f32 %v482_v50, %v433_v0  ;;  %v553_v6 = vsub.f32 1.0, %v545_v31  ;;  %v566_v34 = vsub.f32 0.0, %v550_v8  ;;  %v548_v42 = vsub.f32 1.0, %v540_v47 }
 0x28e   :  { %v549_v20 = vsub.f32 1.0, %v541_v44  ;;  %v575_v53 = vsel %vm559_vm5, %v551_v11, %v567_v37  ;;  %v282_v22 = vmul.f32 0.5, %v4779_v54  ;;  %vm557_vm7 = vcmp.ge.f32.partialorder %v4628_v60, 0.0 }
 0x28f   :  { %v498_v36 = vadd.f32 0.2548296, %v490_v57  ;;  %v569_v43 = vsub.f32 0.0, %v553_v6  ;;  %v574_v50 = vsel %vm558_vm4, %v550_v8, %v566_v34  ;;  %v564_v59 = vsub.f32 0.0, %v548_v42 }
 0x290   :  { %v565_v56 = vsub.f32 0.0, %v549_v20  ;;  %v583_v26 = vadd.f32 1.0, %v575_v53  ;;  %vm556_vm8 = vcmp.ge.f32.partialorder %v4620_v55, 0.0  ;;  %v563_v46 = vsub.f32 0.0, %v547_v27 }
 0x291   :  { %v506_v63 = vmul.f32 %v498_v36, %v433_v0  ;;  %v577_v18 = vsel %vm561_vm3, %v553_v6, %v569_v43  ;;  %v576_v0 = vsel %vm560_vm2, %v552_v21, %v568_v14  ;;  %v279_v1 = vmul.f32 0.5, %v4657_v15 }
 0x292   :  { %v585_v4 = vadd.f32 1.0, %v577_v18  ;;  %v584_v31 = vadd.f32 1.0, %v576_v0  ;;  %v573_v35 = vsel %vm557_vm7, %v549_v20, %v565_v56  ;;  %v582_v54 = vadd.f32 1.0, %v574_v50  ;;  %v646_v20 = vld [vmem:[%s7368_s3 + $0x68] sm:$0xff] }
 0x293   :  { %v546_v33 = vmul.f32 %v4140_v62, %v506_v63  ;;  %v572_v6 = vsel %vm556_vm8, %v548_v42, %v564_v59  ;;  %vm555_vm9 = vcmp.ge.f32.partialorder %v4611_v51, 0.0  ;;  %v278_v60 = vmul.f32 0.5, %v4637_v2  ;;  %v4057_v63 = vld [vmem:[%s7367_s2] sm:$0xff] }
 0x294   :  { %v593_v19 = vmul.f32 %v585_v4, %v281_v13  ;;  %v592_v57 = vmul.f32 %v584_v31, %v280_v5  ;;  %v591_v45 = vmul.f32 %v583_v26, %v279_v1  ;;  %v581_v32 = vadd.f32 1.0, %v573_v35 }
 0x295   :  { %v554_v49 = vsub.f32 1.0, %v546_v33  ;;  %v571_v17 = vsel %vm555_vm9, %v547_v27, %v563_v46  ;;  %v277_v25 = vmul.f32 0.5, %v4622_v58  ;;  %v590_v55 = vmul.f32 %v582_v54, %v278_v60  ;;  %v643_v58 = vld [vmem:[%s7368_s3 + $0x50] sm:$0xff]  ;;  %v644_v33 = vld [vmem:[%s7368_s3 + $0x58] sm:$0xff] }
 0x296   :  { %v601_v38 = vpack.c.bf16 %v592_v57, %v591_v45  ;;  %v580_v36 = vadd.f32 1.0, %v572_v6  ;;  %v276_v21 = vmul.f32 0.5, %v4613_v52  ;;  %v579_v39 = vadd.f32 1.0, %v571_v17  ;;  %v4058_v52 = vld [vmem:[%s7367_s2 + $0x8] sm:$0xff] }
 0x297   :  { %v570_v61 = vsub.f32 0.0, %v554_v49  ;;  %v589_v15 = vmul.f32 %v581_v32, %v277_v25  ;;  %v275_v9 = vmul.f32 0.5, %v4605_v48  ;;  %vm613_vm10 = vcmask 523264   ;;  %v4060_v25 = vld [vmem:[%s7366_s1 + $0x40] sm:$0xff] }
 0x298   :  { %v588_v51 = vmul.f32 %v580_v36, %v276_v21  ;;  %783 = vmatpush.bf16.msra.mxu3 %v4060_v25  ;;  %v4059_v21 = vld [vmem:[%s7366_s1 + $0x38] sm:$0xff] }
 0x299   :  { %v578_v23 = vsel %vm562_vm6, %v554_v49, %v570_v61  ;;  %v600_v29 = vpack.c.bf16 %v590_v55, %v589_v15  ;;  %v587_v2 = vmul.f32 %v579_v39, %v275_v9 }
 0x29a   :  { %v586_v41 = vadd.f32 1.0, %v578_v23 }
 0x29b   :  { %v599_v30 = vpack.c.bf16 %v588_v51, %v587_v2 }
 0x29c   :  { %v594_v40 = vmul.f32 %v586_v41, %v282_v22  ;;  %784 = vmatpush.bf16.msra.mxu3 %v4059_v21 }
 0x29e   :  { %v602_v3 = vpack.c.bf16 %v594_v40, %v593_v19 }
 0x2a0   :  { %624 = vmatpush.bf16.msrb.mxu2 %v602_v3 }
 0x2a4   :  { %625 = vmatpush.bf16.msrb.mxu2 %v601_v38 }
 0x2a8   :  { %626 = vmatpush.bf16.msrb.mxu2 %v600_v29 }
 0x2ac   :  { %627 = vmatpush.bf16.msrb.mxu2 %v599_v30 }
 0x2af   :  { %3926 = vmatmul.msk.bf16.vlgmr.msrb.gmra.mxu2 %vm613_vm10, %v4057_v63 }
 0x2bf   :  { %3927 = vmatmul.msk.bf16.gmra.mxu2 %vm613_vm10, %v4058_v52 }
 0x332   :  { %v629_v48 = vpop.f32.mrf.mxu2 }
 0x333   :  { %v639_v43 = vadd.f32 %v629_v48, %v4526_v7 }
 0x335   :  { %v4928_v11 = vadd.f32 %v643_v58, %v639_v43 }
 0x337   :  { %v653_v44 = vsel %vm90_vm1, %v4928_v11, 0.0 }
 0x338   :  { %654 = vadd.xlane.f32.xlu2 %v653_v44 }
 0x33a   :  { %v631_v62 = vpop.f32.mrf.mxu2 }
 0x33b   :  { %v640_v14 = vadd.f32 %v631_v62, %v4532_v12 }
 0x33d   :  { %v4936_v8 = vadd.f32 %v644_v33, %v640_v14  ;;  %v4087_v33 = vld [vmem:[%s7368_s3 + $0xa] ss:$0 sm:$0xff] }
 0x33f   :  { %v656_v47 = vsel %vm90_vm1, %v4936_v8, 0.0 }
 0x340   :  { %657 = vadd.xlane.f32.xlu0 %v656_v47 }
 0x342   :  { %v634_v7 = vpop.f32.mrf.mxu2 }
 0x343   :  { %v641_v49 = vadd.f32 %v634_v7, %v4530_v10 }
 0x345   :  { %v4944_v18 = vadd.f32 %v645_v28, %v641_v49 }
 0x347   :  { %v659_v37 = vsel %vm90_vm1, %v4944_v18, 0.0 }
 0x348   :  { %660 = vadd.xlane.f32.xlu1 %v659_v37 }
 0x34a   :  { %v636_v12 = vpop.f32.mrf.mxu2 }
 0x34b   :  { %v642_v61 = vadd.f32 %v636_v12, %v4538_v16  ;;  %v4088_v12 = vld [vmem:[%s7368_s3 + $0xb] ss:$0 sm:$0xff] }
 0x34d   :  { %v4952_v0 = vadd.f32 %v646_v20, %v642_v61 }
 0x34f   :  { %v662_v34 = vsel %vm90_vm1, %v4952_v0, 0.0 }
 0x350   :  { %663 = vadd.xlane.f32.xlu2 %v662_v34 }
 0x3ab   :  { %v655_v10 = vpop.xlane.xlu2 %654 }
 0x3ac   :  { %v665_v42 = vmul.f32 %v655_v10, %v4542_v24 }
 0x3ae   :  { %v669_v4 = vsub.f32 %v4928_v11, %v665_v42 }
 0x3b0   :  { %v673_v23 = vmul.f32 %v669_v4, %v669_v4 }
 0x3b2   :  { %v677_v53 = vsel %vm90_vm1, %v673_v23, 0.0 }
 0x3b3   :  { %678 = vadd.xlane.f32.xlu0 %v677_v53  ;;  %v658_v56 = vpop.xlane.xlu0 %657 }
 0x3b4   :  { %v666_v27 = vmul.f32 %v658_v56, %v4542_v24 }
 0x3b6   :  { %v670_v16 = vsub.f32 %v4936_v8, %v666_v27 }
 0x3b8   :  { %v674_v13 = vmul.f32 %v670_v16, %v670_v16 }
 0x3ba   :  { %v680_v22 = vsel %vm90_vm1, %v674_v13, 0.0 }
 0x3bb   :  { %681 = vadd.xlane.f32.xlu1 %v680_v22  ;;  %v661_v41 = vpop.xlane.xlu1 %660 }
 0x3bc   :  { %v667_v31 = vmul.f32 %v661_v41, %v4542_v24 }
 0x3be   :  { %v4964_v50 = vsub.f32 %v4944_v18, %v667_v31 }
 0x3c0   :  { %v675_v59 = vmul.f32 %v4964_v50, %v4964_v50 }
 0x3c2   :  { %v683_v5 = vsel %vm90_vm1, %v675_v59, 0.0 }
 0x3c3   :  { %684 = vadd.xlane.f32.xlu2 %v683_v5  ;;  %v664_v19 = vpop.xlane.xlu2 %663 }
 0x3c4   :  { %v668_v40 = vmul.f32 %v664_v19, %v4542_v24 }
 0x3c6   :  { %v4971_v26 = vsub.f32 %v4952_v0, %v668_v40 }
 0x3c8   :  { %v676_v35 = vmul.f32 %v4971_v26, %v4971_v26 }
 0x3ca   :  { %v686_v46 = vsel %vm90_vm1, %v676_v35, 0.0 }
 0x3cb   :  { %687 = vadd.xlane.f32.xlu0 %v686_v46 }
 0x426   :  { %v679_v1 = vpop.xlane.xlu0 %678 }
 0x427   :  { %v689_v3 = vmul.f32 %v679_v1, %v4542_v24 }
 0x429   :  { %v693_v57 = vadd.f32 1e-05, %v689_v3  ;;  %v4089_v3 = vld [vmem:[%s7368_s3 + $0xc] ss:$0 sm:$0xff] }
 0x42b   :  { %4141 = vrsqrt.f32 %v693_v57  ;;  %vm703_vm12 = vweird.f32 %v693_v57 }
 0x42e   :  { %v682_v54 = vpop.xlane.xlu1 %681 }
 0x42f   :  { %v690_v6 = vmul.f32 %v682_v54, %v4542_v24 }
 0x431   :  { %v4142_v60 = vpop.eup %4141  ;;  %v694_v45 = vadd.f32 1e-05, %v690_v6 }
 0x432   :  { %v698_v32 = vmul.f32 %v4142_v60, %v693_v57  ;;  %vm704_vm11 = vweird.f32 %v4142_v60 }
 0x433   :  { %4143 = vrsqrt.f32 %v694_v45  ;;  %vm705_vm13 = vmor %vm703_vm12, %vm704_vm11  ;;  %vm713_vm15 = vweird.f32 %v694_v45 }
 0x434   :  { %v699_v17 = vmul.f32 %v4142_v60, %v698_v32 }
 0x436   :  { %v700_v38 = vmul.f32 0.5, %v699_v17  ;;  %v685_v55 = vpop.xlane.xlu2 %684 }
 0x437   :  { %v691_v36 = vmul.f32 %v685_v55, %v4542_v24 }
 0x438   :  { %v701_v15 = vsub.f32 1.5, %v700_v38 }
 0x439   :  { %v4144_v39 = vpop.eup %4143  ;;  %v695_v9 = vadd.f32 1e-05, %v691_v36 }
 0x43a   :  { %v702_v29 = vmul.f32 %v4142_v60, %v701_v15  ;;  %v708_v51 = vmul.f32 %v4144_v39, %v694_v45  ;;  %vm714_vm14 = vweird.f32 %v4144_v39 }
 0x43b   :  { %4145 = vrsqrt.f32 %v695_v9  ;;  %vm715_vm0 = vmor %vm713_vm15, %vm714_vm14  ;;  %vm723_vm2 = vweird.f32 %v695_v9 }
 0x43c   :  { %v709_v2 = vmul.f32 %v4144_v39, %v708_v51  ;;  %v706_v30 = vsel %vm705_vm13, %v4142_v60, %v702_v29 }
 0x43d   :  { %v737_v44 = vmul.f32 %v706_v30, %v669_v4 }
 0x43e   :  { %v710_v63 = vmul.f32 0.5, %v709_v2  ;;  %v688_v52 = vpop.xlane.xlu0 %687 }
 0x43f   :  { %v692_v48 = vmul.f32 %v688_v52, %v4542_v24  ;;  %v742_v37 = vmul.f32 %v4087_v33, %v737_v44 }
 0x440   :  { %v711_v58 = vsub.f32 1.5, %v710_v63 }
 0x441   :  { %v4146_v43 = vpop.eup %4145  ;;  %v696_v62 = vadd.f32 1e-05, %v692_v48  ;;  %v747_v42 = vadd.f32 %v4088_v12, %v742_v37 }
 0x442   :  { %v712_v14 = vmul.f32 %v4144_v39, %v711_v58  ;;  %v718_v47 = vmul.f32 %v4146_v43, %v695_v9  ;;  %vm724_vm3 = vweird.f32 %v4146_v43 }
 0x443   :  { %4147 = vrsqrt.f32 %v696_v62  ;;  %vm725_vm4 = vmor %vm723_vm2, %vm724_vm3  ;;  %vm733_vm6 = vweird.f32 %v696_v62 }
 0x444   :  { %v716_v7 = vsel %vm715_vm0, %v4144_v39, %v712_v14  ;;  %v719_v28 = vmul.f32 %v4146_v43, %v718_v47 }
 0x445   :  { %v738_v49 = vmul.f32 %v716_v7, %v670_v16 }
 0x446   :  { %v720_v20 = vmul.f32 0.5, %v719_v28 }
 0x447   :  { %v743_v61 = vmul.f32 %v4087_v33, %v738_v49 }
 0x448   :  { %v721_v34 = vsub.f32 1.5, %v720_v20 }
 0x449   :  { %v4148_v10 = vpop.eup %4147  ;;  %v748_v4 = vadd.f32 %v4088_v12, %v743_v61 }
 0x44a   :  { %v722_v23 = vmul.f32 %v4146_v43, %v721_v34  ;;  %v728_v53 = vmul.f32 %v4148_v10, %v696_v62  ;;  %vm734_vm5 = vweird.f32 %v4148_v10 }
 0x44b   :  { %v755_v56 = vpack.c.bf16 %v748_v4, %v747_v42  ;;  %vm735_vm7 = vmor %vm733_vm6, %vm734_vm5 }
 0x44c   :  { %v729_v27 = vmul.f32 %v4148_v10, %v728_v53  ;;  %v726_v16 = vsel %vm725_vm4, %v4146_v43, %v722_v23 }
 0x44d   :  { %3936 = vmatmul.msk.bf16.vlgmr.msra.gmra.mxu3 %vm90_vm1, %v755_v56  ;;  %v739_v41 = vmul.f32 %v726_v16, %v4964_v50 }
 0x44e   :  { %v730_v13 = vmul.f32 0.5, %v729_v27 }
 0x44f   :  { %v744_v19 = vmul.f32 %v4087_v33, %v739_v41 }
 0x450   :  { %v731_v22 = vsub.f32 1.5, %v730_v13 }
 0x451   :  { %v749_v35 = vadd.f32 %v4088_v12, %v744_v19 }
 0x452   :  { %v732_v31 = vmul.f32 %v4148_v10, %v731_v22 }
 0x454   :  { %v736_v59 = vsel %vm735_vm7, %v4148_v10, %v732_v31 }
 0x455   :  { %v740_v5 = vmul.f32 %v736_v59, %v4971_v26 }
 0x457   :  { %v745_v40 = vmul.f32 %v4087_v33, %v740_v5 }
 0x459   :  { %v750_v46 = vadd.f32 %v4088_v12, %v745_v40 }
 0x45b   :  { %v756_v1 = vpack.c.bf16 %v750_v46, %v749_v35 }
 0x45d   :  { %3937 = vmatmul.msk.bf16.gmra.mxu3 %vm90_vm1, %v756_v1 }
 0x4d0   :  { %v786_v57 = vpop.f32.mrf.mxu3 }
 0x4d1   :  { %v4999_v54 = vadd.f32 %v4089_v3, %v786_v57 }
 0x4d3   :  { %v5002_v50 = vmul.f32 0.70710677, %v4999_v54 }
 0x4d5   :  { %v804_v6 = vand.u32 2147483647, %v5002_v50 }
 0x4d7   :  { %v808_v26 = vmul.f32 0.3275911, %v804_v6  ;;  %v912_v47 = vsub.f32 0.0, %v804_v6 }
 0x4d8   :  { %v788_v60 = vpop.f32.mrf.mxu3 }
 0x4d9   :  { %v812_v45 = vadd.f32 1.0, %v808_v26  ;;  %v5005_v32 = vadd.f32 %v4089_v3, %v788_v60  ;;  %v916_v61 = vmul.f32 %v912_v47, %v804_v6 }
 0x4db   :  { %4149 = vrcp.f32 %v812_v45  ;;  %v5008_v17 = vmul.f32 0.70710677, %v5005_v32  ;;  %v827_v51 = vand.u32 2147483648, %v812_v45  ;;  %v825_v63 = vand.u32 2147483647, %v812_v45 }
 0x4dc   :  { %vm821_vm9 = vweird.f32 %v812_v45  ;;  %v920_v13 = vmul.f32 1.442695, %v916_v61 }
 0x4dd   :  { %v5011_v25 = vand.u32 2147483647, %v5008_v17  ;;  %v828_v43 = vor.u32 1.1754944e-38, %v827_v51  ;;  %vm826_vm12 = vcmp.eq.f32.partialorder %v825_v63, 8.507059e+37 }
 0x4df   :  { %v809_v38 = vmul.f32 0.3275911, %v5011_v25  ;;  %v913_v59 = vsub.f32 0.0, %v5011_v25 }
 0x4e0   :  { %v791_v55 = vpop.f32.mrf.mxu3 }
 0x4e1   :  { %v4150_v36 = vpop.eup %4149  ;;  %v5014_v21 = vadd.f32 %v4089_v3, %v791_v55  ;;  %v813_v39 = vadd.f32 1.0, %v809_v38  ;;  %v917_v60 = vmul.f32 %v913_v59, %v5011_v25 }
 0x4e2   :  { %v817_v15 = vmul.f32 %v4150_v36, %v812_v45  ;;  %vm822_vm8 = vweird.f32 %v4150_v36 }
 0x4e3   :  { %v5017_v9 = vmul.f32 0.70710677, %v5014_v21  ;;  %4151 = vrcp.f32 %v813_v39  ;;  %vm823_vm11 = vmor %vm821_vm9, %vm822_vm8  ;;  %v842_v34 = vand.u32 2147483648, %v813_v39  ;;  %v840_v42 = vand.u32 2147483647, %v813_v39 }
 0x4e4   :  { %v818_v29 = vsub.f32 1.0, %v817_v15  ;;  %vm836_vm14 = vweird.f32 %v813_v39 }
 0x4e5   :  { %v5020_v2 = vand.u32 2147483647, %v5017_v9  ;;  %v843_v22 = vor.u32 1.1754944e-38, %v842_v34  ;;  %vm841_vm0 = vcmp.eq.f32.partialorder %v840_v42, 8.507059e+37 }
 0x4e6   :  { %v819_v30 = vmul.f32 %v4150_v36, %v818_v29 }
 0x4e7   :  { %v810_v52 = vmul.f32 0.3275911, %v5020_v2 }
 0x4e8   :  { %v820_v48 = vadd.f32 %v4150_v36, %v819_v30  ;;  %v793_v58 = vpop.f32.mrf.mxu3  ;;  %v922_v30 = vmul.f32 1.442695, %v917_v60 }
 0x4e9   :  { %v814_v44 = vadd.f32 1.0, %v810_v52  ;;  %v5023_v62 = vadd.f32 %v4089_v3, %v793_v58  ;;  %v4152_v33 = vpop.eup %4151  ;;  %v914_v52 = vsub.f32 0.0, %v5020_v2 }
 0x4ea   :  { %v824_v14 = vsel %vm823_vm11, %v4150_v36, %v820_v48  ;;  %v832_v28 = vmul.f32 %v4152_v33, %v813_v39  ;;  %vm837_vm13 = vweird.f32 %v4152_v33  ;;  %vm936_vm11 = vcmp.ge.f32.partialorder %v5002_v50, 0.0 }
 0x4eb   :  { %v829_v7 = vsel %vm826_vm12, %v828_v43, %v824_v14  ;;  %4153 = vrcp.f32 %v814_v44  ;;  %v5026_v12 = vmul.f32 0.70710677, %v5023_v62  ;;  %vm838_vm15 = vmor %vm836_vm14, %vm837_vm13  ;;  %v857_v1 = vand.u32 2147483648, %v814_v44 }
 0x4ec   :  { %v876_v49 = vmul.f32 1.0614054, %v829_v7  ;;  %v833_v37 = vsub.f32 1.0, %v832_v28  ;;  %v855_v6 = vand.u32 2147483647, %v814_v44  ;;  %vm851_vm2 = vweird.f32 %v814_v44 }
 0x4ed   :  { %v5029_v4 = vand.u32 2147483647, %v5026_v12  ;;  %v858_v36 = vor.u32 1.1754944e-38, %v857_v1  ;;  %vm937_vm12 = vcmp.ge.f32.partialorder %v5008_v17, 0.0  ;;  %v797_v50 = vmul.f32 0.5, %v5005_v32 }
 0x4ee   :  { %v880_v20 = vadd.f32 -1.4531521, %v876_v49  ;;  %v834_v10 = vmul.f32 %v4152_v33, %v833_v37  ;;  %vm856_vm5 = vcmp.eq.f32.partialorder %v855_v6, 8.507059e+37  ;;  %v918_v49 = vmul.f32 %v914_v52, %v5020_v2  ;;  %v4061_v2 = vld [vmem:[%s7366_s1 + $0x48] sm:$0xff] }
 0x4ef   :  { %v811_v27 = vmul.f32 0.3275911, %v5029_v4  ;;  %vm938_vm13 = vcmp.ge.f32.partialorder %v5017_v9, 0.0  ;;  %vm939_vm14 = vcmp.ge.f32.partialorder %v5026_v12, 0.0  ;;  %v4090_v9 = vld [vmem:[%s7368_s3 + $0xd] ss:$0 sm:$0xff] }
 0x4f0   :  { %v884_v23 = vmul.f32 %v880_v20, %v829_v7  ;;  %v835_v56 = vadd.f32 %v4152_v33, %v834_v10 }
 0x4f1   :  { %v4154_v53 = vpop.eup %4153  ;;  %v815_v5 = vadd.f32 1.0, %v811_v27  ;;  %v924_v27 = vmul.f32 1.442695, %v918_v49 }
 0x4f2   :  { %v888_v16 = vadd.f32 1.4214138, %v884_v23  ;;  %v847_v41 = vmul.f32 %v4154_v53, %v814_v44  ;;  %v839_v31 = vsel %vm838_vm15, %v4152_v33, %v835_v56  ;;  %vm852_vm3 = vweird.f32 %v4154_v53 }
 0x4f3   :  { %v844_v40 = vsel %vm841_vm0, %v843_v22, %v839_v31  ;;  %4155 = vrcp.f32 %v815_v5  ;;  %vm853_vm4 = vmor %vm851_vm2, %vm852_vm3  ;;  %v872_v37 = vand.u32 2147483648, %v815_v5  ;;  %v870_v34 = vand.u32 2147483647, %v815_v5 }
 0x4f4   :  { %v892_v19 = vmul.f32 %v888_v16, %v829_v7  ;;  %v848_v35 = vsub.f32 1.0, %v847_v41  ;;  %v877_v46 = vmul.f32 1.0614054, %v844_v40  ;;  %4157 = vpow2.f32 %v920_v13 }
 0x4f5   :  { %4159 = vpow2.f32 %v922_v30  ;;  %vm866_vm7 = vweird.f32 %v815_v5  ;;  %v873_v16 = vor.u32 1.1754944e-38, %v872_v37  ;;  %vm871_vm9 = vcmp.eq.f32.partialorder %v870_v34, 8.507059e+37 }
 0x4f6   :  { %v896_v3 = vadd.f32 -0.28449672, %v892_v19  ;;  %v849_v57 = vmul.f32 %v4154_v53, %v848_v35  ;;  %v881_v26 = vadd.f32 -1.4531521, %v877_v46  ;;  %v915_v35 = vsub.f32 0.0, %v5029_v4 }
 0x4f7   :  { %4161 = vpow2.f32 %v924_v27  ;;  %v798_v34 = vmul.f32 0.5, %v5014_v21 }
 0x4f8   :  { %v900_v45 = vmul.f32 %v896_v3, %v829_v7  ;;  %v850_v38 = vadd.f32 %v4154_v53, %v849_v57  ;;  %v885_v55 = vmul.f32 %v881_v26, %v844_v40  ;;  %v919_v60 = vmul.f32 %v915_v35, %v5029_v4 }
 0x4f9   :  { %v4156_v29 = vpop.eup %4155 }
 0x4fa   :  { %v904_v15 = vadd.f32 0.2548296, %v900_v45  ;;  %v854_v39 = vsel %vm853_vm4, %v4154_v53, %v850_v38  ;;  %v889_v51 = vadd.f32 1.4214138, %v885_v55  ;;  %v862_v43 = vmul.f32 %v4156_v29, %v815_v5  ;;  %v4158_v33 = vpop.eup %4157 }
 0x4fb   :  { %v859_v63 = vsel %vm856_vm5, %v858_v36, %v854_v39  ;;  %vm867_vm6 = vweird.f32 %v4156_v29  ;;  %v4160_v41 = vpop.eup %4159  ;;  %v926_v30 = vmul.f32 1.442695, %v919_v60 }
 0x4fc   :  { %v908_v48 = vmul.f32 %v904_v15, %v829_v7  ;;  %v878_v58 = vmul.f32 1.0614054, %v859_v63  ;;  %v893_v25 = vmul.f32 %v889_v51, %v844_v40  ;;  %v863_v44 = vsub.f32 1.0, %v862_v43  ;;  %v4062_v7 = vld [vmem:[%s7366_s1 + $0x50] sm:$0xff]  ;;  %vm868_vm8 = vmor %vm866_vm7, %vm867_vm6 }
 0x4fd   :  { %986 = vmatpush.bf16.msrb.mxu3 %v4062_v7  ;;  %v4162_v39 = vpop.eup %4161  ;;  %4163 = vpow2.f32 %v926_v30 }
 0x4fe   :  { %v928_v14 = vmul.f32 %v4158_v33, %v908_v48  ;;  %v882_v47 = vadd.f32 -1.4531521, %v878_v58  ;;  %v897_v28 = vadd.f32 -0.28449672, %v893_v25  ;;  %v864_v61 = vmul.f32 %v4156_v29, %v863_v44 }
 0x500   :  { %v886_v20 = vmul.f32 %v882_v47, %v859_v63  ;;  %v932_v10 = vsub.f32 1.0, %v928_v14  ;;  %v901_v42 = vmul.f32 %v897_v28, %v844_v40  ;;  %v865_v53 = vadd.f32 %v4156_v29, %v864_v61 }
 0x501   :  { %987 = vmatpush.bf16.msrb.mxu3 %v4061_v2 }
 0x502   :  { %v890_v23 = vadd.f32 1.4214138, %v886_v20  ;;  %v905_v56 = vadd.f32 0.2548296, %v901_v42  ;;  %v869_v22 = vsel %vm868_vm8, %v4156_v29, %v865_v53  ;;  %v940_v31 = vsub.f32 0.0, %v932_v10 }
 0x503   :  { %v874_v19 = vsel %vm871_vm9, %v873_v16, %v869_v22  ;;  %v796_v29 = vmul.f32 0.5, %v4999_v54  ;;  %v4164_v54 = vpop.eup %4163 }
 0x504   :  { %v894_v13 = vmul.f32 %v890_v23, %v859_v63  ;;  %v909_v59 = vmul.f32 %v905_v56, %v844_v40  ;;  %v879_v5 = vmul.f32 1.0614054, %v874_v19  ;;  %v944_v6 = vsel %vm936_vm11, %v932_v10, %v940_v31 }
 0x505   :  { %v948_v40 = vadd.f32 1.0, %v944_v6  ;;  %v799_v10 = vmul.f32 0.5, %v5023_v62 }
 0x506   :  { %v898_v46 = vadd.f32 -0.28449672, %v894_v13  ;;  %v929_v1 = vmul.f32 %v4160_v41, %v909_v59  ;;  %v883_v57 = vadd.f32 -1.4531521, %v879_v5 }
 0x507   :  { %v952_v43 = vmul.f32 %v948_v40, %v796_v29 }
 0x508   :  { %v902_v3 = vmul.f32 %v898_v46, %v859_v63  ;;  %v933_v26 = vsub.f32 1.0, %v929_v1  ;;  %v887_v38 = vmul.f32 %v883_v57, %v874_v19 }
 0x50a   :  { %v906_v45 = vadd.f32 0.2548296, %v902_v3  ;;  %v941_v55 = vsub.f32 0.0, %v933_v26  ;;  %v891_v15 = vadd.f32 1.4214138, %v887_v38 }
 0x50c   :  { %v910_v36 = vmul.f32 %v906_v45, %v859_v63  ;;  %v945_v51 = vsel %vm937_vm12, %v933_v26, %v941_v55  ;;  %v895_v58 = vmul.f32 %v891_v15, %v874_v19 }
 0x50d   :  { %v949_v52 = vadd.f32 1.0, %v945_v51 }
 0x50e   :  { %v930_v48 = vmul.f32 %v4162_v39, %v910_v36  ;;  %v899_v33 = vadd.f32 -0.28449672, %v895_v58 }
 0x50f   :  { %v953_v4 = vmul.f32 %v949_v52, %v797_v50 }
 0x510   :  { %v934_v14 = vsub.f32 1.0, %v930_v48  ;;  %v903_v47 = vmul.f32 %v899_v33, %v874_v19 }
 0x511   :  { %v960_v25 = vpack.c.bf16 %v953_v4, %v952_v43 }
 0x512   :  { %v907_v17 = vadd.f32 0.2548296, %v903_v47  ;;  %v942_v63 = vsub.f32 0.0, %v934_v14 }
 0x513   :  { %3946 = vmatmul.msk.bf16.vlgmr.msrb.gmra.mxu3 %vm90_vm1, %v960_v25 }
 0x514   :  { %v911_v44 = vmul.f32 %v907_v17, %v874_v19  ;;  %v946_v32 = vsel %vm938_vm13, %v934_v14, %v942_v63 }
 0x515   :  { %v950_v20 = vadd.f32 1.0, %v946_v32 }
 0x516   :  { %v931_v28 = vmul.f32 %v4164_v54, %v911_v44 }
 0x517   :  { %v954_v7 = vmul.f32 %v950_v20, %v798_v34 }
 0x518   :  { %v935_v49 = vsub.f32 1.0, %v931_v28 }
 0x51a   :  { %v943_v37 = vsub.f32 0.0, %v935_v49 }
 0x51c   :  { %v947_v61 = vsel %vm939_vm14, %v935_v49, %v943_v37 }
 0x51d   :  { %v951_v42 = vadd.f32 1.0, %v947_v61 }
 0x51f   :  { %v955_v23 = vmul.f32 %v951_v42, %v799_v10 }
 0x521   :  { %v961_v53 = vpack.c.bf16 %v955_v23, %v954_v7 }
 0x523   :  { %3947 = vmatmul.msk.bf16.gmra.mxu3 %vm90_vm1, %v961_v53 }
 0x596   :  { %v989_v56 = vpop.f32.mrf.mxu3 }
 0x597   :  { %v999_v27 = vadd.f32 %v989_v56, %v4928_v11 }
 0x599   :  { %v5058_v16 = vadd.f32 %v4090_v9, %v999_v27 }
 0x59b   :  { %v1011_v21 = vsel %vm90_vm1, %v5058_v16, 0.0 }
 0x59c   :  { %1012 = vadd.xlane.f32.xlu0 %v1011_v21 }
 0x59e   :  { %v991_v62 = vpop.f32.mrf.mxu3 }
 0x59f   :  { %v1000_v22 = vadd.f32 %v991_v62, %v4936_v8 }
 0x5a1   :  { %v5068_v11 = vadd.f32 %v4090_v9, %v1000_v22 }
 0x5a3   :  { %v1014_v35 = vsel %vm90_vm1, %v5068_v11, 0.0 }
 0x5a6   :  { %v994_v12 = vpop.f32.mrf.mxu3 }
 0x5a7   :  { %v1001_v2 = vadd.f32 %v994_v12, %v4944_v18 }
 0x5a9   :  { %v5063_v13 = vadd.f32 %v4090_v9, %v1001_v2 }
 0x5ab   :  { %v1017_v41 = vsel %vm90_vm1, %v5063_v13, 0.0 }
 0x5ac   :  { %1018 = vadd.xlane.f32.xlu1 %v1017_v41 }
 0x5ae   :  { %v996_v31 = vpop.f32.mrf.mxu3 }
 0x5af   :  { %v1002_v59 = vadd.f32 %v996_v31, %v4952_v0 }
 0x5b1   :  { %v5071_v19 = vadd.f32 %v4090_v9, %v1002_v59 }
 0x5b3   :  { %v1020_v18 = vsel %vm90_vm1, %v5071_v19, 0.0 }
 0x5b4   :  { %1015 = vadd.xlane.f32.xlu1 %v1014_v35  ;;  %1021 = vadd.xlane.f32.xlu2 %v1020_v18 }
 0x60f   :  { %v1013_v8 = vpop.xlane.xlu0 %1012 }
 0x610   :  { %v1023_v46 = vmul.f32 %v1013_v8, %v4542_v24 }
 0x612   :  { %v5079_v5 = vsub.f32 %v5058_v16, %v1023_v46  ;;  %v4091_v46 = vld [vmem:[%s7368_s3 + $0x70] ss:$0 sm:$0xff] }
 0x614   :  { %v1031_v1 = vmul.f32 %v5079_v5, %v5079_v5 }
 0x616   :  { %v1035_v0 = vsel %vm90_vm1, %v1031_v1, 0.0 }
 0x617   :  { %1036 = vadd.xlane.f32.xlu1 %v1035_v0 }
 0x61f   :  { %v1019_v3 = vpop.xlane.xlu1 %1018 }
 0x620   :  { %v1025_v57 = vmul.f32 %v1019_v3, %v4542_v24 }
 0x622   :  { %v5086_v6 = vsub.f32 %v5063_v13, %v1025_v57 }
 0x624   :  { %v1033_v26 = vmul.f32 %v5086_v6, %v5086_v6 }
 0x626   :  { %v1041_v60 = vsel %vm90_vm1, %v1033_v26, 0.0 }
 0x627   :  { %v1016_v45 = vpop.xlane.xlu1 %1015  ;;  %1042 = vadd.xlane.f32.xlu2 %v1041_v60  ;;  %v1022_v38 = vpop.xlane.xlu2 %1021 }
 0x628   :  { %v1024_v55 = vmul.f32 %v1016_v45, %v4542_v24  ;;  %v1026_v40 = vmul.f32 %v1022_v38, %v4542_v24  ;;  %v4092_v45 = vld [vmem:[%s7368_s3 + $0x71] ss:$0 sm:$0xff] }
 0x62a   :  { %v5094_v36 = vsub.f32 %v5068_v11, %v1024_v55  ;;  %v5097_v15 = vsub.f32 %v5071_v19, %v1026_v40 }
 0x62c   :  { %v1032_v39 = vmul.f32 %v5094_v36, %v5094_v36  ;;  %v1034_v29 = vmul.f32 %v5097_v15, %v5097_v15 }
 0x62e   :  { %v1038_v51 = vsel %vm90_vm1, %v1032_v39, 0.0  ;;  %v1044_v30 = vsel %vm90_vm1, %v1034_v29, 0.0 }
 0x62f   :  { %1039 = vadd.xlane.f32.xlu2 %v1038_v51  ;;  %1045 = vadd.xlane.f32.xlu0 %v1044_v30 }
 0x68a   :  { %v1037_v50 = vpop.xlane.xlu1 %1036 }
 0x68b   :  { %v1047_v52 = vmul.f32 %v1037_v50, %v4542_v24  ;;  %v4065_v50 = vld [vmem:[%s7366_s1 + $0x68] sm:$0xff] }
 0x68d   :  { %v1051_v48 = vadd.f32 1e-05, %v1047_v52  ;;  %v4066_v52 = vld [vmem:[%s7366_s1 + $0x70] sm:$0xff] }
 0x68f   :  { %4165 = vrsqrt.f32 %v1051_v48  ;;  %vm1061_vm4 = vweird.f32 %v1051_v48 }
 0x695   :  { %v4166_v33 = vpop.eup %4165 }
 0x696   :  { %v1056_v25 = vmul.f32 %v4166_v33, %v1051_v48  ;;  %vm1062_vm2 = vweird.f32 %v4166_v33 }
 0x697   :  { %vm5109_vm6 = vmor %vm1061_vm4, %vm1062_vm2 }
 0x698   :  { %v1057_v32 = vmul.f32 %v4166_v33, %v1056_v25 }
 0x69a   :  { %v1043_v58 = vpop.xlane.xlu2 %1042  ;;  %v1058_v20 = vmul.f32 0.5, %v1057_v32 }
 0x69b   :  { %v1049_v43 = vmul.f32 %v1043_v58, %v4542_v24 }
 0x69c   :  { %v1059_v7 = vsub.f32 1.5, %v1058_v20 }
 0x69d   :  { %v1053_v4 = vadd.f32 1e-05, %v1049_v43  ;;  %v1119_v43 = vld [vmem:[%s7368_s3 + $0x78] sm:$0xff] }
 0x69e   :  { %v1060_v21 = vmul.f32 %v4166_v33, %v1059_v7  ;;  %v1123_v7 = vld [vmem:[%s7368_s3 + $0x98] sm:$0xff] }
 0x69f   :  { %4167 = vrsqrt.f32 %v1053_v4  ;;  %vm1081_vm0 = vweird.f32 %v1053_v4 }
 0x6a0   :  { %v1064_v18 = vsel %vm5109_vm6, %v4166_v33, %v1060_v21  ;;  %v1120_v33 = vld [vmem:[%s7368_s3 + $0x80] sm:$0xff] }
 0x6a2   :  { %v1046_v14 = vpop.xlane.xlu0 %1045  ;;  %v1040_v47 = vpop.xlane.xlu2 %1039 }
 0x6a3   :  { %v1050_v17 = vmul.f32 %v1046_v14, %v4542_v24  ;;  %v1048_v63 = vmul.f32 %v1040_v47, %v4542_v24  ;;  %v1121_v47 = vld [vmem:[%s7368_s3 + $0x88] sm:$0xff] }
 0x6a5   :  { %v4168_v44 = vpop.eup %4167  ;;  %v1054_v54 = vadd.f32 1e-05, %v1050_v17  ;;  %v1052_v28 = vadd.f32 1e-05, %v1048_v63 }
 0x6a6   :  { %v1076_v49 = vmul.f32 %v4168_v44, %v1053_v4  ;;  %vm1082_vm15 = vweird.f32 %v4168_v44 }
 0x6a7   :  { %4169 = vrsqrt.f32 %v1054_v54  ;;  %vm1083_vm3 = vmor %vm1081_vm0, %vm1082_vm15  ;;  %vm1091_vm8 = vweird.f32 %v1054_v54  ;;  %vm1071_vm11 = vweird.f32 %v1052_v28 }
 0x6a8   :  { %v1077_v37 = vmul.f32 %v4168_v44, %v1076_v49  ;;  %4171 = vrsqrt.f32 %v1052_v28 }
 0x6aa   :  { %v1078_v61 = vmul.f32 0.5, %v1077_v37 }
 0x6ac   :  { %v1079_v34 = vsub.f32 1.5, %v1078_v61 }
 0x6ad   :  { %v4170_v10 = vpop.eup %4169 }
 0x6ae   :  { %v4172_v42 = vpop.eup %4171  ;;  %v1080_v23 = vmul.f32 %v4168_v44, %v1079_v34  ;;  %v1086_v53 = vmul.f32 %v4170_v10, %v1054_v54  ;;  %vm1092_vm5 = vweird.f32 %v4170_v10  ;;  %v1122_v54 = vld [vmem:[%s7368_s3 + $0x90] sm:$0xff] }
 0x6af   :  { %v1066_v9 = vmul.f32 %v4172_v42, %v1052_v28  ;;  %vm1072_vm7 = vweird.f32 %v4172_v42  ;;  %vm1093_vm9 = vmor %vm1091_vm8, %vm1092_vm5 }
 0x6b0   :  { %v1087_v56 = vmul.f32 %v4170_v10, %v1086_v53  ;;  %v1084_v12 = vsel %vm1083_vm3, %v4168_v44, %v1080_v23  ;;  %vm1073_vm12 = vmor %vm1071_vm11, %vm1072_vm7 }
 0x6b1   :  { %v1067_v27 = vmul.f32 %v4172_v42, %v1066_v9  ;;  %v1097_v59 = vmul.f32 %v1084_v12, %v5086_v6  ;;  %v1095_v6 = vmul.f32 %v1064_v18, %v5079_v5  ;;  %v4063_v5 = vld [vmem:[%s7366_s1 + $0x58] sm:$0xff] }
 0x6b2   :  { %v1088_v62 = vmul.f32 0.5, %v1087_v56 }
 0x6b3   :  { %v1068_v2 = vmul.f32 0.5, %v1067_v27  ;;  %v1102_v3 = vmul.f32 %v4091_v46, %v1097_v59  ;;  %v1100_v39 = vmul.f32 %v4091_v46, %v1095_v6 }
 0x6b4   :  { %v1089_v22 = vsub.f32 1.5, %v1088_v62 }
 0x6b5   :  { %v1069_v31 = vsub.f32 1.5, %v1068_v2  ;;  %v1107_v55 = vadd.f32 %v4092_v45, %v1102_v3  ;;  %v1105_v30 = vadd.f32 %v4092_v45, %v1100_v39 }
 0x6b6   :  { %v1090_v35 = vmul.f32 %v4170_v10, %v1089_v22 }
 0x6b7   :  { %v1070_v8 = vmul.f32 %v4172_v42, %v1069_v31 }
 0x6b8   :  { %v1094_v1 = vsel %vm1093_vm9, %v4170_v10, %v1090_v35 }
 0x6b9   :  { %v1098_v0 = vmul.f32 %v1094_v1, %v5097_v15  ;;  %v1074_v57 = vsel %vm1073_vm12, %v4172_v42, %v1070_v8  ;;  %v1124_v8 = vld [vmem:[%s7368_s3 + $0xa0] sm:$0xff] }
 0x6ba   :  { %v1096_v26 = vmul.f32 %v1074_v57, %v5094_v36  ;;  %v4064_v36 = vld [vmem:[%s7366_s1 + $0x60] sm:$0xff] }
 0x6bb   :  { %v1103_v60 = vmul.f32 %v4091_v46, %v1098_v0 }
 0x6bc   :  { %v1101_v38 = vmul.f32 %v4091_v46, %v1096_v26 }
 0x6bd   :  { %v1108_v40 = vadd.f32 %v4092_v45, %v1103_v60  ;;  %v1125_v60 = vld [vmem:[%s7368_s3 + $0xa8] sm:$0xff] }
 0x6be   :  { %v1106_v51 = vadd.f32 %v4092_v45, %v1101_v38 }
 0x6bf   :  { %v1118_v29 = vpack.c.bf16 %v1108_v40, %v1107_v55 }
 0x6c0   :  { %v1117_v15 = vpack.c.bf16 %v1106_v51, %v1105_v30 }
 0x6c1   :  { %1165 = vmatpush.bf16.msrb.mxu0 %v1118_v29 }
 0x6c5   :  { %1166 = vmatpush.bf16.msrb.mxu0 %v1117_v15 }
 0x6c8   :  { %3964 = vmatmul.msk.bf16.vlgmr.msrb.gmra.mxu0 %vm90_vm1, %v4063_v5 }
 0x6d8   :  { %3965 = vmatmul.msk.bf16.gmra.mxu0 %vm90_vm1, %v4064_v36 }
 0x6e8   :  { %3966 = vmatmul.msk.bf16.gmra.mxu0 %vm90_vm1, %v4065_v50 }
 0x6f8   :  { %3967 = vmatmul.msk.bf16.gmra.mxu0 %vm90_vm1, %v4066_v52 }
 0x745   :  { %v1168_v48 = vpop.f32.mrf.mxu0 }
 0x746   :  { %v5144_v4 = vadd.f32 %v1168_v48, %v1119_v43 }
 0x748   :  { %v5150_v14 = vmul.f32 0.70710677, %v5144_v4 }
 0x74a   :  { %v1204_v63 = vand.u32 2147483647, %v5150_v14 }
 0x74c   :  { %v1212_v49 = vmul.f32 0.3275911, %v1204_v63  ;;  %v1420_v51 = vsub.f32 0.0, %v1204_v63 }
 0x74d   :  { %v1170_v58 = vpop.f32.mrf.mxu0 }
 0x74e   :  { %v5155_v17 = vadd.f32 %v1170_v58, %v1120_v33  ;;  %v5172_v34 = vadd.f32 1.0, %v1212_v49 }
 0x750   :  { %v5164_v28 = vmul.f32 0.70710677, %v5155_v17  ;;  %4173 = vrcp.f32 %v5172_v34  ;;  %v1239_v50 = vand.u32 2147483648, %v5172_v34  ;;  %vm1233_vm14 = vweird.f32 %v5172_v34 }
 0x752   :  { %v1205_v61 = vand.u32 2147483647, %v5164_v28 }
 0x754   :  { %v1213_v23 = vmul.f32 0.3275911, %v1205_v61  ;;  %v1421_v52 = vsub.f32 0.0, %v1205_v61 }
 0x755   :  { %v1173_v25 = vpop.f32.mrf.mxu0 }
 0x756   :  { %v5158_v44 = vadd.f32 %v1173_v25, %v1121_v47  ;;  %v5191_v62 = vadd.f32 1.0, %v1213_v23  ;;  %v5200_v41 = vpop.eup %4173  ;;  %v1237_v25 = vand.u32 2147483647, %v5172_v34  ;;  %v5253_v47 = vmul.f32 %v1420_v51, %v1204_v63 }
 0x757   :  { %v1229_v18 = vmul.f32 %v5200_v41, %v5172_v34  ;;  %vm1234_vm13 = vweird.f32 %v5200_v41  ;;  %v5267_v63 = vmul.f32 %v1421_v52, %v1205_v61 }
 0x758   :  { %v5167_v37 = vmul.f32 0.70710677, %v5158_v44  ;;  %4175 = vrcp.f32 %v5191_v62  ;;  %vm5263_vm15 = vmor %vm1233_vm14, %vm1234_vm13  ;;  %vm1248_vm0 = vweird.f32 %v5191_v62  ;;  %vm5279_vm3 = vcmp.eq.f32.partialorder %v1237_v25, 8.507059e+37 }
 0x759   :  { %v1230_v57 = vsub.f32 1.0, %v1229_v18 }
 0x75a   :  { %v5175_v10 = vand.u32 2147483647, %v5167_v37 }
 0x75b   :  { %v1231_v40 = vmul.f32 %v5200_v41, %v1230_v57 }
 0x75c   :  { %v1214_v56 = vmul.f32 0.3275911, %v5175_v10 }
 0x75d   :  { %v1175_v32 = vpop.f32.mrf.mxu0  ;;  %v5249_v58 = vadd.f32 %v5200_v41, %v1231_v40 }
 0x75e   :  { %v5169_v20 = vadd.f32 %v1175_v32, %v1122_v54  ;;  %v5198_v22 = vadd.f32 1.0, %v1214_v56  ;;  %v5216_v1 = vpop.eup %4175  ;;  %v1240_v56 = vor.u32 1.1754944e-38, %v1239_v50 }
 0x75f   :  { %v1244_v26 = vmul.f32 %v5216_v1, %v5191_v62  ;;  %v1236_v34 = vsel %vm5263_vm15, %v5200_v41, %v5249_v58  ;;  %vm1249_vm4 = vweird.f32 %v5216_v1 }
 0x760   :  { %v5178_v42 = vmul.f32 0.70710677, %v5169_v20  ;;  %vm5318_vm12 = vmor %vm1248_vm0, %vm1249_vm4  ;;  %vm1263_vm13 = vweird.f32 %v5198_v22 }
 0x761   :  { %v1245_v5 = vsub.f32 1.0, %v1244_v26 }
 0x762   :  { %v5184_v53 = vand.u32 2147483647, %v5178_v42 }
 0x763   :  { %v1246_v49 = vmul.f32 %v5216_v1, %v1245_v5 }
 0x764   :  { %v1215_v27 = vmul.f32 0.3275911, %v5184_v53 }
 0x765   :  { %v1178_v9 = vpop.f32.mrf.mxu0  ;;  %v1247_v41 = vadd.f32 %v5216_v1, %v1246_v49 }
 0x766   :  { %v5189_v21 = vadd.f32 %v1178_v9, %v1123_v7  ;;  %v5193_v12 = vadd.f32 1.0, %v1215_v27  ;;  %v1252_v7 = vand.u32 2147483647, %v5191_v62 }
 0x768   :  { %v5196_v2 = vmul.f32 0.70710677, %v5189_v21  ;;  %4177 = vrcp.f32 %v5193_v12  ;;  %vm5291_vm5 = vcmp.eq.f32.partialorder %v1252_v7, 8.507059e+37  ;;  %vm1278_vm9 = vweird.f32 %v5193_v12 }
 0x769   :  { %4179 = vrcp.f32 %v5198_v22  ;;  %v1282_v52 = vand.u32 2147483647, %v5193_v12 }
 0x76a   :  { %v5204_v31 = vand.u32 2147483647, %v5196_v2 }
 0x76c   :  { %v1216_v35 = vmul.f32 0.3275911, %v5204_v31 }
 0x76d   :  { %v1180_v59 = vpop.f32.mrf.mxu0 }
 0x76e   :  { %v5214_v46 = vadd.f32 1.0, %v1216_v35  ;;  %v5219_v0 = vadd.f32 %v1180_v59, %v1124_v8  ;;  %v5221_v3 = vpop.eup %4177  ;;  %v1254_v35 = vand.u32 2147483648, %v5191_v62  ;;  %v1267_v62 = vand.u32 2147483647, %v5198_v22 }
 0x76f   :  { %v5223_v6 = vpop.eup %4179  ;;  %v1274_v38 = vmul.f32 %v5221_v3, %v5193_v12  ;;  %vm1279_vm6 = vweird.f32 %v5221_v3 }
 0x770   :  { %4181 = vrcp.f32 %v5214_v46  ;;  %v5233_v55 = vmul.f32 0.70710677, %v5219_v0  ;;  %v1259_v39 = vmul.f32 %v5223_v6, %v5198_v22  ;;  %vm1293_vm7 = vweird.f32 %v5214_v46  ;;  %vm5336_vm14 = vmor %vm1278_vm9, %vm1279_vm6 }
 0x771   :  { %v1275_v48 = vsub.f32 1.0, %v1274_v38  ;;  %v1126_v38 = vld [vmem:[%s7368_s3 + $0xb0] sm:$0xff]  ;;  %v1297_v51 = vand.u32 2147483647, %v5214_v46  ;;  %vm1264_vm8 = vweird.f32 %v5223_v6  ;;  %vm1268_vm4 = vcmp.eq.f32.partialorder %v1267_v62, 8.507059e+37 }
 0x772   :  { %v5241_v30 = vand.u32 2147483647, %v5233_v55  ;;  %v1260_v43 = vsub.f32 1.0, %v1259_v39  ;;  %vm5342_vm15 = vmor %vm1263_vm13, %vm1264_vm8 }
 0x773   :  { %v1276_v27 = vmul.f32 %v5221_v3, %v1275_v48  ;;  %vm1298_vm0 = vcmp.eq.f32.partialorder %v1297_v51, 8.507059e+37 }
 0x774   :  { %v1217_v54 = vmul.f32 0.3275911, %v5241_v30  ;;  %v1261_v18 = vmul.f32 %v5223_v6, %v1260_v43 }
 0x775   :  { %v1183_v45 = vpop.f32.mrf.mxu0  ;;  %v1277_v39 = vadd.f32 %v5221_v3, %v1276_v27 }
 0x776   :  { %v5238_v29 = vpop.eup %4181  ;;  %v5243_v15 = vadd.f32 %v1183_v45, %v1125_v60  ;;  %v5270_v59 = vadd.f32 1.0, %v1217_v54  ;;  %v1284_v60 = vand.u32 2147483648, %v5193_v12  ;;  %v1299_v45 = vand.u32 2147483648, %v5214_v46 }
 0x777   :  { %v1289_v36 = vmul.f32 %v5238_v29, %v5214_v46  ;;  %vm1294_vm2 = vweird.f32 %v5238_v29  ;;  %v1262_v5 = vadd.f32 %v5223_v6, %v1261_v18  ;;  %v1255_v18 = vor.u32 1.1754944e-38, %v1254_v35 }
 0x778   :  { %v5257_v32 = vmul.f32 0.70710677, %v5243_v15  ;;  %4183 = vrcp.f32 %v5270_v59  ;;  %vm5310_vm11 = vmor %vm1293_vm7, %vm1294_vm2  ;;  %v1300_v25 = vor.u32 1.1754944e-38, %v1299_v45  ;;  %v1285_v49 = vor.u32 1.1754944e-38, %v1284_v60 }
 0x779   :  { %v1290_v33 = vsub.f32 1.0, %v1289_v36  ;;  %v1269_v36 = vand.u32 2147483648, %v5198_v22  ;;  %v1266_v7 = vsel %vm5342_vm15, %v5223_v6, %v1262_v5  ;;  %vm1283_vm2 = vcmp.eq.f32.partialorder %v1282_v52, 8.507059e+37 }
 0x77a   :  { %v5287_v57 = vand.u32 2147483647, %v5257_v32  ;;  %v1312_v8 = vand.u32 2147483647, %v5270_v59 }
 0x77b   :  { %v1291_v23 = vmul.f32 %v5238_v29, %v1290_v33  ;;  %v1251_v33 = vsel %vm5318_vm12, %v5216_v1, %v1247_v41  ;;  %v1281_v1 = vsel %vm5336_vm14, %v5221_v3, %v1277_v39  ;;  %v5363_v3 = vsel %vm5279_vm3, %v1240_v56, %v1236_v34 }
 0x77c   :  { %v1218_v58 = vmul.f32 0.3275911, %v5287_v57  ;;  %v5365_v41 = vsel %vm1283_vm2, %v1285_v49, %v1281_v1  ;;  %v5369_v60 = vsel %vm5291_vm5, %v1255_v18, %v1251_v33  ;;  %v1348_v34 = vmul.f32 1.0614054, %v5363_v3 }
 0x77d   :  { %v1292_v61 = vadd.f32 %v5238_v29, %v1291_v23  ;;  %v1185_v40 = vpop.f32.mrf.mxu0  ;;  %v1436_v39 = vmul.f32 1.442695, %v5253_v47  ;;  %v1351_v26 = vmul.f32 1.0614054, %v5365_v41  ;;  %v1349_v51 = vmul.f32 1.0614054, %v5369_v60 }
 0x77e   :  { %v5327_v43 = vadd.f32 %v1185_v40, %v1126_v38  ;;  %v5349_v22 = vadd.f32 1.0, %v1218_v58  ;;  %v1314_v38 = vand.u32 2147483648, %v5270_v59  ;;  %vm1308_vm3 = vweird.f32 %v5270_v59 }
 0x77f   :  { %v1296_v48 = vsel %vm5310_vm11, %v5238_v29, %v1292_v61  ;;  %v4184_v29 = vpop.eup %4183  ;;  %v1270_v61 = vor.u32 1.1754944e-38, %v1269_v36  ;;  %v1438_v58 = vmul.f32 1.442695, %v5267_v63  ;;  %vm1313_vm7 = vcmp.eq.f32.partialorder %v1312_v8, 8.507059e+37 }
 0x780   :  { %v5354_v23 = vsel %vm1298_vm0, %v1300_v25, %v1296_v48  ;;  %v1304_v9 = vmul.f32 %v4184_v29, %v5270_v59  ;;  %v5358_v27 = vmul.f32 0.70710677, %v5327_v43  ;;  %4185 = vrcp.f32 %v5349_v22 }
 0x781   :  { %v5371_v45 = vsel %vm1268_vm4, %v1270_v61, %v1266_v7  ;;  %v1352_v35 = vmul.f32 1.0614054, %v5354_v23  ;;  %vm1309_vm6 = vweird.f32 %v4184_v29  ;;  %v1315_v48 = vor.u32 1.1754944e-38, %v1314_v38 }
 0x782   :  { %v1305_v6 = vsub.f32 1.0, %v1304_v9  ;;  %v5377_v56 = vand.u32 2147483647, %v5358_v27  ;;  %v1350_v46 = vmul.f32 1.0614054, %v5371_v45  ;;  %vm1310_vm5 = vmor %vm1308_vm3, %vm1309_vm6  ;;  %v1329_v18 = vand.u32 2147483648, %v5349_v22 }
 0x783   :  { %v1360_v52 = vadd.f32 -1.4531521, %v1352_v35  ;;  %v1356_v62 = vadd.f32 -1.4531521, %v1348_v34  ;;  %v1359_v12 = vadd.f32 -1.4531521, %v1351_v26  ;;  %vm1323_vm9 = vweird.f32 %v5349_v22 }
 0x784   :  { %v1306_v40 = vmul.f32 %v4184_v29, %v1305_v6  ;;  %v1219_v36 = vmul.f32 0.3275911, %v5377_v56  ;;  %v1357_v59 = vadd.f32 -1.4531521, %v1349_v51  ;;  %v1358_v7 = vadd.f32 -1.4531521, %v1350_v46 }
 0x785   :  { %v1368_v9 = vmul.f32 %v1360_v52, %v5354_v23  ;;  %v1327_v61 = vand.u32 2147483647, %v5349_v22  ;;  %v1367_v6 = vmul.f32 %v1359_v12, %v5365_v41  ;;  %v1330_v26 = vor.u32 1.1754944e-38, %v1329_v18 }
 0x786   :  { %v1307_v5 = vadd.f32 %v4184_v29, %v1306_v40  ;;  %v4186_v50 = vpop.eup %4185  ;;  %v5390_v54 = vadd.f32 1.0, %v1219_v36  ;;  %v1364_v40 = vmul.f32 %v1356_v62, %v5363_v3  ;;  %v1365_v8 = vmul.f32 %v1357_v59, %v5369_v60 }
 0x787   :  { %v1319_v47 = vmul.f32 %v4186_v50, %v5349_v22  ;;  %vm1324_vm8 = vweird.f32 %v4186_v50  ;;  %v1366_v34 = vmul.f32 %v1358_v7, %v5371_v45  ;;  %v1376_v51 = vadd.f32 1.4214138, %v1368_v9 }
 0x788   :  { %v1311_v33 = vsel %vm1310_vm5, %v4184_v29, %v1307_v5  ;;  %4187 = vrcp.f32 %v5390_v54  ;;  %vm1325_vm11 = vmor %vm1323_vm9, %vm1324_vm8  ;;  %vm1328_vm12 = vcmp.eq.f32.partialorder %v1327_v61, 8.507059e+37  ;;  %v1422_v46 = vsub.f32 0.0, %v5175_v10 }
 0x789   :  { %v5388_v25 = vsel %vm1313_vm7, %v1315_v48, %v1311_v33  ;;  %v1320_v49 = vsub.f32 1.0, %v1319_v47  ;;  %4189 = vpow2.f32 %v1436_v39  ;;  %v1375_v52 = vadd.f32 1.4214138, %v1367_v6 }
 0x78a   :  { %v1353_v1 = vmul.f32 1.0614054, %v5388_v25  ;;  %4191 = vpow2.f32 %v1438_v58  ;;  %v1426_v22 = vsub.f32 0.0, %v5287_v57  ;;  %v1423_v58 = vsub.f32 0.0, %v5184_v53 }
 0x78b   :  { %v1321_v29 = vmul.f32 %v4186_v50, %v1320_v49  ;;  %v1374_v59 = vadd.f32 1.4214138, %v1366_v34  ;;  %v1425_v49 = vsub.f32 0.0, %v5241_v30  ;;  %v1373_v9 = vadd.f32 1.4214138, %v1365_v8 }
 0x78c   :  { %v1361_v63 = vadd.f32 -1.4531521, %v1353_v1  ;;  %v1424_v1 = vsub.f32 0.0, %v5204_v31  ;;  %v1384_v18 = vmul.f32 %v1376_v51, %v5354_v23  ;;  %v1383_v61 = vmul.f32 %v1375_v52, %v5365_v41 }
 0x78d   :  { %v1322_v38 = vadd.f32 %v4186_v50, %v1321_v29  ;;  %v1434_v6 = vmul.f32 %v1426_v22, %v5287_v57  ;;  %v1431_v8 = vmul.f32 %v1423_v58, %v5184_v53  ;;  %vm1338_vm14 = vweird.f32 %v5390_v54 }
 0x78e   :  { %v1369_v35 = vmul.f32 %v1361_v63, %v5388_v25  ;;  %v4188_v39 = vpop.eup %4187  ;;  %v1432_v51 = vmul.f32 %v1424_v1, %v5204_v31  ;;  %v1392_v52 = vadd.f32 -0.28449672, %v1384_v18  ;;  %v1381_v22 = vmul.f32 %v1373_v9, %v5369_v60 }
 0x78f   :  { %v1326_v36 = vsel %vm1325_vm11, %v4186_v50, %v1322_v38  ;;  %v1334_v62 = vmul.f32 %v4188_v39, %v5390_v54  ;;  %v5411_v12 = vpop.eup %4189  ;;  %v1372_v50 = vadd.f32 1.4214138, %v1364_v40  ;;  %v1344_v38 = vand.u32 2147483648, %v5390_v54 }
 0x790   :  { %v1377_v5 = vadd.f32 1.4214138, %v1369_v35  ;;  %v5404_v48 = vsel %vm1328_vm12, %v1330_v26, %v1326_v36  ;;  %v5415_v7 = vpop.eup %4191  ;;  %v1342_v35 = vand.u32 2147483647, %v5390_v54  ;;  %vm1339_vm13 = vweird.f32 %v4188_v39 }
 0x791   :  { %v1354_v47 = vmul.f32 1.0614054, %v5404_v48  ;;  %v1335_v29 = vsub.f32 1.0, %v1334_v62  ;;  %v1433_v36 = vmul.f32 %v1425_v49, %v5241_v30  ;;  %v1448_v62 = vmul.f32 1.442695, %v1434_v6  ;;  %vm1340_vm15 = vmor %vm1338_vm14, %vm1339_vm13 }
 0x792   :  { %v1385_v33 = vmul.f32 %v1377_v5, %v5388_v25  ;;  %v1382_v5 = vmul.f32 %v1374_v59, %v5371_v45  ;;  %vm1343_vm0 = vcmp.eq.f32.partialorder %v1342_v35, 8.507059e+37  ;;  %v1380_v31 = vmul.f32 %v1372_v50, %v5363_v3 }
 0x793   :  { %v1362_v63 = vadd.f32 -1.4531521, %v1354_v47  ;;  %v1336_v26 = vmul.f32 %v4188_v39, %v1335_v29  ;;  %v1446_v30 = vmul.f32 1.442695, %v1433_v36  ;;  %v1427_v1 = vsub.f32 0.0, %v5377_v56 }
 0x794   :  { %v1393_v40 = vadd.f32 -0.28449672, %v1385_v33  ;;  %v1391_v33 = vadd.f32 -0.28449672, %v1383_v61  ;;  %v1390_v49 = vadd.f32 -0.28449672, %v1382_v5  ;;  %v1400_v54 = vmul.f32 %v1392_v52, %v5354_v23 }
 0x795   :  { %v1370_v34 = vmul.f32 %v1362_v63, %v5404_v48  ;;  %v1337_v57 = vadd.f32 %v4188_v39, %v1336_v26  ;;  %v1345_v63 = vor.u32 1.1754944e-38, %v1344_v38  ;;  %v1389_v61 = vadd.f32 -0.28449672, %v1381_v22 }
 0x796   :  { %v1401_v29 = vmul.f32 %v1393_v40, %v5388_v25  ;;  %v1430_v6 = vmul.f32 %v1422_v46, %v5175_v10  ;;  %v1444_v38 = vmul.f32 1.442695, %v1432_v51  ;;  %4193 = vpow2.f32 %v1448_v62 }
 0x797   :  { %v1378_v47 = vadd.f32 1.4214138, %v1370_v34  ;;  %v1341_v53 = vsel %vm1340_vm15, %v4188_v39, %v1337_v57  ;;  %v1399_v40 = vmul.f32 %v1391_v33, %v5365_v41  ;;  %v1388_v34 = vadd.f32 -0.28449672, %v1380_v31 }
 0x798   :  { %v1346_v58 = vsel %vm1343_vm0, %v1345_v63, %v1341_v53  ;;  %v1409_v39 = vadd.f32 0.2548296, %v1401_v29  ;;  %v1442_v26 = vmul.f32 1.442695, %v1431_v8  ;;  %4195 = vpow2.f32 %v1446_v30 }
 0x799   :  { %v1386_v59 = vmul.f32 %v1378_v47, %v5404_v48  ;;  %v1355_v18 = vmul.f32 1.0614054, %v1346_v58  ;;  %v1435_v5 = vmul.f32 %v1427_v1, %v5377_v56  ;;  %v1398_v36 = vmul.f32 %v1390_v49, %v5371_v45 }
 0x79a   :  { %v1408_v52 = vadd.f32 0.2548296, %v1400_v54  ;;  %v1397_v10 = vmul.f32 %v1389_v61, %v5369_v60  ;;  %v1440_v46 = vmul.f32 1.442695, %v1430_v6  ;;  %4197 = vpow2.f32 %v1444_v38 }
 0x79b   :  { %v1394_v9 = vadd.f32 -0.28449672, %v1386_v59  ;;  %v1363_v50 = vadd.f32 -1.4531521, %v1355_v18  ;;  %v1407_v51 = vadd.f32 0.2548296, %v1399_v40  ;;  %v1417_v22 = vmul.f32 %v1409_v39, %v5388_v25 }
 0x79c   :  { %v4194_v63 = vpop.eup %4193  ;;  %v1396_v8 = vmul.f32 %v1388_v34, %v5363_v3  ;;  %4199 = vpow2.f32 %v1442_v26  ;;  %v1450_v56 = vmul.f32 1.442695, %v1435_v5  ;;  %v1406_v29 = vadd.f32 0.2548296, %v1398_v36 }
 0x79d   :  { %v1402_v35 = vmul.f32 %v1394_v9, %v5404_v48  ;;  %v1371_v57 = vmul.f32 %v1363_v50, %v1346_v58  ;;  %v1416_v59 = vmul.f32 %v1408_v52, %v5354_v23  ;;  %4201 = vpow2.f32 %v1440_v46 }
 0x79e   :  { %v4196_v30 = vpop.eup %4195  ;;  %v1405_v1 = vadd.f32 0.2548296, %v1397_v10  ;;  %v1415_v49 = vmul.f32 %v1407_v51, %v5365_v41  ;;  %4203 = vpow2.f32 %v1450_v56  ;;  %v1414_v18 = vmul.f32 %v1406_v29, %v5371_v45 }
 0x79f   :  { %v1410_v47 = vadd.f32 0.2548296, %v1402_v35  ;;  %v1379_v62 = vadd.f32 1.4214138, %v1371_v57  ;;  %v1457_v54 = vmul.f32 %v4196_v30, %v1417_v22  ;;  %vm1474_vm2 = vcmp.ge.f32.partialorder %v5257_v32, 0.0 }
 0x7a0   :  { %v4198_v9 = vpop.eup %4197  ;;  %v1413_v23 = vmul.f32 %v1405_v1, %v5369_v60  ;;  %vm1473_vm4 = vcmp.ge.f32.partialorder %v5233_v55, 0.0  ;;  %vm1471_vm6 = vcmp.ge.f32.partialorder %v5178_v42, 0.0  ;;  %vm1472_vm3 = vcmp.ge.f32.partialorder %v5196_v2, 0.0 }
 0x7a1   :  { %v1418_v33 = vmul.f32 %v1410_v47, %v5404_v48  ;;  %v1387_v31 = vmul.f32 %v1379_v62, %v1346_v58  ;;  %v1404_v48 = vadd.f32 0.2548296, %v1396_v8  ;;  %v1456_v61 = vmul.f32 %v4198_v9, %v1416_v59 }
 0x7a2   :  { %v4200_v40 = vpop.eup %4199  ;;  %v1465_v35 = vsub.f32 1.0, %v1457_v54  ;;  %v1453_v57 = vmul.f32 %v5415_v7, %v1413_v23  ;;  %vm1475_vm5 = vcmp.ge.f32.partialorder %v5358_v27, 0.0  ;;  %v1195_v55 = vmul.f32 0.5, %v5327_v43 }
 0x7a3   :  { %v1458_v53 = vmul.f32 %v4194_v63, %v1418_v33  ;;  %v1395_v25 = vadd.f32 -0.28449672, %v1387_v31  ;;  %v1455_v39 = vmul.f32 %v4200_v40, %v1415_v49  ;;  %v4202_v34 = vpop.eup %4201  ;;  %v1412_v26 = vmul.f32 %v1404_v48, %v5363_v3 }
 0x7a4   :  { %v1454_v41 = vmul.f32 %v4202_v34, %v1414_v18  ;;  %v1464_v5 = vsub.f32 1.0, %v1456_v61  ;;  %v4204_v47 = vpop.eup %4203  ;;  %v1481_v10 = vsub.f32 0.0, %v1465_v35  ;;  %v1461_v3 = vsub.f32 1.0, %v1453_v57  ;;  %v1556_v57 = vld [vmem:[%s7368_s3 + $0xc0] sm:$0xff] }
 0x7a5   :  { %v1466_v6 = vsub.f32 1.0, %v1458_v53  ;;  %v1403_v38 = vmul.f32 %v1395_v25, %v1346_v58  ;;  %v1463_v45 = vsub.f32 1.0, %v1455_v39  ;;  %v1452_v51 = vmul.f32 %v5411_v12, %v1412_v26 }
 0x7a6   :  { %v1462_v60 = vsub.f32 1.0, %v1454_v41  ;;  %v1480_v22 = vsub.f32 0.0, %v1464_v5  ;;  %v1489_v8 = vsel %vm1473_vm4, %v1465_v35, %v1481_v10  ;;  %v1194_v53 = vmul.f32 0.5, %v5243_v15  ;;  %v4067_v41 = vld [vmem:[%s7367_s2 + $0x10] sm:$0xff] }
 0x7a7   :  { %v1411_v50 = vadd.f32 0.2548296, %v1403_v38  ;;  %v1482_v36 = vsub.f32 0.0, %v1466_v6  ;;  %v1479_v63 = vsub.f32 0.0, %v1463_v45  ;;  %v1460_v12 = vsub.f32 1.0, %v1452_v51  ;;  %v1557_v51 = vld [vmem:[%s7368_s3 + $0xc8] sm:$0xff] }
 0x7a8   :  { %v1478_v56 = vsub.f32 0.0, %v1462_v60  ;;  %v1488_v32 = vsel %vm1472_vm3, %v1464_v5, %v1480_v22  ;;  %v1497_v59 = vadd.f32 1.0, %v1489_v8  ;;  %v1477_v30 = vsub.f32 0.0, %v1461_v3 }
 0x7a9   :  { %v1419_v52 = vmul.f32 %v1411_v50, %v1346_v58  ;;  %v1490_v33 = vsel %vm1474_vm2, %v1466_v6, %v1482_v36  ;;  %vm1470_vm7 = vcmp.ge.f32.partialorder %v5167_v37, 0.0  ;;  %v1487_v1 = vsel %vm1471_vm6, %v1463_v45, %v1479_v63 }
 0x7aa   :  { %v1498_v7 = vadd.f32 1.0, %v1490_v33  ;;  %v1496_v42 = vadd.f32 1.0, %v1488_v32  ;;  %v1193_v2 = vmul.f32 0.5, %v5219_v0  ;;  %v1476_v27 = vsub.f32 0.0, %v1460_v12 }
 0x7ab   :  { %v1459_v46 = vmul.f32 %v4204_v47, %v1419_v52  ;;  %vm1469_vm8 = vcmp.ge.f32.partialorder %v5164_v28, 0.0  ;;  %v1486_v25 = vsel %vm1470_vm7, %v1462_v60, %v1478_v56  ;;  %v1495_v9 = vadd.f32 1.0, %v1487_v1 }
 0x7ac   :  { %v1506_v49 = vmul.f32 %v1498_v7, %v1194_v53  ;;  %v1192_v48 = vmul.f32 0.5, %v5189_v21  ;;  %v1505_v15 = vmul.f32 %v1497_v59, %v1193_v2  ;;  %v1485_v43 = vsel %vm1469_vm8, %v1461_v3, %v1477_v30 }
 0x7ad   :  { %v1467_v62 = vsub.f32 1.0, %v1459_v46  ;;  %vm1468_vm9 = vcmp.ge.f32.partialorder %v5150_v14, 0.0  ;;  %v1494_v61 = vadd.f32 1.0, %v1486_v25  ;;  %v1191_v37 = vmul.f32 0.5, %v5169_v20 }
 0x7ae   :  { %v1504_v6 = vmul.f32 %v1496_v42, %v1192_v48  ;;  %v1484_v0 = vsel %vm1468_vm9, %v1460_v12, %v1476_v27  ;;  %v1493_v38 = vadd.f32 1.0, %v1485_v43  ;;  %v1190_v40 = vmul.f32 0.5, %v5158_v44  ;;  %v4069_v43 = vld [vmem:[%s7366_s1 + $0x78] sm:$0xff] }
 0x7af   :  { %v1483_v58 = vsub.f32 0.0, %v1467_v62  ;;  %v1503_v23 = vmul.f32 %v1495_v9, %v1191_v37  ;;  %v1492_v39 = vadd.f32 1.0, %v1484_v0  ;;  %v1189_v35 = vmul.f32 0.5, %v5155_v17  ;;  %v4068_v17 = vld [vmem:[%s7367_s2 + $0x18] sm:$0xff] }
 0x7b0   :  { %v1514_v28 = vpack.c.bf16 %v1505_v15, %v1504_v6  ;;  %v1502_v21 = vmul.f32 %v1494_v61, %v1190_v40  ;;  %v1188_v50 = vmul.f32 0.5, %v5144_v4  ;;  %v1555_v4 = vld [vmem:[%s7368_s3 + $0xb8] sm:$0xff] }
 0x7b1   :  { %v1491_v29 = vsel %vm1475_vm5, %v1467_v62, %v1483_v58  ;;  %v1501_v34 = vmul.f32 %v1493_v38, %v1189_v35  ;;  %v1558_v62 = vld [vmem:[%s7368_s3 + $0xd0] sm:$0xff]  ;;  %v4070_v58 = vld [vmem:[%s7366_s1 + $0x80] sm:$0xff] }
 0x7b2   :  { %v1499_v31 = vadd.f32 1.0, %v1491_v29  ;;  %v1513_v14 = vpack.c.bf16 %v1503_v23, %v1502_v21  ;;  %v1500_v26 = vmul.f32 %v1492_v39, %v1188_v50  ;;  %1695 = vmatpush.bf16.msrb.mxu1 %v4070_v58 }
 0x7b4   :  { %v1507_v54 = vmul.f32 %v1499_v31, %v1195_v55  ;;  %v1512_v20 = vpack.c.bf16 %v1501_v34, %v1500_v26 }
 0x7b6   :  { %v1515_v18 = vpack.c.bf16 %v1507_v54, %v1506_v49  ;;  %1696 = vmatpush.bf16.msrb.mxu1 %v4069_v43 }
 0x7b8   :  { %1536 = vmatpush.bf16.msra.mxu2 %v1515_v18 }
 0x7bc   :  { %1537 = vmatpush.bf16.msra.mxu2 %v1514_v28 }
 0x7c0   :  { %1538 = vmatpush.bf16.msra.mxu2 %v1513_v14 }
 0x7c4   :  { %1539 = vmatpush.bf16.msra.mxu2 %v1512_v20 }
 0x7c7   :  { %3976 = vmatmul.msk.bf16.vlgmr.msra.gmra.mxu2 %vm613_vm10, %v4067_v41 }
 0x7d7   :  { %3977 = vmatmul.msk.bf16.gmra.mxu2 %vm613_vm10, %v4068_v17 }
 0x84a   :  { %v1541_v44 = vpop.f32.mrf.mxu2 }
 0x84b   :  { %v1551_v5 = vadd.f32 %v1541_v44, %v5058_v16 }
 0x84d   :  { %v5478_v36 = vadd.f32 %v1555_v4, %v1551_v5 }
 0x84f   :  { %v1565_v52 = vsel %vm90_vm1, %v5478_v36, 0.0 }
 0x850   :  { %1566 = vadd.xlane.f32.xlu0 %v1565_v52 }
 0x852   :  { %v1543_v47 = vpop.f32.mrf.mxu2 }
 0x853   :  { %v1552_v45 = vadd.f32 %v1543_v47, %v5068_v11 }
 0x855   :  { %v5486_v10 = vadd.f32 %v1556_v57, %v1552_v45  ;;  %v4093_v57 = vld [vmem:[%s7368_s3 + $0x72] ss:$0 sm:$0xff] }
 0x857   :  { %v1568_v46 = vsel %vm90_vm1, %v5486_v10, 0.0 }
 0x858   :  { %1569 = vadd.xlane.f32.xlu1 %v1568_v46 }
 0x85a   :  { %v1546_v16 = vpop.f32.mrf.mxu2 }
 0x85b   :  { %v1553_v60 = vadd.f32 %v1546_v16, %v5063_v13 }
 0x85d   :  { %v5494_v22 = vadd.f32 %v1557_v51, %v1553_v60 }
 0x85f   :  { %v1571_v33 = vsel %vm90_vm1, %v5494_v22, 0.0 }
 0x860   :  { %1572 = vadd.xlane.f32.xlu2 %v1571_v33 }
 0x862   :  { %v1548_v11 = vpop.f32.mrf.mxu2 }
 0x863   :  { %v1554_v3 = vadd.f32 %v1548_v11, %v5071_v19  ;;  %v4094_v11 = vld [vmem:[%s7368_s3 + $0x73] ss:$0 sm:$0xff] }
 0x865   :  { %v5502_v63 = vadd.f32 %v1558_v62, %v1554_v3 }
 0x867   :  { %v1574_v8 = vsel %vm90_vm1, %v5502_v63, 0.0 }
 0x868   :  { %1575 = vadd.xlane.f32.xlu0 %v1574_v8 }
 0x8c3   :  { %v1567_v13 = vpop.xlane.xlu0 %1566 }
 0x8c4   :  { %v1577_v7 = vmul.f32 %v1567_v13, %v4542_v24 }
 0x8c6   :  { %v1581_v12 = vsub.f32 %v5478_v36, %v1577_v7 }
 0x8c8   :  { %v1585_v56 = vmul.f32 %v1581_v12, %v1581_v12 }
 0x8ca   :  { %v1589_v32 = vsel %vm90_vm1, %v1585_v56, 0.0 }
 0x8cb   :  { %1590 = vadd.xlane.f32.xlu1 %v1589_v32  ;;  %v1570_v19 = vpop.xlane.xlu1 %1569 }
 0x8cc   :  { %v1578_v29 = vmul.f32 %v1570_v19, %v4542_v24 }
 0x8ce   :  { %v1582_v59 = vsub.f32 %v5486_v10, %v1578_v29 }
 0x8d0   :  { %v1586_v53 = vmul.f32 %v1582_v59, %v1582_v59 }
 0x8d2   :  { %v1592_v55 = vsel %vm90_vm1, %v1586_v53, 0.0 }
 0x8d3   :  { %1593 = vadd.xlane.f32.xlu2 %v1592_v55  ;;  %v1573_v31 = vpop.xlane.xlu2 %1572 }
 0x8d4   :  { %v1579_v30 = vmul.f32 %v1573_v31, %v4542_v24 }
 0x8d6   :  { %v5517_v1 = vsub.f32 %v5494_v22, %v1579_v30 }
 0x8d8   :  { %v1587_v42 = vmul.f32 %v5517_v1, %v5517_v1 }
 0x8da   :  { %v1595_v2 = vsel %vm90_vm1, %v1587_v42, 0.0 }
 0x8db   :  { %1596 = vadd.xlane.f32.xlu0 %v1595_v2  ;;  %v1576_v49 = vpop.xlane.xlu0 %1575 }
 0x8dc   :  { %v1580_v54 = vmul.f32 %v1576_v49, %v4542_v24 }
 0x8de   :  { %v5524_v27 = vsub.f32 %v5502_v63, %v1580_v54 }
 0x8e0   :  { %v1588_v25 = vmul.f32 %v5524_v27, %v5524_v27 }
 0x8e2   :  { %v1598_v9 = vsel %vm90_vm1, %v1588_v25, 0.0 }
 0x8e3   :  { %1599 = vadd.xlane.f32.xlu1 %v1598_v9 }
 0x93e   :  { %v1591_v48 = vpop.xlane.xlu1 %1590 }
 0x93f   :  { %v1601_v15 = vmul.f32 %v1591_v48, %v4542_v24  ;;  %v4095_v48 = vld [vmem:[%s7368_s3 + $0x74] ss:$0 sm:$0xff] }
 0x941   :  { %v1605_v18 = vadd.f32 1e-05, %v1601_v15 }
 0x943   :  { %4205 = vrsqrt.f32 %v1605_v18  ;;  %vm1615_vm11 = vweird.f32 %v1605_v18 }
 0x946   :  { %v1594_v61 = vpop.xlane.xlu2 %1593 }
 0x947   :  { %v1602_v37 = vmul.f32 %v1594_v61, %v4542_v24 }
 0x949   :  { %v4206_v6 = vpop.eup %4205  ;;  %v1606_v0 = vadd.f32 1e-05, %v1602_v37 }
 0x94a   :  { %v1610_v38 = vmul.f32 %v4206_v6, %v1605_v18  ;;  %vm1616_vm10 = vweird.f32 %v4206_v6 }
 0x94b   :  { %4207 = vrsqrt.f32 %v1606_v0  ;;  %vm1617_vm12 = vmor %vm1615_vm11, %vm1616_vm10  ;;  %vm1625_vm14 = vweird.f32 %v1606_v0 }
 0x94c   :  { %v1611_v40 = vmul.f32 %v4206_v6, %v1610_v38 }
 0x94e   :  { %v1612_v23 = vmul.f32 0.5, %v1611_v40  ;;  %v1597_v28 = vpop.xlane.xlu0 %1596 }
 0x94f   :  { %v1603_v39 = vmul.f32 %v1597_v28, %v4542_v24 }
 0x950   :  { %v1613_v35 = vsub.f32 1.5, %v1612_v23 }
 0x951   :  { %v4208_v21 = vpop.eup %4207  ;;  %v1607_v50 = vadd.f32 1e-05, %v1603_v39 }
 0x952   :  { %v1614_v34 = vmul.f32 %v4206_v6, %v1613_v35  ;;  %v1620_v14 = vmul.f32 %v4208_v21, %v1606_v0  ;;  %vm1626_vm13 = vweird.f32 %v4208_v21 }
 0x953   :  { %4209 = vrsqrt.f32 %v1607_v50  ;;  %vm1627_vm15 = vmor %vm1625_vm14, %vm1626_vm13  ;;  %vm1635_vm2 = vweird.f32 %v1607_v50 }
 0x954   :  { %v1621_v26 = vmul.f32 %v4208_v21, %v1620_v14  ;;  %v1618_v20 = vsel %vm1617_vm12, %v4206_v6, %v1614_v34 }
 0x955   :  { %v1649_v52 = vmul.f32 %v1618_v20, %v1581_v12 }
 0x956   :  { %v1622_v41 = vmul.f32 0.5, %v1621_v26  ;;  %v1600_v17 = vpop.xlane.xlu1 %1599 }
 0x957   :  { %v1604_v44 = vmul.f32 %v1600_v17, %v4542_v24  ;;  %v1654_v33 = vmul.f32 %v4093_v57, %v1649_v52 }
 0x958   :  { %v1623_v4 = vsub.f32 1.5, %v1622_v41 }
 0x959   :  { %v4210_v5 = vpop.eup %4209  ;;  %v1608_v47 = vadd.f32 1e-05, %v1604_v44  ;;  %v1659_v58 = vadd.f32 %v4094_v11, %v1654_v33 }
 0x95a   :  { %v1624_v45 = vmul.f32 %v4208_v21, %v1623_v4  ;;  %v1630_v46 = vmul.f32 %v4210_v5, %v1607_v50  ;;  %vm1636_vm0 = vweird.f32 %v4210_v5 }
 0x95b   :  { %4211 = vrsqrt.f32 %v1608_v47  ;;  %vm1637_vm4 = vmor %vm1635_vm2, %vm1636_vm0  ;;  %vm1645_vm3 = vweird.f32 %v1608_v47 }
 0x95c   :  { %v1628_v16 = vsel %vm1627_vm15, %v4208_v21, %v1624_v45  ;;  %v1631_v51 = vmul.f32 %v4210_v5, %v1630_v46 }
 0x95d   :  { %v1650_v60 = vmul.f32 %v1628_v16, %v1582_v59 }
 0x95e   :  { %v1632_v62 = vmul.f32 0.5, %v1631_v51 }
 0x95f   :  { %v1655_v3 = vmul.f32 %v4093_v57, %v1650_v60 }
 0x960   :  { %v1633_v8 = vsub.f32 1.5, %v1632_v62 }
 0x961   :  { %v4212_v13 = vpop.eup %4211  ;;  %v1660_v7 = vadd.f32 %v4094_v11, %v1655_v3 }
 0x962   :  { %v1634_v12 = vmul.f32 %v4210_v5, %v1633_v8  ;;  %v1640_v56 = vmul.f32 %v4212_v13, %v1608_v47  ;;  %vm1646_vm6 = vweird.f32 %v4212_v13 }
 0x963   :  { %v1667_v32 = vpack.c.bf16 %v1660_v7, %v1659_v58  ;;  %vm1647_vm5 = vmor %vm1645_vm3, %vm1646_vm6 }
 0x964   :  { %v1641_v19 = vmul.f32 %v4212_v13, %v1640_v56  ;;  %v1638_v29 = vsel %vm1637_vm4, %v4210_v5, %v1634_v12 }
 0x965   :  { %3986 = vmatmul.msk.bf16.vlgmr.msrb.gmra.mxu1 %vm90_vm1, %v1667_v32  ;;  %v1651_v55 = vmul.f32 %v1638_v29, %v5517_v1 }
 0x966   :  { %v1642_v59 = vmul.f32 0.5, %v1641_v19 }
 0x967   :  { %v1656_v2 = vmul.f32 %v4093_v57, %v1651_v55 }
 0x968   :  { %v1643_v53 = vsub.f32 1.5, %v1642_v59 }
 0x969   :  { %v1661_v54 = vadd.f32 %v4094_v11, %v1656_v2 }
 0x96a   :  { %v1644_v31 = vmul.f32 %v4212_v13, %v1643_v53 }
 0x96c   :  { %v1648_v30 = vsel %vm1647_vm5, %v4212_v13, %v1644_v31 }
 0x96d   :  { %v1652_v42 = vmul.f32 %v1648_v30, %v5524_v27 }
 0x96f   :  { %v1657_v49 = vmul.f32 %v4093_v57, %v1652_v42 }
 0x971   :  { %v1662_v25 = vadd.f32 %v4094_v11, %v1657_v49 }
 0x973   :  { %v1668_v9 = vpack.c.bf16 %v1662_v25, %v1661_v54 }
 0x975   :  { %3987 = vmatmul.msk.bf16.gmra.mxu1 %vm90_vm1, %v1668_v9 }
 0x9e2   :  { %v1698_v15 = vpop.f32.mrf.mxu1 }
 0x9e3   :  { %v5549_v18 = vadd.f32 %v4095_v48, %v1698_v15 }
 0x9e5   :  { %v5552_v1 = vmul.f32 0.70710677, %v5549_v18 }
 0x9e7   :  { %v1716_v43 = vand.u32 2147483647, %v5552_v1 }
 0x9e9   :  { %v1720_v27 = vmul.f32 0.3275911, %v1716_v43  ;;  %v1824_v46 = vsub.f32 0.0, %v1716_v43 }
 0x9ea   :  { %v1700_v61 = vpop.f32.mrf.mxu1 }
 0x9eb   :  { %v1724_v37 = vadd.f32 1.0, %v1720_v27  ;;  %v5555_v6 = vadd.f32 %v4095_v48, %v1700_v61  ;;  %v1828_v3 = vmul.f32 %v1824_v46, %v1716_v43 }
 0x9ed   :  { %4213 = vrcp.f32 %v1724_v37  ;;  %v5558_v0 = vmul.f32 0.70710677, %v5555_v6  ;;  %v1739_v14 = vand.u32 2147483648, %v1724_v37  ;;  %v1737_v41 = vand.u32 2147483647, %v1724_v37 }
 0x9ee   :  { %vm1733_vm8 = vweird.f32 %v1724_v37  ;;  %v1832_v59 = vmul.f32 1.442695, %v1828_v3 }
 0x9ef   :  { %v5561_v38 = vand.u32 2147483647, %v5558_v0  ;;  %v1740_v5 = vor.u32 1.1754944e-38, %v1739_v14  ;;  %vm1738_vm10 = vcmp.eq.f32.partialorder %v1737_v41, 8.507059e+37 }
 0x9f1   :  { %v1721_v40 = vmul.f32 0.3275911, %v5561_v38  ;;  %v1825_v30 = vsub.f32 0.0, %v5561_v38 }
 0x9f2   :  { %v1703_v23 = vpop.f32.mrf.mxu1 }
 0x9f3   :  { %v4214_v28 = vpop.eup %4213  ;;  %v5564_v39 = vadd.f32 %v4095_v48, %v1703_v23  ;;  %v1725_v21 = vadd.f32 1.0, %v1721_v40  ;;  %v1829_v61 = vmul.f32 %v1825_v30, %v5561_v38  ;;  %v4072_v38 = vld [vmem:[%s7366_s1 + $0x90] sm:$0xff] }
 0x9f4   :  { %v1729_v35 = vmul.f32 %v4214_v28, %v1724_v37  ;;  %vm1734_vm7 = vweird.f32 %v4214_v28  ;;  %1898 = vmatpush.bf16.msra.mxu3 %v4072_v38 }
 0x9f5   :  { %v5567_v50 = vmul.f32 0.70710677, %v5564_v39  ;;  %4215 = vrcp.f32 %v1725_v21  ;;  %vm1735_vm9 = vmor %vm1733_vm8, %vm1734_vm7  ;;  %v1754_v8 = vand.u32 2147483648, %v1725_v21  ;;  %v1752_v58 = vand.u32 2147483647, %v1725_v21 }
 0x9f6   :  { %v1730_v34 = vsub.f32 1.0, %v1729_v35  ;;  %vm1748_vm12 = vweird.f32 %v1725_v21  ;;  %vm1848_vm8 = vcmp.ge.f32.partialorder %v5552_v1, 0.0  ;;  %v1709_v1 = vmul.f32 0.5, %v5555_v6 }
 0x9f7   :  { %v5570_v26 = vand.u32 2147483647, %v5567_v50  ;;  %v1755_v53 = vor.u32 1.1754944e-38, %v1754_v8  ;;  %vm1753_vm14 = vcmp.eq.f32.partialorder %v1752_v58, 8.507059e+37 }
 0x9f8   :  { %v1731_v20 = vmul.f32 %v4214_v28, %v1730_v34 }
 0x9f9   :  { %v1722_v17 = vmul.f32 0.3275911, %v5570_v26 }
 0x9fa   :  { %v1732_v44 = vadd.f32 %v4214_v28, %v1731_v20  ;;  %v1705_v4 = vpop.f32.mrf.mxu1  ;;  %v1834_v20 = vmul.f32 1.442695, %v1829_v61 }
 0x9fb   :  { %v1726_v52 = vadd.f32 1.0, %v1722_v17  ;;  %v5573_v47 = vadd.f32 %v4095_v48, %v1705_v4  ;;  %v4216_v57 = vpop.eup %4215  ;;  %v1826_v17 = vsub.f32 0.0, %v5570_v26 }
 0x9fc   :  { %v1736_v45 = vsel %vm1735_vm9, %v4214_v28, %v1732_v44  ;;  %v1744_v51 = vmul.f32 %v4216_v57, %v1725_v21  ;;  %vm1749_vm11 = vweird.f32 %v4216_v57  ;;  %vm1849_vm9 = vcmp.ge.f32.partialorder %v5558_v0, 0.0 }
 0x9fd   :  { %v1741_v16 = vsel %vm1738_vm10, %v1740_v5, %v1736_v45  ;;  %4217 = vrcp.f32 %v1726_v52  ;;  %v5576_v11 = vmul.f32 0.70710677, %v5573_v47  ;;  %vm1750_vm13 = vmor %vm1748_vm12, %vm1749_vm11  ;;  %v1769_v9 = vand.u32 2147483648, %v1726_v52 }
 0x9fe   :  { %v1788_v60 = vmul.f32 1.0614054, %v1741_v16  ;;  %v1745_v33 = vsub.f32 1.0, %v1744_v51  ;;  %v1767_v43 = vand.u32 2147483647, %v1726_v52  ;;  %vm1763_vm0 = vweird.f32 %v1726_v52 }
 0x9ff   :  { %v5579_v7 = vand.u32 2147483647, %v5576_v11  ;;  %v1770_v28 = vor.u32 1.1754944e-38, %v1769_v9  ;;  %vm1850_vm10 = vcmp.ge.f32.partialorder %v5567_v50, 0.0  ;;  %vm1851_vm11 = vcmp.ge.f32.partialorder %v5576_v11, 0.0 }
 0xa00   :  { %v1792_v62 = vadd.f32 -1.4531521, %v1788_v60  ;;  %v1746_v13 = vmul.f32 %v4216_v57, %v1745_v33  ;;  %vm1768_vm4 = vcmp.eq.f32.partialorder %v1767_v43, 8.507059e+37  ;;  %v1830_v33 = vmul.f32 %v1826_v17, %v5570_v26 }
 0xa01   :  { %v1723_v19 = vmul.f32 0.3275911, %v5579_v7 }
 0xa02   :  { %v1796_v12 = vmul.f32 %v1792_v62, %v1741_v16  ;;  %v1747_v32 = vadd.f32 %v4216_v57, %v1746_v13  ;;  %v4071_v13 = vld [vmem:[%s7366_s1 + $0x88] sm:$0xff] }
 0xa03   :  { %v4218_v56 = vpop.eup %4217  ;;  %v1727_v42 = vadd.f32 1.0, %v1723_v19  ;;  %1899 = vmatpush.bf16.msra.mxu3 %v4071_v13 }
 0xa04   :  { %v1800_v29 = vadd.f32 1.4214138, %v1796_v12  ;;  %v1759_v55 = vmul.f32 %v4218_v56, %v1726_v52  ;;  %v1751_v31 = vsel %vm1750_vm13, %v4216_v57, %v1747_v32  ;;  %vm1764_vm15 = vweird.f32 %v4218_v56 }
 0xa05   :  { %v1756_v49 = vsel %vm1753_vm14, %v1755_v53, %v1751_v31  ;;  %4219 = vrcp.f32 %v1727_v42  ;;  %vm1765_vm2 = vmor %vm1763_vm0, %vm1764_vm15  ;;  %v1784_v62 = vand.u32 2147483648, %v1727_v42  ;;  %vm1778_vm3 = vweird.f32 %v1727_v42 }
 0xa06   :  { %v1804_v2 = vmul.f32 %v1800_v29, %v1741_v16  ;;  %v1760_v54 = vsub.f32 1.0, %v1759_v55  ;;  %v1789_v25 = vmul.f32 1.0614054, %v1756_v49  ;;  %4221 = vpow2.f32 %v1832_v59 }
 0xa07   :  { %4223 = vpow2.f32 %v1834_v20  ;;  %v1836_v29 = vmul.f32 1.442695, %v1830_v33  ;;  %v1785_v59 = vor.u32 1.1754944e-38, %v1784_v62  ;;  %vm7371_vm13 = vcmask 1041409  }
 0xa08   :  { %v1808_v48 = vadd.f32 -0.28449672, %v1804_v2  ;;  %v1761_v15 = vmul.f32 %v4218_v56, %v1760_v54  ;;  %v1793_v27 = vadd.f32 -1.4531521, %v1789_v25  ;;  %v1827_v54 = vsub.f32 0.0, %v5579_v7 }
 0xa09   :  { %4225 = vpow2.f32 %v1836_v29  ;;  %vm1955_vm14 = vcmask 254976  }
 0xa0a   :  { %v1812_v37 = vmul.f32 %v1808_v48, %v1741_v16  ;;  %v1762_v40 = vadd.f32 %v4218_v56, %v1761_v15  ;;  %v1797_v23 = vmul.f32 %v1793_v27, %v1756_v49  ;;  %v1831_v61 = vmul.f32 %v1827_v54, %v5579_v7 }
 0xa0b   :  { %v4220_v34 = vpop.eup %4219 }
 0xa0c   :  { %v1816_v35 = vadd.f32 0.2548296, %v1812_v37  ;;  %v1766_v21 = vsel %vm1765_vm2, %v4218_v56, %v1762_v40  ;;  %v1801_v14 = vadd.f32 1.4214138, %v1797_v23  ;;  %v1774_v5 = vmul.f32 %v4220_v34, %v1727_v42  ;;  %v4222_v52 = vpop.eup %4221 }
 0xa0d   :  { %v1771_v41 = vsel %vm1768_vm4, %v1770_v28, %v1766_v21  ;;  %vm1779_vm6 = vweird.f32 %v4220_v34  ;;  %v4224_v55 = vpop.eup %4223  ;;  %v1838_v20 = vmul.f32 1.442695, %v1831_v61  ;;  %vm2443_vm4 = vcmask 258048  }
 0xa0e   :  { %v1820_v44 = vmul.f32 %v1816_v35, %v1741_v16  ;;  %v1790_v4 = vmul.f32 1.0614054, %v1771_v41  ;;  %v1805_v57 = vmul.f32 %v1801_v14, %v1756_v49  ;;  %v1775_v51 = vsub.f32 1.0, %v1774_v5  ;;  %vm1780_vm5 = vmor %vm1778_vm3, %vm1779_vm6 }
 0xa0f   :  { %v1782_v16 = vand.u32 2147483647, %v1727_v42  ;;  %v4226_v21 = vpop.eup %4225  ;;  %4227 = vpow2.f32 %v1838_v20 }
 0xa10   :  { %v1840_v45 = vmul.f32 %v4222_v52, %v1820_v44  ;;  %v1794_v46 = vadd.f32 -1.4531521, %v1790_v4  ;;  %v1809_v60 = vadd.f32 -0.28449672, %v1805_v57  ;;  %v1776_v8 = vmul.f32 %v4220_v34, %v1775_v51 }
 0xa11   :  { %vm1783_vm7 = vcmp.eq.f32.partialorder %v1782_v16, 8.507059e+37  ;;  %v1711_v16 = vmul.f32 0.5, %v5573_v47 }
 0xa12   :  { %v1798_v3 = vmul.f32 %v1794_v46, %v1771_v41  ;;  %v1844_v58 = vsub.f32 1.0, %v1840_v45  ;;  %v1813_v12 = vmul.f32 %v1809_v60, %v1756_v49  ;;  %v1777_v32 = vadd.f32 %v4220_v34, %v1776_v8 }
 0xa13   :  { %v1710_v8 = vmul.f32 0.5, %v5564_v39 }
 0xa14   :  { %v1802_v56 = vadd.f32 1.4214138, %v1798_v3  ;;  %v1817_v19 = vadd.f32 0.2548296, %v1813_v12  ;;  %v1781_v53 = vsel %vm1780_vm5, %v4220_v34, %v1777_v32  ;;  %v1852_v31 = vsub.f32 0.0, %v1844_v58 }
 0xa15   :  { %v1786_v2 = vsel %vm1783_vm7, %v1785_v59, %v1781_v53  ;;  %v1708_v34 = vmul.f32 0.5, %v5549_v18  ;;  %v4228_v18 = vpop.eup %4227 }
 0xa16   :  { %v1806_v26 = vmul.f32 %v1802_v56, %v1771_v41  ;;  %v1821_v30 = vmul.f32 %v1817_v19, %v1756_v49  ;;  %v1791_v9 = vmul.f32 1.0614054, %v1786_v2  ;;  %v1856_v43 = vsel %vm1848_vm8, %v1844_v58, %v1852_v31  ;;  %v4096_v19 = vld [vmem:[%s7368_s3 + $0x75] ss:$0 sm:$0xff] }
 0xa17   :  { %v1860_v28 = vadd.f32 1.0, %v1856_v43  ;;  %v4474_v31 = vmov 16.0  }
 0xa18   :  { %v1810_v25 = vadd.f32 -0.28449672, %v1806_v26  ;;  %v1841_v48 = vmul.f32 %v4224_v55, %v1821_v30  ;;  %v1795_v15 = vadd.f32 -1.4531521, %v1791_v9  ;;  %4229 = vrcp.f32 %v4474_v31 }
 0xa19   :  { %v1864_v5 = vmul.f32 %v1860_v28, %v1708_v34 }
 0xa1a   :  { %v1814_v42 = vmul.f32 %v1810_v25, %v1771_v41  ;;  %v1845_v27 = vsub.f32 1.0, %v1841_v48  ;;  %v1799_v40 = vmul.f32 %v1795_v15, %v1786_v2 }
 0xa1c   :  { %v1818_v37 = vadd.f32 0.2548296, %v1814_v42  ;;  %v1853_v23 = vsub.f32 0.0, %v1845_v27  ;;  %v1803_v35 = vadd.f32 1.4214138, %v1799_v40 }
 0xa1e   :  { %v1822_v49 = vmul.f32 %v1818_v37, %v1771_v41  ;;  %v1857_v14 = vsel %vm1849_vm9, %v1845_v27, %v1853_v23  ;;  %v1807_v4 = vmul.f32 %v1803_v35, %v1786_v2 }
 0xa1f   :  { %v1861_v17 = vadd.f32 1.0, %v1857_v14 }
 0xa20   :  { %v1842_v44 = vmul.f32 %v4226_v21, %v1822_v49  ;;  %v1811_v38 = vadd.f32 -0.28449672, %v1807_v4 }
 0xa21   :  { %v1865_v7 = vmul.f32 %v1861_v17, %v1709_v1 }
 0xa22   :  { %v1846_v57 = vsub.f32 1.0, %v1842_v44  ;;  %v1815_v45 = vmul.f32 %v1811_v38, %v1786_v2 }
 0xa23   :  { %v1872_v52 = vpack.c.bf16 %v1865_v7, %v1864_v5 }
 0xa24   :  { %v1819_v0 = vadd.f32 0.2548296, %v1815_v45  ;;  %v1854_v41 = vsub.f32 0.0, %v1846_v57 }
 0xa25   :  { %3996 = vmatmul.msk.bf16.vlgmr.msra.gmra.mxu3 %vm90_vm1, %v1872_v52 }
 0xa26   :  { %v1823_v46 = vmul.f32 %v1819_v0, %v1786_v2  ;;  %v1858_v6 = vsel %vm1850_vm10, %v1846_v57, %v1854_v41  ;;  %v4230_v2 = vpop.eup %4229 }
 0xa27   :  { %v1862_v62 = vadd.f32 1.0, %v1858_v6  ;;  %vm1944_vm12 = vweird.f32 %v4230_v2 }
 0xa28   :  { %v1843_v51 = vmul.f32 %v4228_v18, %v1823_v46 }
 0xa29   :  { %v1866_v58 = vmul.f32 %v1862_v62, %v1710_v8 }
 0xa2a   :  { %v1847_v60 = vsub.f32 1.0, %v1843_v51 }
 0xa2c   :  { %v1855_v33 = vsub.f32 0.0, %v1847_v60 }
 0xa2e   :  { %v1859_v3 = vsel %vm1851_vm11, %v1847_v60, %v1855_v33 }
 0xa2f   :  { %v1863_v13 = vadd.f32 1.0, %v1859_v3 }
 0xa31   :  { %v1867_v12 = vmul.f32 %v1863_v13, %v1711_v16 }
 0xa33   :  { %v1873_v56 = vpack.c.bf16 %v1867_v12, %v1866_v58  ;;  %v4097_v12 = vld [vmem:[%s7368_s3 + $0x1] ss:$0 sm:$0xff] }
 0xa35   :  { %3997 = vmatmul.msk.bf16.gmra.mxu3 %vm90_vm1, %v1873_v56 }
 0xaa8   :  { %v1901_v32 = vpop.f32.mrf.mxu3 }
 0xaa9   :  { %v1911_v50 = vadd.f32 %v1901_v32, %v5478_v36 }
 0xaab   :  { %v1917_v39 = vadd.f32 %v4096_v19, %v1911_v50 }
 0xaad   :  { %v1921_v26 = vsel %vm90_vm1, %v1917_v39, 0.0  ;;  %v5628_v39 = vld [vmem:[%s7369_s4 + $0x20] sm:$0x1f] }
 0xab0   :  { %v1903_v29 = vpop.f32.mrf.mxu3 }
 0xab1   :  { %v1912_v11 = vadd.f32 %v1903_v29, %v5486_v10  ;;  %v1940_v10 = vmul.f32 16.0, %v4230_v2 }
 0xab3   :  { %v1918_v59 = vadd.f32 %v4096_v19, %v1912_v11  ;;  %v1941_v61 = vsub.f32 1.0, %v1940_v10 }
 0xab5   :  { %v1922_v47 = vsel %vm90_vm1, %v1918_v59, 0.0  ;;  %v1942_v28 = vmul.f32 %v4230_v2, %v1941_v61 }
 0xab6   :  { %v1923_v53 = vadd.f32 %v1922_v47, %v1921_v26  ;;  %v5633_v47 = vld [vmem:[%s7369_s4 + $0x70] sm:$0x1f]  ;;  %v5638_v26 = vld [vmem:[%s7369_s4 + $0x8] sm:$0x1f] }
 0xab7   :  { %v1943_v21 = vadd.f32 %v4230_v2, %v1942_v28 }
 0xab8   :  { %v1906_v55 = vpop.f32.mrf.mxu3  ;;  %v1924_v30 = vrot.slane %v1923_v53, 4 }
 0xab9   :  { %v1913_v36 = vadd.f32 %v1906_v55, %v5494_v22  ;;  %v1945_v20 = vsel %vm1944_vm12, %v4230_v2, %v1943_v21  ;;  %v5646_v55 = vld [vmem:[%s7369_s4 + $0x38] sm:$0x1f]  ;;  %v5696_v21 = vld [vmem:[%s7369_s4 + $0x30] sm:$0x1f] }
 0xaba   :  { %v1925_v54 = vadd.f32 %v1924_v30, %v1923_v53  ;;  %v2000_v53 = vld [vmem:[%s7369_s4] sm:$0x1f]  ;;  %v5654_v2 = vld [vmem:[%s7369_s4 + $0x18] sm:$0x1f] }
 0xabb   :  { %v1919_v9 = vadd.f32 %v4096_v19, %v1913_v36  ;;  %v2002_v36 = vld [vmem:[%s7369_s4 + $0x10] sm:$0x1f] }
 0xabc   :  { %v1926_v15 = vrot.slane %v1925_v54, 2 }
 0xabd   :  { %v1930_v43 = vsel %vm90_vm1, %v1919_v9, 0.0  ;;  %v5667_v9 = vld [vmem:[%s7369_s4 + $0x28] sm:$0x1f] }
 0xabe   :  { %v1927_v40 = vadd.f32 %v1926_v15, %v1925_v54  ;;  %v5659_v54 = vld [vmem:[%s7369_s4 + $0x58] sm:$0x1f]  ;;  %v5674_v15 = vld [vmem:[%s7369_s4 + $0x88] sm:$0x1f] }
 0xac0   :  { %v1908_v25 = vpop.f32.mrf.mxu3  ;;  %v1928_v35 = vrot.slane %v1927_v40, 1 }
 0xac1   :  { %v1914_v48 = vadd.f32 %v1908_v25, %v5502_v63  ;;  %v3998_v25 = vld [vmem:[%s7369_s4 + $0x50] sm:$0x1f] }
 0xac2   :  { %v1929_v14 = vadd.f32 %v1928_v35, %v1927_v40 }
 0xac3   :  { %v1920_v42 = vadd.f32 %v4096_v19, %v1914_v48 }
 0xac4   :  { %v1946_v17 = vmul.f32 %v1945_v20, %v1929_v14 }
 0xac5   :  { %v1931_v27 = vsel %vm90_vm1, %v1920_v42, 0.0 }
 0xac6   :  { %v1932_v37 = vadd.f32 %v1931_v27, %v1930_v43  ;;  %v5679_v43 = vld [vmem:[%s7369_s4 + $0x60] sm:$0x1f]  ;;  %v5684_v27 = vld [vmem:[%s7369_s4 + $0x68] sm:$0x1f] }
 0xac8   :  { %v1933_v23 = vrot.slane %v1932_v37, 4 }
 0xaca   :  { %v1934_v49 = vadd.f32 %v1933_v23, %v1932_v37 }
 0xacc   :  { %v1935_v22 = vrot.slane %v1934_v49, 2 }
 0xace   :  { %v1936_v34 = vadd.f32 %v1935_v22, %v1934_v49 }
 0xad0   :  { %v1937_v63 = vrot.slane %v1936_v34, 1 }
 0xad2   :  { %v1938_v1 = vadd.f32 %v1937_v63, %v1936_v34 }
 0xad4   :  { %v1947_v44 = vmul.f32 %v1945_v20, %v1938_v1  ;;  %v5704_v20 = vld [vmem:[%s7369_s4 + $0x78] sm:$0x1f] }
 0xad6   :  { %v1953_v4 = vsel %vm7371_vm13, %v1947_v44, %v1946_v17 }
 0xad7   :  { %v1956_v5 = vsel %vm1955_vm14, %v1953_v4, 0.0 }
 0xad8   :  { %1957 = vadd.xlane.f32.xlu2 %v1956_v5 }
 0xb4b   :  { %v1958_v7 = vpop.xlane.xlu2 %1957 }
 0xb4c   :  { %v1959_v38 = vmul.f32 %v1958_v7, %v4542_v24 }
 0xb4e   :  { %v1961_v52 = vrot.slane %v1959_v38, 1  ;;  %v1964_v57 = vsub.f32 %v1946_v17, %v1959_v38 }
 0xb50   :  { %v1965_v45 = vsub.f32 %v1947_v44, %v1961_v52  ;;  %v1966_v41 = vmul.f32 %v1964_v57, %v1964_v57  ;;  %v5711_v52 = vld [vmem:[%s7369_s4 + $0x80] sm:$0x1f] }
 0xb52   :  { %v1967_v0 = vmul.f32 %v1965_v45, %v1965_v45 }
 0xb54   :  { %v1970_v46 = vrot.slane %v1967_v0, 7  ;;  %v5717_v0 = vld [vmem:[%s7369_s4 + $0x48] sm:$0x1f] }
 0xb56   :  { %v1971_v18 = vsel %vm7371_vm13, %v1970_v46, %v1966_v41 }
 0xb57   :  { %v1973_v51 = vsel %vm1955_vm14, %v1971_v18, 0.0 }
 0xb58   :  { %1974 = vadd.xlane.f32.xlu0 %v1973_v51 }
 0xbcb   :  { %v1975_v6 = vpop.xlane.xlu0 %1974 }
 0xbcc   :  { %v1976_v60 = vmul.f32 %v1975_v6, %v4542_v24  ;;  %v4098_v24 = vld [vmem:[%s7368_s3 + $0x2] ss:$0 sm:$0xff] }
 0xbcd   :  { %v5724_v6 = vld [vmem:[%s7369_s4 + $0x40] sm:$0x1f] }
 0xbce   :  { %v1977_v33 = vadd.f32 1e-05, %v1976_v60  ;;  %v5729_v60 = vld [vmem:[%s7369_s4 + $0x98] sm:$0x1f] }
 0xbd0   :  { %4231 = vrsqrt.f32 %v1977_v33  ;;  %vm1984_vm15 = vweird.f32 %v1977_v33 }
 0xbd6   :  { %v4232_v62 = vpop.eup %4231 }
 0xbd7   :  { %v1979_v3 = vmul.f32 %v4232_v62, %v1977_v33  ;;  %vm1985_vm1 = vweird.f32 %v4232_v62 }
 0xbd8   :  { %vm1986_vm0 = vmor %vm1984_vm15, %vm1985_vm1 }
 0xbd9   :  { %v1980_v8 = vmul.f32 %v4232_v62, %v1979_v3 }
 0xbdb   :  { %v1981_v16 = vmul.f32 0.5, %v1980_v8 }
 0xbdd   :  { %v1982_v13 = vsub.f32 1.5, %v1981_v16 }
 0xbdf   :  { %v1983_v58 = vmul.f32 %v4232_v62, %v1982_v13 }
 0xbe1   :  { %v1987_v56 = vsel %vm1986_vm0, %v4232_v62, %v1983_v58 }
 0xbe2   :  { %v1989_v32 = vrot.slane %v1987_v56, 1  ;;  %v1992_v50 = vmul.f32 %v1987_v56, %v1964_v57 }
 0xbe4   :  { %v1993_v19 = vmul.f32 %v1989_v32, %v1965_v45  ;;  %v1995_v29 = vmul.f32 %v4097_v12, %v1992_v50 }
 0xbe6   :  { %v1996_v11 = vmul.f32 %v4097_v12, %v1993_v19  ;;  %v1998_v59 = vadd.f32 %v4098_v24, %v1995_v29 }
 0xbe8   :  { %v1999_v31 = vadd.f32 %v4098_v24, %v1996_v11  ;;  %v2021_v30 = vperm.slane %v1998_v59, 0  ;;  %v5740_v24 = vld [vmem:[%s7369_s4 + $0x90] sm:$0x1f] }
 0xbea   :  { %v2027_v48 = vmul.f32 %v2021_v30, %v5628_v39  ;;  %v2024_v10 = vmul.f32 %v2021_v30, %v5638_v26  ;;  %v2023_v42 = vmul.f32 %v2021_v30, %v2000_v53  ;;  %v5686_v61 = vperm.slane %v1999_v31, 0 }
 0xbeb   :  { %v2030_v37 = vmul.f32 %v2021_v30, %v5646_v55  ;;  %v2025_v40 = vmul.f32 %v2021_v30, %v2002_v36  ;;  %v2026_v23 = vmul.f32 %v2021_v30, %v5654_v2  ;;  %v2028_v35 = vmul.f32 %v2021_v30, %v5667_v9 }
 0xbec   :  { %v2047_v28 = vadd.f32 %v5633_v47, %v2027_v48  ;;  %v2044_v49 = vadd.f32 %v5659_v54, %v2024_v10  ;;  %v2043_v22 = vadd.f32 %v3998_v25, %v2023_v42  ;;  %v2029_v5 = vmul.f32 %v2021_v30, %v5696_v21 }
 0xbed   :  { %v2050_v34 = vadd.f32 %v5674_v15, %v2030_v37  ;;  %v2045_v14 = vadd.f32 %v5679_v43, %v2025_v40  ;;  %v2046_v63 = vadd.f32 %v5684_v27, %v2026_v23  ;;  %v2048_v38 = vadd.f32 %v5704_v20, %v2028_v35 }
 0xbee   :  { %v4012_v1 = vmul.f32 -1.442695, %v2047_v28  ;;  %v4009_v17 = vmul.f32 -1.442695, %v2044_v49  ;;  %v4008_v44 = vmul.f32 -1.442695, %v2043_v22  ;;  %v2033_v57 = vmul.f32 %v5686_v61, %v2000_v53 }
 0xbef   :  { %v4015_v4 = vmul.f32 -1.442695, %v2050_v34  ;;  %v4010_v7 = vmul.f32 -1.442695, %v2045_v14  ;;  %v4011_v45 = vmul.f32 -1.442695, %v2046_v63  ;;  %v2049_v41 = vadd.f32 %v5711_v52, %v2029_v5 }
 0xbf0   :  { %4233 = vpow2.f32 %v4012_v1  ;;  %v4013_v46 = vmul.f32 -1.442695, %v2048_v38  ;;  %v2053_v18 = vadd.f32 %v3998_v25, %v2033_v57  ;;  %v2032_v51 = vmul.f32 %v2021_v30, %v5717_v0 }
 0xbf1   :  { %4235 = vpow2.f32 %v4009_v17  ;;  %v4014_v8 = vmul.f32 -1.442695, %v2049_v41  ;;  %v2031_v16 = vmul.f32 %v2021_v30, %v5724_v6  ;;  %v2035_v19 = vmul.f32 %v5686_v61, %v2002_v36 }
 0xbf2   :  { %4237 = vpow2.f32 %v4008_v44  ;;  %v4018_v12 = vmul.f32 -1.442695, %v2053_v18  ;;  %v2052_v56 = vadd.f32 %v5729_v60, %v2032_v51  ;;  %v5773_v22 = vmul.f32 %v5686_v61, %v5654_v2 }
 0xbf3   :  { %4239 = vpow2.f32 %v4015_v4  ;;  %v5750_v53 = vadd.f32 %v5740_v24, %v2031_v16  ;;  %v5766_v23 = vadd.f32 %v5679_v43, %v2035_v19 }
 0xbf4   :  { %4241 = vpow2.f32 %v4010_v7  ;;  %v5755_v25 = vmul.f32 -1.442695, %v2052_v56 }
 0xbf5   :  { %4243 = vpow2.f32 %v4011_v45 }
 0xbf6   :  { %v4234_v33 = vpop.eup %4233  ;;  %4245 = vpow2.f32 %v4013_v46 }
 0xbf7   :  { %v4236_v62 = vpop.eup %4235  ;;  %v5731_v3 = vadd.f32 1.0, %v4234_v33 }
 0xbf8   :  { %v4238_v13 = vpop.eup %4237  ;;  %v5734_v58 = vadd.f32 1.0, %v4236_v62 }
 0xbf9   :  { %v4240_v32 = vpop.eup %4239  ;;  %4247 = vrcp.f32 %v5731_v3  ;;  %v5745_v11 = vadd.f32 1.0, %v4238_v13  ;;  %v2212_v31 = vand.u32 2147483647, %v5731_v3  ;;  %v2214_v48 = vand.u32 2147483648, %v5731_v3 }
 0xbfa   :  { %v4242_v50 = vpop.eup %4241  ;;  %4249 = vrcp.f32 %v5734_v58  ;;  %v5747_v59 = vadd.f32 1.0, %v4240_v32  ;;  %v2167_v36 = vand.u32 2147483647, %v5734_v58  ;;  %v2169_v10 = vand.u32 2147483648, %v5734_v58 }
 0xbfb   :  { %v4244_v29 = vpop.eup %4243  ;;  %4251 = vpow2.f32 %v4014_v8  ;;  %v5753_v30 = vadd.f32 1.0, %v4242_v50  ;;  %v2154_v37 = vand.u32 2147483648, %v5745_v11  ;;  %vm2208_vm2 = vweird.f32 %v5731_v3 }
 0xbfc   :  { %4253 = vpow2.f32 %v4018_v12  ;;  %v4246_v42 = vpop.eup %4245  ;;  %v5763_v40 = vadd.f32 1.0, %v4244_v29  ;;  %v2259_v49 = vand.u32 2147483648, %v5747_v59  ;;  %vm5776_vm6 = vcmp.eq.f32.partialorder %v2212_v31, 8.507059e+37 }
 0xbfd   :  { %4255 = vrcp.f32 %v5745_v11  ;;  %vm2163_vm3 = vweird.f32 %v5734_v58  ;;  %v2152_v43 = vand.u32 2147483647, %v5745_v11  ;;  %v2215_v1 = vor.u32 1.1754944e-38, %v2214_v48 }
 0xbfe   :  { %4257 = vrcp.f32 %v5747_v59  ;;  %vm5783_vm5 = vcmp.eq.f32.partialorder %v2167_v36, 8.507059e+37  ;;  %v2170_v2 = vor.u32 1.1754944e-38, %v2169_v10  ;;  %vm2148_vm7 = vweird.f32 %v5745_v11 }
 0xbff   :  { %v4248_v28 = vpop.eup %4247  ;;  %4259 = vrcp.f32 %v5753_v30  ;;  %v2155_v7 = vor.u32 1.1754944e-38, %v2154_v37  ;;  %v2257_v38 = vand.u32 2147483647, %v5747_v59  ;;  %v2260_v41 = vor.u32 1.1754944e-38, %v2259_v49 }
 0xc00   :  { %v4250_v35 = vpop.eup %4249  ;;  %v2204_v34 = vmul.f32 %v4248_v28, %v5731_v3  ;;  %4261 = vrcp.f32 %v5763_v40  ;;  %vm2209_vm8 = vweird.f32 %v4248_v28  ;;  %vm5792_vm11 = vcmp.eq.f32.partialorder %v2152_v43, 8.507059e+37 }
 0xc01   :  { %v4252_v63 = vpop.eup %4251  ;;  %v2159_v17 = vmul.f32 %v4250_v35, %v5734_v58  ;;  %vm2164_vm9 = vweird.f32 %v4250_v35  ;;  %v2182_v62 = vand.u32 2147483647, %v5753_v30  ;;  %v2184_v8 = vand.u32 2147483648, %v5753_v30  ;;  %vm2210_vm15 = vmor %vm2208_vm2, %vm2209_vm8 }
 0xc02   :  { %v4254_v4 = vpop.eup %4253  ;;  %v2205_v5 = vsub.f32 1.0, %v2204_v34  ;;  %v2197_v56 = vand.u32 2147483647, %v5763_v40  ;;  %v2199_v32 = vand.u32 2147483648, %v5763_v40  ;;  %vm5802_vm1 = vcmp.eq.f32.partialorder %v2257_v38, 8.507059e+37  ;;  %vm2165_vm10 = vmor %vm2163_vm3, %vm2164_vm9 }
 0xc03   :  { %v4256_v57 = vpop.eup %4255  ;;  %v2160_v45 = vsub.f32 1.0, %v2159_v17  ;;  %vm2193_vm12 = vweird.f32 %v5763_v40  ;;  %v5814_v43 = vadd.f32 1.0, %v4246_v42  ;;  %vm2183_vm9 = vcmp.eq.f32.partialorder %v2182_v62, 8.507059e+37 }
 0xc04   :  { %v4258_v46 = vpop.eup %4257  ;;  %v2206_v18 = vmul.f32 %v4248_v28, %v2205_v5  ;;  %v2144_v51 = vmul.f32 %v4256_v57, %v5745_v11  ;;  %vm2149_vm14 = vweird.f32 %v4256_v57  ;;  %v4016_v62 = vmul.f32 -1.442695, %v5750_v53 }
 0xc05   :  { %v4260_v16 = vpop.eup %4259  ;;  %v2161_v13 = vmul.f32 %v4250_v35, %v2160_v45  ;;  %v2249_v12 = vmul.f32 %v4258_v46, %v5747_v59  ;;  %vm2254_vm0 = vweird.f32 %v4258_v46  ;;  %vm2150_vm2 = vmor %vm2148_vm7, %vm2149_vm14  ;;  %4263 = vrcp.f32 %v5814_v43 }
 0xc06   :  { %v2207_v50 = vadd.f32 %v4248_v28, %v2206_v18  ;;  %v2145_v19 = vsub.f32 1.0, %v2144_v51  ;;  %v2174_v31 = vmul.f32 %v4260_v16, %v5753_v30  ;;  %vm2179_vm13 = vweird.f32 %v4260_v16  ;;  %v4262_v10 = vpop.eup %4261 }
 0xc07   :  { %v2162_v48 = vadd.f32 %v4250_v35, %v2161_v13  ;;  %v2250_v36 = vsub.f32 1.0, %v2249_v12  ;;  %v2189_v38 = vmul.f32 %v4262_v10, %v5763_v40  ;;  %vm2194_vm8 = vweird.f32 %v4262_v10 }
 0xc08   :  { %v2211_v37 = vsel %vm2210_vm15, %v4248_v28, %v2207_v50  ;;  %v2146_v49 = vmul.f32 %v4256_v57, %v2145_v19  ;;  %v2175_v34 = vsub.f32 1.0, %v2174_v31  ;;  %v2185_v12 = vor.u32 1.1754944e-38, %v2184_v8 }
 0xc09   :  { %v5818_v3 = vsel %vm5776_vm6, %v2215_v1, %v2211_v37  ;;  %v2166_v17 = vsel %vm2165_vm10, %v4250_v35, %v2162_v48  ;;  %v2251_v5 = vmul.f32 %v4258_v46, %v2250_v36  ;;  %v2190_v14 = vsub.f32 1.0, %v2189_v38 }
 0xc0a   :  { %v2456_v45 = vsel %vm2443_vm4, %v5818_v3, 0.0  ;;  %v5825_v28 = vsel %vm5783_vm5, %v2170_v2, %v2166_v17  ;;  %v2147_v58 = vadd.f32 %v4256_v57, %v2146_v49  ;;  %v2176_v18 = vmul.f32 %v4260_v16, %v2175_v34 }
 0xc0b   :  { %2457 = vadd.xlane.f32.xlu0 %v2456_v45  ;;  %v2447_v42 = vsel %vm2443_vm4, %v5825_v28, 0.0  ;;  %v2252_v35 = vadd.f32 %v4258_v46, %v2251_v5  ;;  %v5832_v1 = vadd.f32 1.0, %v4252_v63  ;;  %vm7425_vm6 = vweird.f32 %v5747_v59  ;;  %v4264_v29 = vpop.eup %4263 }
 0xc0c   :  { %2448 = vadd.xlane.f32.xlu2 %v2447_v42  ;;  %v2151_v51 = vsel %vm2150_vm2, %v4256_v57, %v2147_v58  ;;  %vm2255_vm3 = vmor %vm7425_vm6, %vm2254_vm0  ;;  %v2177_v44 = vadd.f32 %v4260_v16, %v2176_v18  ;;  %v5838_v2 = vadd.f32 1.0, %v4254_v4  ;;  %vm7426_vm5 = vweird.f32 %v5753_v30 }
 0xc0d   :  { %v5842_v13 = vsel %vm5792_vm11, %v2155_v7, %v2151_v51  ;;  %v2256_v11 = vsel %vm2255_vm3, %v4258_v46, %v2252_v35  ;;  %vm2180_vm7 = vmor %vm7426_vm5, %vm2179_vm13  ;;  %v2191_v63 = vmul.f32 %v4262_v10, %v2190_v14  ;;  %v2227_v46 = vand.u32 2147483647, %v5814_v43 }
 0xc0e   :  { %v2444_v59 = vsel %vm2443_vm4, %v5842_v13, 0.0  ;;  %v2181_v57 = vsel %vm2180_vm7, %v4260_v16, %v2177_v44  ;;  %v5851_v4 = vsel %vm5802_vm1, %v2260_v41, %v2256_v11  ;;  %v2229_v33 = vand.u32 2147483648, %v5814_v43  ;;  %vm5859_vm13 = vmor %vm2193_vm12, %vm2194_vm8 }
 0xc0f   :  { %2445 = vadd.xlane.f32.xlu1 %v2444_v59  ;;  %v2192_v7 = vadd.f32 %v4262_v10, %v2191_v63  ;;  %v5855_v30 = vsel %vm2183_vm9, %v2185_v12, %v2181_v57  ;;  %4265 = vrcp.f32 %v5832_v1  ;;  %v2056_v41 = vadd.f32 %v5684_v27, %v5773_v22 }
 0xc10   :  { %v2200_v16 = vor.u32 1.1754944e-38, %v2199_v32  ;;  %4267 = vrcp.f32 %v5838_v2  ;;  %v2034_v19 = vmul.f32 %v5686_v61, %v5638_v26  ;;  %v2465_v31 = vsel %vm2443_vm4, %v5851_v4, 0.0 }
 0xc11   :  { %v2196_v8 = vsel %vm5859_vm13, %v4262_v10, %v2192_v7  ;;  %vm2198_vm10 = vcmp.eq.f32.partialorder %v2197_v56, 8.507059e+37  ;;  %vm2223_vm11 = vweird.f32 %v5814_v43  ;;  %v4020_v27 = vmul.f32 -1.442695, %v5766_v23 }
 0xc12   :  { %v2450_v53 = vsel %vm2443_vm4, %v5855_v30, 0.0  ;;  %v5880_v22 = vsel %vm2198_vm10, %v2200_v16, %v2196_v8  ;;  %v2219_v32 = vmul.f32 %v4264_v29, %v5814_v43  ;;  %vm5883_vm12 = vcmp.eq.f32.partialorder %v2227_v46, 8.507059e+37 }
 0xc13   :  { %2466 = vadd.xlane.f32.xlu0 %v2465_v31  ;;  %v2230_v48 = vor.u32 1.1754944e-38, %v2229_v33  ;;  %v2242_v40 = vand.u32 2147483647, %v5832_v1  ;;  %v2244_v56 = vand.u32 2147483648, %v5832_v1  ;;  %v2302_v23 = vand.u32 2147483647, %v5838_v2 }
 0xc14   :  { %2451 = vadd.xlane.f32.xlu2 %v2450_v53  ;;  %4269 = vpow2.f32 %v5755_v25  ;;  %v2220_v36 = vsub.f32 1.0, %v2219_v32  ;;  %v4021_v10 = vmul.f32 -1.442695, %v2056_v41  ;;  %v2054_v37 = vadd.f32 %v5659_v54, %v2034_v19 }
 0xc15   :  { %4271 = vpow2.f32 %v4016_v62  ;;  %v4266_v49 = vpop.eup %4265  ;;  %v2453_v34 = vsel %vm2443_vm4, %v5880_v22, 0.0  ;;  %v2304_v17 = vand.u32 2147483648, %v5838_v2  ;;  %v2038_v5 = vmul.f32 %v5686_v61, %v5667_v9 }
 0xc16   :  { %v2037_v38 = vmul.f32 %v5686_v61, %v5628_v39  ;;  %v4268_v45 = vpop.eup %4267  ;;  %v2221_v25 = vmul.f32 %v4264_v29, %v2220_v36  ;;  %vm2224_vm14 = vweird.f32 %v4264_v29  ;;  %v2234_v58 = vmul.f32 %v4266_v49, %v5832_v1 }
 0xc17   :  { %2454 = vadd.xlane.f32.xlu1 %v2453_v34  ;;  %4273 = vpow2.f32 %v4020_v27  ;;  %v2294_v54 = vmul.f32 %v4268_v45, %v5838_v2  ;;  %v4019_v18 = vmul.f32 -1.442695, %v2054_v37  ;;  %v2058_v42 = vadd.f32 %v5704_v20, %v2038_v5  ;;  %vm2225_vm1 = vmor %vm2223_vm11, %vm2224_vm14 }
 0xc18   :  { %v2039_v35 = vmul.f32 %v5686_v61, %v5696_v21  ;;  %v2222_v14 = vadd.f32 %v4264_v29, %v2221_v25  ;;  %v2235_v9 = vsub.f32 1.0, %v2234_v58  ;;  %4275 = vpow2.f32 %v4021_v10 }
 0xc19   :  { %v5905_v39 = vadd.f32 %v5633_v47, %v2037_v38  ;;  %vm2239_vm15 = vweird.f32 %v4266_v49  ;;  %v2295_v44 = vsub.f32 1.0, %v2294_v54  ;;  %vm2299_vm0 = vweird.f32 %v4268_v45 }
 0xc1a   :  { %v4270_v51 = vpop.eup %4269  ;;  %v4023_v11 = vmul.f32 -1.442695, %v2058_v42  ;;  %v2226_v59 = vsel %vm2225_vm1, %v4264_v29, %v2222_v14  ;;  %v2236_v20 = vmul.f32 %v4266_v49, %v2235_v9  ;;  %4277 = vpow2.f32 %v4019_v18 }
 0xc1b   :  { %v4272_v63 = vpop.eup %4271  ;;  %v5909_v57 = vadd.f32 1.0, %v4270_v51  ;;  %v5913_v21 = vsel %vm5883_vm12, %v2230_v48, %v2226_v59  ;;  %v2296_v47 = vmul.f32 %v4268_v45, %v2295_v44  ;;  %vm2238_vm2 = vweird.f32 %v5832_v1 }
 0xc1c   :  { %v5915_v12 = vadd.f32 1.0, %v4272_v63  ;;  %4279 = vpow2.f32 %v4023_v11  ;;  %v2459_v7 = vsel %vm2443_vm4, %v5913_v21, 0.0  ;;  %v2237_v46 = vadd.f32 %v4266_v49, %v2236_v20  ;;  %vm2240_vm6 = vmor %vm2238_vm2, %vm2239_vm15 }
 0xc1d   :  { %v4274_v43 = vpop.eup %4273  ;;  %4281 = vrcp.f32 %v5909_v57  ;;  %2460 = vadd.xlane.f32.xlu2 %v2459_v7  ;;  %v2245_v33 = vor.u32 1.1754944e-38, %v2244_v56  ;;  %v2297_v50 = vadd.f32 %v4268_v45, %v2296_v47  ;;  %vm2298_vm3 = vweird.f32 %v5838_v2 }
 0xc1e   :  { %4283 = vrcp.f32 %v5915_v12  ;;  %v4276_v62 = vpop.eup %4275  ;;  %v2241_v41 = vsel %vm2240_vm6, %v4266_v49, %v2237_v46  ;;  %vm2243_vm5 = vcmp.eq.f32.partialorder %v2242_v40, 8.507059e+37  ;;  %vm2300_vm7 = vmor %vm2298_vm3, %vm2299_vm0  ;;  %v2305_v8 = vor.u32 1.1754944e-38, %v2304_v17 }
 0xc1f   :  { %v2059_v16 = vadd.f32 %v5711_v52, %v2039_v35  ;;  %v5926_v1 = vsel %vm2243_vm5, %v2245_v33, %v2241_v41  ;;  %v2301_v19 = vsel %vm2300_vm7, %v4268_v45, %v2297_v50  ;;  %vm2303_vm8 = vcmp.eq.f32.partialorder %v2302_v23, 8.507059e+37 }
 0xc20   :  { %v2287_v29 = vand.u32 2147483647, %v5909_v57  ;;  %v4278_v31 = vpop.eup %4277  ;;  %v2462_v2 = vsel %vm2443_vm4, %v5926_v1, 0.0  ;;  %v5931_v27 = vsel %vm2303_vm8, %v2305_v8, %v2301_v19  ;;  %v2289_v53 = vand.u32 2147483648, %v5909_v57 }
 0xc21   :  { %v2272_v32 = vand.u32 2147483647, %v5915_v12  ;;  %2463 = vadd.xlane.f32.xlu1 %v2462_v2  ;;  %v2474_v52 = vsel %vm2443_vm4, %v5931_v27, 0.0  ;;  %v2274_v48 = vand.u32 2147483648, %v5915_v12  ;;  %v5938_v40 = vadd.f32 1.0, %v4274_v43 }
 0xc22   :  { %v4280_v26 = vpop.eup %4279  ;;  %v5940_v56 = vadd.f32 1.0, %v4276_v62  ;;  %2475 = vadd.xlane.f32.xlu0 %v2474_v52  ;;  %vm2283_vm9 = vweird.f32 %v5909_v57  ;;  %v4024_v36 = vmul.f32 -1.442695, %v2059_v16  ;;  %v2040_v10 = vmul.f32 %v5686_v61, %v5646_v55 }
 0xc23   :  { %v4282_v23 = vpop.eup %4281  ;;  %vm2268_vm13 = vweird.f32 %v5915_v12  ;;  %4285 = vrcp.f32 %v5938_v40  ;;  %v5948_v34 = vadd.f32 1.0, %v4278_v31  ;;  %vm5950_vm10 = vcmp.eq.f32.partialorder %v2287_v29, 8.507059e+37 }
 0xc24   :  { %v4284_v37 = vpop.eup %4283  ;;  %v2279_v49 = vmul.f32 %v4282_v23, %v5909_v57  ;;  %v2290_v5 = vor.u32 1.1754944e-38, %v2289_v53  ;;  %vm5955_vm11 = vcmp.eq.f32.partialorder %v2272_v32, 8.507059e+37  ;;  %v2275_v25 = vor.u32 1.1754944e-38, %v2274_v48 }
 0xc25   :  { %v2264_v38 = vmul.f32 %v4284_v37, %v5915_v12  ;;  %4287 = vrcp.f32 %v5940_v56  ;;  %v5960_v58 = vadd.f32 1.0, %v4280_v26  ;;  %vm2284_vm12 = vweird.f32 %v4282_v23 }
 0xc26   :  { %v2280_v55 = vsub.f32 1.0, %v2279_v49  ;;  %v2332_v18 = vand.u32 2147483647, %v5938_v40  ;;  %4289 = vpow2.f32 %v4024_v36  ;;  %v2334_v35 = vand.u32 2147483648, %v5938_v40  ;;  %vm2285_vm15 = vmor %vm2283_vm9, %vm2284_vm12 }
 0xc27   :  { %v2265_v54 = vsub.f32 1.0, %v2264_v38  ;;  %v2349_v14 = vand.u32 2147483648, %v5940_v56  ;;  %4291 = vrcp.f32 %v5948_v34  ;;  %vm2269_vm14 = vweird.f32 %v4284_v37 }
 0xc28   :  { %v2281_v42 = vmul.f32 %v4282_v23, %v2280_v55  ;;  %v2347_v51 = vand.u32 2147483647, %v5940_v56  ;;  %v4022_v44 = vmul.f32 -1.442695, %v5905_v39  ;;  %vm2328_vm1 = vweird.f32 %v5938_v40  ;;  %vm2270_vm6 = vmor %vm2268_vm13, %vm2269_vm14 }
 0xc29   :  { %v2266_v9 = vmul.f32 %v4284_v37, %v2265_v54  ;;  %v4286_v11 = vpop.eup %4285  ;;  %4293 = vrcp.f32 %v5960_v58  ;;  %v2060_v59 = vadd.f32 %v5674_v15, %v2040_v10  ;;  %vm5975_vm0 = vcmp.eq.f32.partialorder %v2332_v18, 8.507059e+37 }
 0xc2a   :  { %v2282_v63 = vadd.f32 %v4282_v23, %v2281_v42  ;;  %v2324_v47 = vmul.f32 %v4286_v11, %v5938_v40  ;;  %vm2343_vm2 = vweird.f32 %v5940_v56  ;;  %v2335_v15 = vor.u32 1.1754944e-38, %v2334_v35 }
 0xc2b   :  { %v2267_v20 = vadd.f32 %v4284_v37, %v2266_v9  ;;  %v4288_v39 = vpop.eup %4287  ;;  %v2350_v46 = vor.u32 1.1754944e-38, %v2349_v14  ;;  %v2317_v57 = vand.u32 2147483647, %v5948_v34  ;;  %vm5989_vm3 = vcmp.eq.f32.partialorder %v2347_v51, 8.507059e+37 }
 0xc2c   :  { %v2286_v7 = vsel %vm2285_vm15, %v4282_v23, %v2282_v63  ;;  %v4290_v33 = vpop.eup %4289  ;;  %v2325_v41 = vsub.f32 1.0, %v2324_v47  ;;  %v2339_v8 = vmul.f32 %v4288_v39, %v5940_v56  ;;  %vm2313_vm5 = vweird.f32 %v5948_v34 }
 0xc2d   :  { %v5986_v50 = vsel %vm5950_vm10, %v2290_v5, %v2286_v7  ;;  %v2271_v62 = vsel %vm2270_vm6, %v4284_v37, %v2267_v20  ;;  %v4292_v12 = vpop.eup %4291  ;;  %vm2329_vm7 = vweird.f32 %v4286_v11  ;;  %v2319_v31 = vand.u32 2147483648, %v5948_v34 }
 0xc2e   :  { %v2471_v19 = vsel %vm2443_vm4, %v5986_v50, 0.0  ;;  %v5998_v29 = vsel %vm5955_vm11, %v2275_v25, %v2271_v62  ;;  %v2326_v53 = vmul.f32 %v4286_v11, %v2325_v41  ;;  %v2340_v32 = vsub.f32 1.0, %v2339_v8  ;;  %vm2330_vm13 = vmor %vm2328_vm1, %vm2329_vm7 }
 0xc2f   :  { %2472 = vadd.xlane.f32.xlu2 %v2471_v19  ;;  %v2468_v2 = vsel %vm2443_vm4, %v5998_v29, 0.0  ;;  %v2309_v26 = vmul.f32 %v4292_v12, %v5948_v34  ;;  %vm2373_vm8 = vweird.f32 %v5960_v58  ;;  %v4294_v52 = vpop.eup %4293  ;;  %vm2344_vm9 = vweird.f32 %v4288_v39 }
 0xc30   :  { %2469 = vadd.xlane.f32.xlu1 %v2468_v2  ;;  %v6005_v48 = vadd.f32 1.0, %v4290_v33  ;;  %4295 = vpow2.f32 %v4022_v44  ;;  %v4025_v23 = vmul.f32 -1.442695, %v2060_v59  ;;  %v2327_v36 = vadd.f32 %v4286_v11, %v2326_v53  ;;  %vm2345_vm12 = vmor %vm2343_vm2, %vm2344_vm9 }
 0xc31   :  { %v2341_v10 = vmul.f32 %v4288_v39, %v2340_v32  ;;  %v2310_v37 = vsub.f32 1.0, %v2309_v26  ;;  %v2369_v49 = vmul.f32 %v4294_v52, %v5960_v58  ;;  %vm2314_vm10 = vweird.f32 %v4292_v12 }
 0xc32   :  { %vm6011_vm11 = vcmp.eq.f32.partialorder %v2317_v57, 8.507059e+37  ;;  %v2377_v5 = vand.u32 2147483647, %v5960_v58  ;;  %4297 = vrcp.f32 %v6005_v48  ;;  %v2331_v38 = vsel %vm2330_vm13, %v4286_v11, %v2327_v36  ;;  %vm2315_vm1 = vmor %vm2313_vm5, %vm2314_vm10 }
 0xc33   :  { %v2342_v45 = vadd.f32 %v4288_v39, %v2341_v10  ;;  %v2311_v55 = vmul.f32 %v4292_v12, %v2310_v37  ;;  %v2370_v25 = vsub.f32 1.0, %v2369_v49  ;;  %v6019_v54 = vsel %vm5975_vm0, %v2335_v15, %v2331_v38 }
 0xc34   :  { %vm2374_vm14 = vweird.f32 %v4294_v52  ;;  %v2379_v40 = vand.u32 2147483648, %v5960_v58  ;;  %4299 = vpow2.f32 %v4025_v23  ;;  %v2480_v18 = vsel %vm2443_vm4, %v6019_v54, 0.0 }
 0xc35   :  { %v2346_v42 = vsel %vm2345_vm12, %v4288_v39, %v2342_v45  ;;  %v2312_v35 = vadd.f32 %v4292_v12, %v2311_v55  ;;  %v2371_v14 = vmul.f32 %v4294_v52, %v2370_v25  ;;  %2481 = vadd.xlane.f32.xlu0 %v2480_v18  ;;  %v2320_v56 = vor.u32 1.1754944e-38, %v2319_v31  ;;  %vm2375_vm15 = vmor %vm2373_vm8, %vm2374_vm14 }
 0xc36   :  { %v4296_v9 = vpop.eup %4295  ;;  %v6029_v51 = vsel %vm5989_vm3, %v2350_v46, %v2346_v42  ;;  %v2042_v44 = vmul.f32 %v5686_v61, %v5717_v0  ;;  %v2041_v11 = vmul.f32 %v5686_v61, %v5724_v6  ;;  %v2380_v0 = vor.u32 1.1754944e-38, %v2379_v40 }
 0xc37   :  { %v2483_v63 = vsel %vm2443_vm4, %v6029_v51, 0.0  ;;  %v2316_v59 = vsel %vm2315_vm1, %v4292_v12, %v2312_v35  ;;  %v2372_v20 = vadd.f32 %v4294_v52, %v2371_v14  ;;  %v6040_v47 = vadd.f32 1.0, %v4296_v9 }
 0xc38   :  { %v4298_v43 = vpop.eup %4297  ;;  %2484 = vadd.xlane.f32.xlu2 %v2483_v63  ;;  %v6044_v34 = vsel %vm6011_vm11, %v2320_v56, %v2316_v59  ;;  %v2062_v61 = vadd.f32 %v5729_v60, %v2042_v44  ;;  %v2061_v6 = vadd.f32 %v5740_v24, %v2041_v11  ;;  %vm2378_vm0 = vcmp.eq.f32.partialorder %v2377_v5, 8.507059e+37 }
 0xc39   :  { %v2477_v39 = vsel %vm2443_vm4, %v6044_v34, 0.0  ;;  %v2376_v7 = vsel %vm2375_vm15, %v4294_v52, %v2372_v20  ;;  %v2384_v15 = vmul.f32 %v4298_v43, %v6005_v48  ;;  %4301 = vrcp.f32 %v6040_v47 }
 0xc3a   :  { %v4300_v46 = vpop.eup %4299  ;;  %2478 = vadd.xlane.f32.xlu1 %v2477_v39  ;;  %v6054_v57 = vsel %vm2378_vm0, %v2380_v0, %v2376_v7  ;;  %v2392_v33 = vand.u32 2147483647, %v6005_v48  ;;  %v2394_v60 = vand.u32 2147483648, %v6005_v48  ;;  %v4027_v24 = vmul.f32 -1.442695, %v2062_v61 }
 0xc3b   :  { %v2385_v58 = vsub.f32 1.0, %v2384_v15  ;;  %v2140_v62 = vadd.f32 1.0, %v4300_v46  ;;  %v4026_v41 = vmul.f32 -1.442695, %v2061_v6  ;;  %v2489_v8 = vsel %vm2443_vm4, %v6054_v57, 0.0 }
 0xc3c   :  { %vm2389_vm2 = vweird.f32 %v4298_v43  ;;  %vm2388_vm6 = vweird.f32 %v6005_v48  ;;  %v2395_v31 = vor.u32 1.1754944e-38, %v2394_v60  ;;  %vm2393_vm5 = vcmp.eq.f32.partialorder %v2392_v33, 8.507059e+37 }
 0xc3d   :  { %v2386_v16 = vmul.f32 %v4298_v43, %v2385_v58  ;;  %4303 = vrcp.f32 %v2140_v62  ;;  %2490 = vadd.xlane.f32.xlu0 %v2489_v8  ;;  %vm2390_vm3 = vmor %vm2388_vm6, %vm2389_vm2  ;;  %v2364_v36 = vand.u32 2147483648, %v6040_v47  ;;  %v2362_v17 = vand.u32 2147483647, %v6040_v47 }
 0xc3e   :  { %4305 = vpow2.f32 %v4027_v24  ;;  %vm2358_vm8 = vweird.f32 %v6040_v47  ;;  %v2409_v40 = vand.u32 2147483648, %v2140_v62  ;;  %v2407_v42 = vand.u32 2147483647, %v2140_v62 }
 0xc3f   :  { %v2387_v12 = vadd.f32 %v4298_v43, %v2386_v16  ;;  %4307 = vpow2.f32 %v4026_v41  ;;  %v4302_v19 = vpop.eup %4301  ;;  %v2365_v25 = vor.u32 1.1754944e-38, %v2364_v36  ;;  %vm2363_vm10 = vcmp.eq.f32.partialorder %v2362_v17, 8.507059e+37 }
 0xc40   :  { %v2354_v53 = vmul.f32 %v4302_v19, %v6040_v47  ;;  %vm2359_vm7 = vweird.f32 %v4302_v19  ;;  %vm2403_vm11 = vweird.f32 %v2140_v62  ;;  %v2410_v44 = vor.u32 1.1754944e-38, %v2409_v40 }
 0xc41   :  { %v2391_v2 = vsel %vm2390_vm3, %v4298_v43, %v2387_v12  ;;  %vm2360_vm9 = vmor %vm2358_vm8, %vm2359_vm7  ;;  %vm2408_vm14 = vcmp.eq.f32.partialorder %v2407_v42, 8.507059e+37  ;;  %vm2504_vm8 = vcmask 1044480  }
 0xc42   :  { %v6063_v32 = vsel %vm2393_vm5, %v2395_v31, %v2391_v2  ;;  %v2355_v23 = vsub.f32 1.0, %v2354_v53 }
 0xc43   :  { %v4304_v26 = vpop.eup %4303  ;;  %v2492_v52 = vsel %vm2443_vm4, %v6063_v32, 0.0 }
 0xc44   :  { %v4306_v10 = vpop.eup %4305  ;;  %2493 = vadd.xlane.f32.xlu2 %v2492_v52  ;;  %v2399_v48 = vmul.f32 %v4304_v26, %v2140_v62  ;;  %v2356_v49 = vmul.f32 %v4302_v19, %v2355_v23  ;;  %vm2404_vm13 = vweird.f32 %v4304_v26 }
 0xc45   :  { %v4308_v37 = vpop.eup %4307  ;;  %v2142_v5 = vadd.f32 1.0, %v4306_v10  ;;  %vm2405_vm12 = vmor %vm2403_vm11, %vm2404_vm13 }
 0xc46   :  { %v2400_v38 = vsub.f32 1.0, %v2399_v48  ;;  %v2141_v45 = vadd.f32 1.0, %v4308_v37  ;;  %v2357_v55 = vadd.f32 %v4302_v19, %v2356_v49 }
 0xc47   :  { %4309 = vrcp.f32 %v2142_v5  ;;  %v2439_v6 = vand.u32 2147483648, %v2142_v5  ;;  %v2437_v15 = vand.u32 2147483647, %v2142_v5  ;;  %vm2433_vm0 = vweird.f32 %v2142_v5 }
 0xc48   :  { %v2401_v18 = vmul.f32 %v4304_v26, %v2400_v38  ;;  %4311 = vrcp.f32 %v2141_v45  ;;  %v2361_v35 = vsel %vm2360_vm9, %v4302_v19, %v2357_v55  ;;  %v2424_v46 = vand.u32 2147483648, %v2141_v45 }
 0xc49   :  { %v6070_v14 = vsel %vm2363_vm10, %v2365_v25, %v2361_v35  ;;  %v2422_v33 = vand.u32 2147483647, %v2141_v45  ;;  %v2440_v60 = vor.u32 1.1754944e-38, %v2439_v6  ;;  %vm2418_vm6 = vweird.f32 %v2141_v45 }
 0xc4a   :  { %v2402_v9 = vadd.f32 %v4304_v26, %v2401_v18  ;;  %v2486_v56 = vsel %vm2443_vm4, %v6070_v14, 0.0  ;;  %vm2438_vm3 = vcmp.eq.f32.partialorder %v2437_v15, 8.507059e+37  ;;  %v2425_v8 = vor.u32 1.1754944e-38, %v2424_v46 }
 0xc4b   :  { %2487 = vadd.xlane.f32.xlu1 %v2486_v56  ;;  %vm2423_vm7 = vcmp.eq.f32.partialorder %v2422_v33, 8.507059e+37 }
 0xc4c   :  { %v2406_v11 = vsel %vm2405_vm12, %v4304_v26, %v2402_v9 }
 0xc4d   :  { %v4310_v63 = vpop.eup %4309  ;;  %v6074_v59 = vsel %vm2408_vm14, %v2410_v44, %v2406_v11 }
 0xc4e   :  { %v4312_v20 = vpop.eup %4311  ;;  %v2495_v47 = vsel %vm2443_vm4, %v6074_v59, 0.0  ;;  %v2429_v43 = vmul.f32 %v4310_v63, %v2142_v5  ;;  %vm2434_vm1 = vweird.f32 %v4310_v63  ;;  %v4475_v5 = vmov 160.0  }
 0xc4f   :  { %2496 = vadd.xlane.f32.xlu0 %v2495_v47  ;;  %v2414_v0 = vmul.f32 %v4312_v20, %v2141_v45  ;;  %vm2419_vm15 = vweird.f32 %v4312_v20  ;;  %vm2435_vm2 = vmor %vm2433_vm0, %vm2434_vm1  ;;  %4313 = vrcp.f32 %v4475_v5 }
 0xc50   :  { %v2430_v61 = vsub.f32 1.0, %v2429_v43  ;;  %vm2420_vm5 = vmor %vm2418_vm6, %vm2419_vm15 }
 0xc51   :  { %v2415_v39 = vsub.f32 1.0, %v2414_v0 }
 0xc52   :  { %v2431_v7 = vmul.f32 %v4310_v63, %v2430_v61 }
 0xc53   :  { %v2416_v58 = vmul.f32 %v4312_v20, %v2415_v39 }
 0xc54   :  { %v2432_v62 = vadd.f32 %v4310_v63, %v2431_v7 }
 0xc55   :  { %v2417_v24 = vadd.f32 %v4312_v20, %v2416_v58 }
 0xc56   :  { %v2436_v41 = vsel %vm2435_vm2, %v4310_v63, %v2432_v62  ;;  %v4314_v63 = vpop.eup %4313 }
 0xc57   :  { %v6078_v16 = vsel %vm2438_vm3, %v2440_v60, %v2436_v41  ;;  %v2421_v12 = vsel %vm2420_vm5, %v4312_v20, %v2417_v24  ;;  %v2646_v61 = vmul.f32 160.0, %v4314_v63  ;;  %vm2650_vm9 = vweird.f32 %v4314_v63 }
 0xc58   :  { %v2501_v19 = vsel %vm2443_vm4, %v6078_v16, 0.0  ;;  %v6082_v31 = vsel %vm2423_vm7, %v2425_v8, %v2421_v12 }
 0xc59   :  { %2502 = vadd.xlane.f32.xlu2 %v2501_v19  ;;  %v2498_v2 = vsel %vm2443_vm4, %v6082_v31, 0.0  ;;  %v2647_v62 = vsub.f32 1.0, %v2646_v61 }
 0xc5a   :  { %2499 = vadd.xlane.f32.xlu1 %v2498_v2 }
 0xc5b   :  { %v2648_v8 = vmul.f32 %v4314_v63, %v2647_v62 }
 0xc7e   :  { %v2458_v53 = vpop.xlane.xlu0 %2457 }
 0xc7f   :  { %v2533_v26 = vsel %vm2504_vm8, %v2458_v53, 0.0  ;;  %v2449_v52 = vpop.xlane.xlu2 %2448 }
 0xc80   :  { %v2534_v23 = vrot.slane %v2533_v26, 4  ;;  %v2512_v36 = vsel %vm2504_vm8, %v2449_v52, 0.0 }
 0xc81   :  { %v2513_v10 = vrot.slane %v2512_v36, 4 }
 0xc82   :  { %v2535_v48 = vadd.f32 %v2534_v23, %v2533_v26  ;;  %v2446_v37 = vpop.xlane.xlu1 %2445  ;;  %v2649_v23 = vadd.f32 %v4314_v63, %v2648_v8 }
 0xc83   :  { %v2514_v49 = vadd.f32 %v2513_v10, %v2512_v36  ;;  %v2505_v17 = vsel %vm2504_vm8, %v2446_v37, 0.0 }
 0xc84   :  { %v2536_v38 = vrot.slane %v2535_v48, 2  ;;  %v2506_v45 = vrot.slane %v2505_v17, 4 }
 0xc85   :  { %v2515_v55 = vrot.slane %v2514_v49, 2 }
 0xc86   :  { %v2507_v25 = vadd.f32 %v2506_v45, %v2505_v17  ;;  %v2467_v40 = vpop.xlane.xlu0 %2466  ;;  %v2537_v18 = vadd.f32 %v2536_v38, %v2535_v48  ;;  %v6093_v17 = vsel %vm2650_vm9, %v4314_v63, %v2649_v23 }
 0xc87   :  { %v2516_v42 = vadd.f32 %v2515_v55, %v2514_v49  ;;  %v2554_v35 = vsel %vm2504_vm8, %v2467_v40, 0.0  ;;  %v2452_v9 = vpop.xlane.xlu2 %2451 }
 0xc88   :  { %v2508_v56 = vrot.slane %v2507_v25, 2  ;;  %v2555_v44 = vrot.slane %v2554_v35, 4  ;;  %v2519_v11 = vsel %vm2504_vm8, %v2452_v9, 0.0  ;;  %v2538_v6 = vrot.slane %v2537_v18, 1 }
 0xc89   :  { %v2520_v20 = vrot.slane %v2519_v11, 4  ;;  %v2517_v39 = vrot.slane %v2516_v42, 1 }
 0xc8a   :  { %v2509_v47 = vadd.f32 %v2508_v56, %v2507_v25  ;;  %v2556_v43 = vadd.f32 %v2555_v44, %v2554_v35  ;;  %v2455_v0 = vpop.xlane.xlu1 %2454  ;;  %v2539_v12 = vadd.f32 %v2538_v6, %v2537_v18 }
 0xc8b   :  { %v2521_v7 = vadd.f32 %v2520_v20, %v2519_v11  ;;  %v2526_v15 = vsel %vm2504_vm8, %v2455_v0, 0.0  ;;  %v2518_v19 = vadd.f32 %v2517_v39, %v2516_v42 }
 0xc8c   :  { %v2510_v46 = vrot.slane %v2509_v47, 1  ;;  %v2557_v58 = vrot.slane %v2556_v43, 2  ;;  %v2527_v33 = vrot.slane %v2526_v15, 4  ;;  %v2656_v45 = vmul.f32 %v6093_v17, %v2539_v12 }
 0xc8d   :  { %v2522_v60 = vrot.slane %v2521_v7, 2  ;;  %v2653_v55 = vmul.f32 %v6093_v17, %v2518_v19 }
 0xc8e   :  { %v2558_v24 = vadd.f32 %v2557_v58, %v2556_v43  ;;  %v2528_v41 = vadd.f32 %v2527_v33, %v2526_v15  ;;  %v2511_v53 = vadd.f32 %v2510_v46, %v2509_v47  ;;  %v6099_v35 = vsub.f32 %v5818_v3, %v2656_v45 }
 0xc8f   :  { %v2523_v2 = vadd.f32 %v2522_v60, %v2521_v7  ;;  %v6102_v9 = vsub.f32 %v5825_v28, %v2653_v55 }
 0xc90   :  { %v2559_v26 = vrot.slane %v2558_v24, 1  ;;  %v2529_v52 = vrot.slane %v2528_v41, 2  ;;  %v2461_v10 = vpop.xlane.xlu2 %2460  ;;  %v2652_v40 = vmul.f32 %v6093_v17, %v2511_v53  ;;  %v2696_v3 = vmul.f32 %v6099_v35, %v6099_v35 }
 0xc91   :  { %v2524_v36 = vrot.slane %v2523_v2, 1  ;;  %v2540_v49 = vsel %vm2504_vm8, %v2461_v10, 0.0  ;;  %v2693_v6 = vmul.f32 %v6102_v9, %v6102_v9 }
 0xc92   :  { %v2560_v48 = vadd.f32 %v2559_v26, %v2558_v24  ;;  %v2530_v37 = vadd.f32 %v2529_v52, %v2528_v41  ;;  %v2541_v38 = vrot.slane %v2540_v49, 4  ;;  %v6107_v20 = vsub.f32 %v5842_v13, %v2652_v40 }
 0xc93   :  { %v2525_v5 = vadd.f32 %v2524_v36, %v2523_v2  ;;  %v2724_v46 = vsel %vm2443_vm4, %v2696_v3, 0.0  ;;  %v2715_v62 = vsel %vm2443_vm4, %v2693_v6, 0.0 }
 0xc94   :  { %v2531_v25 = vrot.slane %v2530_v37, 1  ;;  %v2542_v18 = vadd.f32 %v2541_v38, %v2540_v49  ;;  %v2464_v42 = vpop.xlane.xlu1 %2463  ;;  %v2659_v56 = vmul.f32 %v6093_v17, %v2560_v48  ;;  %v2692_v39 = vmul.f32 %v6107_v20, %v6107_v20  ;;  %2725 = vadd.xlane.f32.xlu2 %v2724_v46  ;;  %2716 = vadd.xlane.f32.xlu1 %v2715_v62 }
 0xc95   :  { %v2547_v11 = vsel %vm2504_vm8, %v2464_v42, 0.0  ;;  %v2476_v63 = vpop.xlane.xlu0 %2475  ;;  %v2654_v47 = vmul.f32 %v6093_v17, %v2525_v5 }
 0xc96   :  { %v2532_v44 = vadd.f32 %v2531_v25, %v2530_v37  ;;  %v2543_v43 = vrot.slane %v2542_v18, 2  ;;  %v2548_v0 = vrot.slane %v2547_v11, 4  ;;  %v2575_v61 = vsel %vm2504_vm8, %v2476_v63, 0.0 }
 0xc97   :  { %v2576_v28 = vrot.slane %v2575_v61, 4  ;;  %v6118_v7 = vsub.f32 %v5851_v4, %v2659_v56  ;;  %v6122_v58 = vsub.f32 %v5855_v30, %v2654_v47  ;;  %v2712_v60 = vsel %vm2443_vm4, %v2692_v39, 0.0 }
 0xc98   :  { %v2544_v13 = vadd.f32 %v2543_v43, %v2542_v18  ;;  %v2549_v15 = vadd.f32 %v2548_v0, %v2547_v11  ;;  %2713 = vadd.xlane.f32.xlu0 %v2712_v60  ;;  %v2655_v8 = vmul.f32 %v6093_v17, %v2532_v44 }
 0xc99   :  { %v2577_v33 = vadd.f32 %v2576_v28, %v2575_v61  ;;  %v2699_v4 = vmul.f32 %v6118_v7, %v6118_v7  ;;  %v2694_v30 = vmul.f32 %v6122_v58, %v6122_v58 }
 0xc9a   :  { %v2545_v24 = vrot.slane %v2544_v13, 1  ;;  %v2550_v41 = vrot.slane %v2549_v15, 2  ;;  %v6132_v53 = vsub.f32 %v5880_v22, %v2655_v8 }
 0xc9b   :  { %v2578_v12 = vrot.slane %v2577_v33, 2  ;;  %v2733_v23 = vsel %vm2443_vm4, %v2699_v4, 0.0  ;;  %v2718_v37 = vsel %vm2443_vm4, %v2694_v30, 0.0 }
 0xc9c   :  { %v2546_v19 = vadd.f32 %v2545_v24, %v2544_v13  ;;  %v2551_v2 = vadd.f32 %v2550_v41, %v2549_v15  ;;  %v2695_v36 = vmul.f32 %v6132_v53, %v6132_v53  ;;  %2734 = vadd.xlane.f32.xlu2 %v2733_v23  ;;  %2719 = vadd.xlane.f32.xlu1 %v2718_v37 }
 0xc9d   :  { %v2579_v26 = vadd.f32 %v2578_v12, %v2577_v33 }
 0xc9e   :  { %v2552_v52 = vrot.slane %v2551_v2, 1  ;;  %v2657_v10 = vmul.f32 %v6093_v17, %v2546_v19  ;;  %v2721_v5 = vsel %vm2443_vm4, %v2695_v36, 0.0 }
 0xc9f   :  { %v2580_v48 = vrot.slane %v2579_v26, 1 }
 0xca0   :  { %v2553_v49 = vadd.f32 %v2552_v52, %v2551_v2  ;;  %v6141_v38 = vsub.f32 %v5913_v21, %v2657_v10  ;;  %2722 = vadd.xlane.f32.xlu0 %v2721_v5 }
 0xca1   :  { %v2581_v22 = vadd.f32 %v2580_v48, %v2579_v26 }
 0xca2   :  { %v2473_v45 = vpop.xlane.xlu2 %2472  ;;  %v2658_v40 = vmul.f32 %v6093_v17, %v2553_v49  ;;  %v2697_v56 = vmul.f32 %v6141_v38, %v6141_v38 }
 0xca3   :  { %v2568_v55 = vsel %vm2504_vm8, %v2473_v45, 0.0  ;;  %v2470_v25 = vpop.xlane.xlu1 %2469  ;;  %v2662_v44 = vmul.f32 %v6093_v17, %v2581_v22 }
 0xca4   :  { %v2569_v18 = vrot.slane %v2568_v55, 4  ;;  %v2561_v42 = vsel %vm2504_vm8, %v2470_v25, 0.0  ;;  %v6150_v11 = vsub.f32 %v5926_v1, %v2658_v40  ;;  %v2727_v3 = vsel %vm2443_vm4, %v2697_v56, 0.0 }
 0xca5   :  { %v2562_v21 = vrot.slane %v2561_v42, 4  ;;  %v6153_v47 = vsub.f32 %v5931_v27, %v2662_v44  ;;  %2728 = vadd.xlane.f32.xlu1 %v2727_v3 }
 0xca6   :  { %v2570_v63 = vadd.f32 %v2569_v18, %v2568_v55  ;;  %v2698_v0 = vmul.f32 %v6150_v11, %v6150_v11 }
 0xca7   :  { %v2563_v43 = vadd.f32 %v2562_v21, %v2561_v42  ;;  %v2702_v28 = vmul.f32 %v6153_v47, %v6153_v47 }
 0xca8   :  { %v2571_v61 = vrot.slane %v2570_v63, 2  ;;  %v2482_v39 = vpop.xlane.xlu0 %2481  ;;  %v2730_v13 = vsel %vm2443_vm4, %v2698_v0, 0.0 }
 0xca9   :  { %v2564_v6 = vrot.slane %v2563_v43, 2  ;;  %v2589_v15 = vsel %vm2504_vm8, %v2482_v39, 0.0  ;;  %v2742_v27 = vsel %vm2443_vm4, %v2702_v28, 0.0  ;;  %2731 = vadd.xlane.f32.xlu0 %v2730_v13 }
 0xcaa   :  { %v2572_v1 = vadd.f32 %v2571_v61, %v2570_v63  ;;  %v2590_v33 = vrot.slane %v2589_v15, 4  ;;  %2743 = vadd.xlane.f32.xlu2 %v2742_v27 }
 0xcab   :  { %v2565_v46 = vadd.f32 %v2564_v6, %v2563_v43  ;;  %v2485_v62 = vpop.xlane.xlu2 %2484 }
 0xcac   :  { %v2573_v60 = vrot.slane %v2572_v1, 1  ;;  %v2596_v24 = vsel %vm2504_vm8, %v2485_v62, 0.0  ;;  %v2591_v4 = vadd.f32 %v2590_v33, %v2589_v15 }
 0xcad   :  { %v2566_v41 = vrot.slane %v2565_v46, 1  ;;  %v2597_v8 = vrot.slane %v2596_v24, 4  ;;  %v2479_v12 = vpop.xlane.xlu1 %2478 }
 0xcae   :  { %v2574_v30 = vadd.f32 %v2573_v60, %v2572_v1  ;;  %v2582_v19 = vsel %vm2504_vm8, %v2479_v12, 0.0  ;;  %v2592_v26 = vrot.slane %v2591_v4, 2 }
 0xcaf   :  { %v2567_v2 = vadd.f32 %v2566_v41, %v2565_v46  ;;  %v2598_v52 = vadd.f32 %v2597_v8, %v2596_v24  ;;  %v2583_v23 = vrot.slane %v2582_v19, 4 }
 0xcb0   :  { %v2661_v36 = vmul.f32 %v6093_v17, %v2574_v30  ;;  %v2593_v10 = vadd.f32 %v2592_v26, %v2591_v4  ;;  %v2491_v49 = vpop.xlane.xlu0 %2490 }
 0xcb1   :  { %v2599_v48 = vrot.slane %v2598_v52, 2  ;;  %v2584_v37 = vadd.f32 %v2583_v23, %v2582_v19  ;;  %v2660_v5 = vmul.f32 %v6093_v17, %v2567_v2  ;;  %v2610_v22 = vsel %vm2504_vm8, %v2491_v49, 0.0 }
 0xcb2   :  { %v6169_v45 = vsub.f32 %v5986_v50, %v2661_v36  ;;  %v2594_v55 = vrot.slane %v2593_v10, 1  ;;  %v2611_v18 = vrot.slane %v2610_v22, 4 }
 0xcb3   :  { %v2600_v25 = vadd.f32 %v2599_v48, %v2598_v52  ;;  %v2585_v40 = vrot.slane %v2584_v37, 2  ;;  %v6174_v56 = vsub.f32 %v5998_v29, %v2660_v5 }
 0xcb4   :  { %v2701_v42 = vmul.f32 %v6169_v45, %v6169_v45  ;;  %v2595_v44 = vadd.f32 %v2594_v55, %v2593_v10  ;;  %v2612_v43 = vadd.f32 %v2611_v18, %v2610_v22 }
 0xcb5   :  { %7441 = vst [vmem:[#allocation5_spill] sm:$0xff] %v6174_v56  ;;  %v2601_v21 = vrot.slane %v2600_v25, 1  ;;  %v2586_v63 = vadd.f32 %v2585_v40, %v2584_v37  ;;  %v2700_v50 = vmul.f32 %v6174_v56, %v6174_v56 }
 0xcb6   :  { %v2739_v0 = vsel %vm2443_vm4, %v2701_v42, 0.0  ;;  %v2613_v28 = vrot.slane %v2612_v43, 2  ;;  %v2664_v39 = vmul.f32 %v6093_v17, %v2595_v44 }
 0xcb7   :  { %v2602_v61 = vadd.f32 %v2601_v21, %v2600_v25  ;;  %v2587_v3 = vrot.slane %v2586_v63, 1  ;;  %v2494_v6 = vpop.xlane.xlu2 %2493  ;;  %2740 = vadd.xlane.f32.xlu1 %v2739_v0  ;;  %v2736_v29 = vsel %vm2443_vm4, %v2700_v50, 0.0 }
 0xcb8   :  { %v2617_v13 = vsel %vm2504_vm8, %v2494_v6, 0.0  ;;  %v2614_v15 = vadd.f32 %v2613_v28, %v2612_v43  ;;  %2737 = vadd.xlane.f32.xlu0 %v2736_v29  ;;  %v6183_v46 = vsub.f32 %v6019_v54, %v2664_v39 }
 0xcb9   :  { %v2588_v1 = vadd.f32 %v2587_v3, %v2586_v63  ;;  %v2618_v27 = vrot.slane %v2617_v13, 4  ;;  %v2665_v33 = vmul.f32 %v6093_v17, %v2602_v61 }
 0xcba   :  { %7442 = vst [vmem:[#allocation6_spill] sm:$0xff] %v6183_v46  ;;  %v2615_v62 = vrot.slane %v2614_v15, 1  ;;  %v2704_v24 = vmul.f32 %v6183_v46, %v6183_v46 }
 0xcbb   :  { %v2619_v60 = vadd.f32 %v2618_v27, %v2617_v13  ;;  %v2663_v41 = vmul.f32 %v6093_v17, %v2588_v1  ;;  %v6190_v4 = vsub.f32 %v6029_v51, %v2665_v33 }
 0xcbc   :  { %v2616_v8 = vadd.f32 %v2615_v62, %v2614_v15  ;;  %v2748_v30 = vsel %vm2443_vm4, %v2704_v24, 0.0 }
 0xcbd   :  { %7443 = vst [vmem:[#allocation7_spill] sm:$0xff] %v6190_v4  ;;  %v2620_v12 = vrot.slane %v2619_v60, 2  ;;  %v6194_v19 = vsub.f32 %v6044_v34, %v2663_v41  ;;  %2749 = vadd.xlane.f32.xlu2 %v2748_v30  ;;  %v2705_v54 = vmul.f32 %v6190_v4, %v6190_v4 }
 0xcbe   :  { %v2488_v26 = vpop.xlane.xlu1 %2487  ;;  %v2667_v23 = vmul.f32 %v6093_v17, %v2616_v8 }
 0xcbf   :  { %7444 = vst [vmem:[#allocation8_spill] sm:$0xff] %v6194_v19  ;;  %v2621_v2 = vadd.f32 %v2620_v12, %v2619_v60  ;;  %v2703_v52 = vmul.f32 %v6194_v19, %v6194_v19  ;;  %v2603_v51 = vsel %vm2504_vm8, %v2488_v26, 0.0  ;;  %v2751_v36 = vsel %vm2443_vm4, %v2705_v54, 0.0 }
 0xcc0   :  { %v2604_v48 = vrot.slane %v2603_v51, 4  ;;  %2752 = vadd.xlane.f32.xlu1 %v2751_v36  ;;  %v6205_v37 = vsub.f32 %v6054_v57, %v2667_v23 }
 0xcc1   :  { %v2622_v10 = vrot.slane %v2621_v2, 1  ;;  %v2745_v34 = vsel %vm2443_vm4, %v2703_v52, 0.0 }
 0xcc2   :  { %7445 = vst [vmem:[#allocation9_spill] sm:$0xff] %v6205_v37  ;;  %v2497_v49 = vpop.xlane.xlu0 %2496  ;;  %2746 = vadd.xlane.f32.xlu0 %v2745_v34  ;;  %v2605_v22 = vadd.f32 %v2604_v48, %v2603_v51  ;;  %v2707_v25 = vmul.f32 %v6205_v37, %v6205_v37 }
 0xcc3   :  { %v2623_v5 = vadd.f32 %v2622_v10, %v2621_v2  ;;  %v2624_v55 = vsel %vm2504_vm8, %v2497_v49, 0.0 }
 0xcc4   :  { %v2625_v40 = vrot.slane %v2624_v55, 4  ;;  %v2606_v18 = vrot.slane %v2605_v22, 2  ;;  %v2757_v42 = vsel %vm2443_vm4, %v2707_v25, 0.0 }
 0xcc5   :  { %v2668_v44 = vmul.f32 %v6093_v17, %v2623_v5  ;;  %2758 = vadd.xlane.f32.xlu2 %v2757_v42 }
 0xcc6   :  { %v2626_v21 = vadd.f32 %v2625_v40, %v2624_v55  ;;  %v2607_v63 = vadd.f32 %v2606_v18, %v2605_v22 }
 0xcc7   :  { %v6213_v57 = vsub.f32 %v6063_v32, %v2668_v44 }
 0xcc8   :  { %v2627_v43 = vrot.slane %v2626_v21, 2  ;;  %v2608_v0 = vrot.slane %v2607_v63, 1 }
 0xcc9   :  { %7446 = vst [vmem:[#allocation10_spill] sm:$0xff] %v6213_v57  ;;  %v2708_v50 = vmul.f32 %v6213_v57, %v6213_v57 }
 0xcca   :  { %v2628_v61 = vadd.f32 %v2627_v43, %v2626_v21  ;;  %v2609_v3 = vadd.f32 %v2608_v0, %v2607_v63 }
 0xccb   :  { %v2760_v28 = vsel %vm2443_vm4, %v2708_v50, 0.0 }
 0xccc   :  { %v2629_v6 = vrot.slane %v2628_v61, 1  ;;  %v2503_v39 = vpop.xlane.xlu2 %2502  ;;  %2761 = vadd.xlane.f32.xlu1 %v2760_v28  ;;  %v2666_v1 = vmul.f32 %v6093_v17, %v2609_v3 }
 0xccd   :  { %v2638_v13 = vsel %vm2504_vm8, %v2503_v39, 0.0  ;;  %v2500_v29 = vpop.xlane.xlu1 %2499 }
 0xcce   :  { %v2630_v15 = vadd.f32 %v2629_v6, %v2628_v61  ;;  %v2639_v32 = vrot.slane %v2638_v13, 4  ;;  %v2631_v27 = vsel %vm2504_vm8, %v2500_v29, 0.0  ;;  %v6222_v62 = vsub.f32 %v6070_v14, %v2666_v1 }
 0xccf   :  { %v2632_v33 = vrot.slane %v2631_v27, 4 }
 0xcd0   :  { %7447 = vst [vmem:[#allocation11_spill] sm:$0xff] %v6222_v62  ;;  %v2640_v60 = vadd.f32 %v2639_v32, %v2638_v13  ;;  %v2669_v24 = vmul.f32 %v6093_v17, %v2630_v15  ;;  %v2706_v8 = vmul.f32 %v6222_v62, %v6222_v62 }
 0xcd1   :  { %v2633_v41 = vadd.f32 %v2632_v33, %v2631_v27 }
 0xcd2   :  { %v2641_v12 = vrot.slane %v2640_v60, 2  ;;  %v6228_v30 = vsub.f32 %v6074_v59, %v2669_v24  ;;  %v2754_v2 = vsel %vm2443_vm4, %v2706_v8, 0.0 }
 0xcd3   :  { %v2634_v54 = vrot.slane %v2633_v41, 2  ;;  %2755 = vadd.xlane.f32.xlu0 %v2754_v2 }
 0xcd4   :  { %7448 = vst [vmem:[#allocation12_spill] sm:$0xff] %v6228_v30  ;;  %v2642_v26 = vadd.f32 %v2641_v12, %v2640_v60  ;;  %v2709_v14 = vmul.f32 %v6228_v30, %v6228_v30 }
 0xcd5   :  { %v2635_v52 = vadd.f32 %v2634_v54, %v2633_v41 }
 0xcd6   :  { %v2643_v23 = vrot.slane %v2642_v26, 1  ;;  %v2763_v51 = vsel %vm2443_vm4, %v2709_v14, 0.0 }
 0xcd7   :  { %v2636_v36 = vrot.slane %v2635_v52, 1  ;;  %2764 = vadd.xlane.f32.xlu2 %v2763_v51 }
 0xcd8   :  { %v2644_v10 = vadd.f32 %v2643_v23, %v2642_v26 }
 0xcd9   :  { %v2637_v48 = vadd.f32 %v2636_v36, %v2635_v52 }
 0xcda   :  { %v2671_v34 = vmul.f32 %v6093_v17, %v2644_v10 }
 0xcdb   :  { %v2670_v59 = vmul.f32 %v6093_v17, %v2637_v48 }
 0xcdc   :  { %v6237_v49 = vsub.f32 %v6078_v16, %v2671_v34 }
 0xcdd   :  { %v6240_v5 = vsub.f32 %v6082_v31, %v2670_v59 }
 0xcde   :  { %7449 = vst [vmem:[#allocation13_spill] sm:$0xff] %v6237_v49  ;;  %v2711_v22 = vmul.f32 %v6237_v49, %v6237_v49 }
 0xcdf   :  { %7450 = vst [vmem:[#allocation14_spill] sm:$0xff] %v6240_v5  ;;  %v2710_v55 = vmul.f32 %v6240_v5, %v6240_v5 }
 0xce0   :  { %v2769_v25 = vsel %vm2443_vm4, %v2711_v22, 0.0 }
 0xce1   :  { %2770 = vadd.xlane.f32.xlu1 %v2769_v25  ;;  %v2766_v40 = vsel %vm2443_vm4, %v2710_v55, 0.0 }
 0xce2   :  { %2767 = vadd.xlane.f32.xlu0 %v2766_v40 }
 0xd07   :  { %v2726_v18 = vpop.xlane.xlu2 %2725  ;;  %v2717_v16 = vpop.xlane.xlu1 %2716 }
 0xd08   :  { %v2800_v42 = vsel %vm2504_vm8, %v2726_v18, 0.0  ;;  %v2779_v31 = vsel %vm2504_vm8, %v2717_v16, 0.0 }
 0xd09   :  { %v2801_v21 = vrot.slane %v2800_v42, 4  ;;  %v2780_v43 = vrot.slane %v2779_v31, 4 }
 0xd0b   :  { %v2714_v44 = vpop.xlane.xlu0 %2713  ;;  %v2802_v50 = vadd.f32 %v2801_v21, %v2800_v42  ;;  %v2781_v61 = vadd.f32 %v2780_v43, %v2779_v31 }
 0xd0c   :  { %v2772_v63 = vsel %vm2504_vm8, %v2714_v44, 0.0 }
 0xd0d   :  { %v2773_v0 = vrot.slane %v2772_v63, 4  ;;  %v2803_v28 = vrot.slane %v2802_v50, 2  ;;  %v2782_v6 = vrot.slane %v2781_v61, 2 }
 0xd0f   :  { %v2774_v3 = vadd.f32 %v2773_v0, %v2772_v63  ;;  %v2735_v39 = vpop.xlane.xlu2 %2734  ;;  %v2804_v13 = vadd.f32 %v2803_v28, %v2802_v50  ;;  %v2720_v15 = vpop.xlane.xlu1 %2719  ;;  %v2783_v27 = vadd.f32 %v2782_v6, %v2781_v61 }
 0xd10   :  { %v2821_v1 = vsel %vm2504_vm8, %v2735_v39, 0.0  ;;  %v2786_v60 = vsel %vm2504_vm8, %v2720_v15, 0.0 }
 0xd11   :  { %v2775_v29 = vrot.slane %v2774_v3, 2  ;;  %v2822_v33 = vrot.slane %v2821_v1, 4  ;;  %v2787_v41 = vrot.slane %v2786_v60, 4  ;;  %v2805_v54 = vrot.slane %v2804_v13, 1 }
 0xd12   :  { %v2784_v52 = vrot.slane %v2783_v27, 1 }
 0xd13   :  { %v2723_v32 = vpop.xlane.xlu0 %2722  ;;  %v2823_v12 = vadd.f32 %v2822_v33, %v2821_v1  ;;  %v2776_v2 = vadd.f32 %v2775_v29, %v2774_v3  ;;  %v2788_v26 = vadd.f32 %v2787_v41, %v2786_v60  ;;  %v2806_v48 = vadd.f32 %v2805_v54, %v2804_v13 }
 0xd14   :  { %v2793_v24 = vsel %vm2504_vm8, %v2723_v32, 0.0  ;;  %v2785_v55 = vadd.f32 %v2784_v52, %v2783_v27 }
 0xd15   :  { %v2794_v8 = vrot.slane %v2793_v24, 4  ;;  %v2824_v23 = vrot.slane %v2823_v12, 2  ;;  %v2789_v51 = vrot.slane %v2788_v26, 2  ;;  %v2777_v34 = vrot.slane %v2776_v2, 1 }
 0xd16   :  { %v2916_v43 = vmul.f32 %v2806_v48, %v6093_v17  ;;  %v2913_v3 = vmul.f32 %v2785_v55, %v6093_v17 }
 0xd17   :  { %v2795_v14 = vadd.f32 %v2794_v8, %v2793_v24  ;;  %v2825_v36 = vadd.f32 %v2824_v23, %v2823_v12  ;;  %v2790_v42 = vadd.f32 %v2789_v51, %v2788_v26  ;;  %v2778_v0 = vadd.f32 %v2777_v34, %v2776_v2 }
 0xd18   :  { %v2729_v59 = vpop.xlane.xlu1 %2728  ;;  %v6259_v32 = vadd.f32 1e-05, %v2916_v43  ;;  %v6262_v60 = vadd.f32 1e-05, %v2913_v3 }
 0xd19   :  { %v2796_v10 = vrot.slane %v2795_v14, 2  ;;  %v2807_v25 = vsel %vm2504_vm8, %v2729_v59, 0.0  ;;  %v2826_v44 = vrot.slane %v2825_v36, 1  ;;  %v2791_v6 = vrot.slane %v2790_v42, 1 }
 0xd1a   :  { %v2808_v16 = vrot.slane %v2807_v25, 4  ;;  %v2912_v27 = vmul.f32 %v2778_v0, %v6093_v17  ;;  %4315 = vrsqrt.f32 %v6259_v32  ;;  %vm2998_vm10 = vweird.f32 %v6259_v32 }
 0xd1b   :  { %v2797_v21 = vadd.f32 %v2796_v10, %v2795_v14  ;;  %v2827_v29 = vadd.f32 %v2826_v44, %v2825_v36  ;;  %v2792_v8 = vadd.f32 %v2791_v6, %v2790_v42  ;;  %4317 = vrsqrt.f32 %v6262_v60 }
 0xd1c   :  { %v2732_v22 = vpop.xlane.xlu0 %2731  ;;  %v2809_v50 = vadd.f32 %v2808_v16, %v2807_v25  ;;  %v6266_v52 = vadd.f32 1e-05, %v2912_v27  ;;  %vm2968_vm14 = vweird.f32 %v6262_v60 }
 0xd1d   :  { %v2744_v40 = vpop.xlane.xlu2 %2743  ;;  %v2814_v18 = vsel %vm2504_vm8, %v2732_v22, 0.0  ;;  %v2798_v1 = vrot.slane %v2797_v21, 1  ;;  %v2919_v54 = vmul.f32 %v2827_v29, %v6093_v17  ;;  %v2914_v34 = vmul.f32 %v2792_v8, %v6093_v17 }
 0xd1e   :  { %v2842_v31 = vsel %vm2504_vm8, %v2744_v40, 0.0  ;;  %v2815_v63 = vrot.slane %v2814_v18, 4  ;;  %v2810_v39 = vrot.slane %v2809_v50, 2  ;;  %4319 = vrsqrt.f32 %v6266_v52 }
 0xd1f   :  { %v2843_v61 = vrot.slane %v2842_v31, 4  ;;  %v2799_v2 = vadd.f32 %v2798_v1, %v2797_v21  ;;  %v6271_v55 = vadd.f32 1e-05, %v2919_v54  ;;  %vm2958_vm0 = vweird.f32 %v6266_v52 }
 0xd20   :  { %v2816_v28 = vadd.f32 %v2815_v63, %v2814_v18  ;;  %v2811_v33 = vadd.f32 %v2810_v39, %v2809_v50  ;;  %v6280_v63 = vadd.f32 1e-05, %v2914_v34 }
 0xd21   :  { %v2844_v13 = vadd.f32 %v2843_v61, %v2842_v31  ;;  %v2915_v25 = vmul.f32 %v2799_v2, %v6093_v17  ;;  %v6278_v31 = vpop.eup %4315  ;;  %4321 = vrsqrt.f32 %v6271_v55  ;;  %vm3028_vm6 = vweird.f32 %v6271_v55 }
 0xd22   :  { %v2817_v15 = vrot.slane %v2816_v28, 2  ;;  %v2812_v12 = vrot.slane %v2811_v33, 1  ;;  %v6283_v50 = vpop.eup %4317  ;;  %v2993_v29 = vmul.f32 %v6278_v31, %v6259_v32  ;;  %4323 = vrsqrt.f32 %v6280_v63 }
 0xd23   :  { %v2845_v24 = vrot.slane %v2844_v13, 2  ;;  %v6286_v61 = vadd.f32 1e-05, %v2915_v25  ;;  %vm2999_vm13 = vweird.f32 %v6278_v31  ;;  %vm2969_vm12 = vweird.f32 %v6283_v50 }
 0xd24   :  { %v2818_v41 = vadd.f32 %v2817_v15, %v2816_v28  ;;  %v2813_v23 = vadd.f32 %v2812_v12, %v2811_v33  ;;  %v2963_v33 = vmul.f32 %v6283_v50, %v6262_v60  ;;  %v6300_v12 = vpop.eup %4319  ;;  %vm3000_vm11 = vmor %vm2998_vm10, %vm2999_vm13  ;;  %vm2978_vm7 = vweird.f32 %v6280_v63 }
 0xd25   :  { %v2846_v26 = vadd.f32 %v2845_v24, %v2844_v13  ;;  %4325 = vrsqrt.f32 %v6286_v61  ;;  %vm2970_vm1 = vmor %vm2968_vm14, %vm2969_vm12  ;;  %vm2959_vm15 = vweird.f32 %v6300_v12  ;;  %vm2988_vm13 = vweird.f32 %v6286_v61 }
 0xd26   :  { %v2819_v14 = vrot.slane %v2818_v41, 1  ;;  %v2917_v42 = vmul.f32 %v2813_v23, %v6093_v17  ;;  %vm2960_vm2 = vmor %vm2958_vm0, %vm2959_vm15 }
 0xd27   :  { %v2847_v36 = vrot.slane %v2846_v26, 1 }
 0xd28   :  { %v2820_v10 = vadd.f32 %v2819_v14, %v2818_v41  ;;  %v6288_v6 = vadd.f32 1e-05, %v2917_v42 }
 0xd29   :  { %v2848_v40 = vadd.f32 %v2847_v36, %v2846_v26 }
 0xd2a   :  { %v2741_v51 = vpop.xlane.xlu1 %2740  ;;  %v2918_v21 = vmul.f32 %v2820_v10, %v6093_v17  ;;  %4327 = vrsqrt.f32 %v6288_v6  ;;  %v6306_v10 = vpop.eup %4321  ;;  %vm3008_vm14 = vweird.f32 %v6288_v6 }
 0xd2b   :  { %v2835_v48 = vsel %vm2504_vm8, %v2741_v51, 0.0  ;;  %v2738_v22 = vpop.xlane.xlu0 %2737  ;;  %v2922_v43 = vmul.f32 %v2848_v40, %v6093_v17  ;;  %vm3029_vm3 = vweird.f32 %v6306_v10 }
 0xd2c   :  { %v2836_v59 = vrot.slane %v2835_v48, 4  ;;  %v2828_v18 = vsel %vm2504_vm8, %v2738_v22, 0.0  ;;  %v6293_v1 = vadd.f32 1e-05, %v2918_v21  ;;  %v2953_v22 = vmul.f32 %v6300_v12, %v6266_v52  ;;  %vm3030_vm5 = vmor %vm3028_vm6, %vm3029_vm3 }
 0xd2d   :  { %v2829_v44 = vrot.slane %v2828_v18, 4  ;;  %v6298_v24 = vadd.f32 1e-05, %v2922_v43  ;;  %v6314_v43 = vpop.eup %4323 }
 0xd2e   :  { %v2837_v16 = vadd.f32 %v2836_v59, %v2835_v48  ;;  %4329 = vrsqrt.f32 %v6293_v1  ;;  %vm3018_vm3 = vweird.f32 %v6293_v1 }
 0xd2f   :  { %v2830_v28 = vadd.f32 %v2829_v44, %v2828_v18  ;;  %4331 = vrsqrt.f32 %v6298_v24  ;;  %v2994_v18 = vmul.f32 %v6278_v31, %v2993_v29  ;;  %vm3058_vm0 = vweird.f32 %v6298_v24 }
 0xd30   :  { %v2838_v0 = vrot.slane %v2837_v16, 2  ;;  %v2750_v3 = vpop.xlane.xlu2 %2749 }
 0xd31   :  { %v2856_v13 = vsel %vm2504_vm8, %v2750_v3, 0.0  ;;  %v2831_v27 = vrot.slane %v2830_v28, 2  ;;  %v3023_v3 = vmul.f32 %v6306_v10, %v6271_v55  ;;  %v2995_v57 = vmul.f32 0.5, %v2994_v18 }
 0xd32   :  { %v2839_v39 = vadd.f32 %v2838_v0, %v2837_v16  ;;  %v2857_v15 = vrot.slane %v2856_v13, 4  ;;  %v6317_v0 = vmul.f32 %v6283_v50, %v2963_v33 }
 0xd33   :  { %v2753_v8 = vpop.xlane.xlu1 %2752  ;;  %v2832_v2 = vadd.f32 %v2831_v27, %v2830_v28 }
 0xd34   :  { %v2840_v41 = vrot.slane %v2839_v39, 1  ;;  %v2858_v54 = vadd.f32 %v2857_v15, %v2856_v13  ;;  %v2863_v26 = vsel %vm2504_vm8, %v2753_v8, 0.0  ;;  %v6323_v13 = vpop.eup %4325 }
 0xd35   :  { %v2747_v14 = vpop.xlane.xlu0 %2746  ;;  %v2864_v51 = vrot.slane %v2863_v26, 4  ;;  %v2833_v34 = vrot.slane %v2832_v2, 1  ;;  %v6327_v8 = vpop.eup %4327  ;;  %vm2989_vm10 = vweird.f32 %v6323_v13 }
 0xd36   :  { %v2841_v23 = vadd.f32 %v2840_v41, %v2839_v39  ;;  %v2849_v36 = vsel %vm2504_vm8, %v2747_v14, 0.0  ;;  %v2859_v48 = vrot.slane %v2858_v54, 2  ;;  %v2973_v14 = vmul.f32 %v6314_v43, %v6280_v63  ;;  %vm2990_vm12 = vmor %vm2988_vm13, %vm2989_vm10 }
 0xd37   :  { %v2850_v59 = vrot.slane %v2849_v36, 4  ;;  %v2865_v40 = vadd.f32 %v2864_v51, %v2863_v26  ;;  %v2834_v16 = vadd.f32 %v2833_v34, %v2832_v2  ;;  %v6333_v26 = vpop.eup %4329  ;;  %v6342_v34 = vmul.f32 %v6306_v10, %v3023_v3 }
 0xd38   :  { %v2921_v25 = vmul.f32 %v2841_v23, %v6093_v17  ;;  %v2860_v42 = vadd.f32 %v2859_v48, %v2858_v54  ;;  %v2759_v44 = vpop.xlane.xlu2 %2758  ;;  %v6330_v54 = vmul.f32 %v6300_v12, %v2953_v22  ;;  %v6339_v48 = vpop.eup %4331 }
 0xd39   :  { %v2851_v21 = vadd.f32 %v2850_v59, %v2849_v36  ;;  %v2866_v39 = vrot.slane %v2865_v40, 2  ;;  %v2920_v29 = vmul.f32 %v2834_v16, %v6093_v17  ;;  %v2877_v27 = vsel %vm2504_vm8, %v2759_v44, 0.0 }
 0xd3a   :  { %v6321_v28 = vadd.f32 1e-05, %v2921_v25  ;;  %v2861_v15 = vrot.slane %v2860_v42, 1  ;;  %v2878_v2 = vrot.slane %v2877_v27, 4  ;;  %v2983_v59 = vmul.f32 %v6323_v13, %v6286_v61 }
 0xd3b   :  { %v2852_v41 = vrot.slane %v2851_v21, 2  ;;  %v2867_v33 = vadd.f32 %v2866_v39, %v2865_v40  ;;  %v6337_v51 = vadd.f32 1e-05, %v2920_v29  ;;  %v3003_v40 = vmul.f32 %v6327_v8, %v6288_v6 }
 0xd3c   :  { %4333 = vrsqrt.f32 %v6321_v28  ;;  %v2862_v23 = vadd.f32 %v2861_v15, %v2860_v42  ;;  %v2879_v25 = vadd.f32 %v2878_v2, %v2877_v27  ;;  %v3053_v29 = vmul.f32 %v6339_v48, %v6298_v24 }
 0xd3d   :  { %v2853_v36 = vadd.f32 %v2852_v41, %v2851_v21  ;;  %v2868_v22 = vrot.slane %v2867_v33, 1  ;;  %4335 = vrsqrt.f32 %v6337_v51  ;;  %v3013_v21 = vmul.f32 %v6333_v26, %v6293_v1 }
 0xd3e   :  { %v2924_v16 = vmul.f32 %v2862_v23, %v6093_v17  ;;  %v2880_v3 = vrot.slane %v2879_v25, 2  ;;  %v6360_v23 = vmul.f32 %v6314_v43, %v2973_v14  ;;  %v6363_v49 = vmul.f32 %v6323_v13, %v2983_v59 }
 0xd3f   :  { %v2854_v42 = vrot.slane %v2853_v36, 1  ;;  %v2762_v44 = vpop.xlane.xlu1 %2761  ;;  %v2869_v39 = vadd.f32 %v2868_v22, %v2867_v33  ;;  %v6374_v14 = vmul.f32 %v6333_v26, %v3013_v21  ;;  %vm3059_vm15 = vweird.f32 %v6339_v48 }
 0xd40   :  { %v2884_v15 = vsel %vm2504_vm8, %v2762_v44, 0.0  ;;  %v6355_v27 = vadd.f32 1e-05, %v2924_v16  ;;  %v2881_v22 = vadd.f32 %v2880_v3, %v2879_v25  ;;  %v6381_v25 = vmul.f32 %v6339_v48, %v3053_v29  ;;  %vm3060_vm6 = vmor %vm3058_vm0, %vm3059_vm15 }
 0xd41   :  { %v2855_v41 = vadd.f32 %v2854_v42, %v2853_v36  ;;  %v2885_v2 = vrot.slane %v2884_v15, 4  ;;  %v2925_v33 = vmul.f32 %v2869_v39, %v6093_v17  ;;  %v6371_v42 = vmul.f32 %v6327_v8, %v3003_v40 }
 0xd42   :  { %v6357_v5 = vpop.eup %4333  ;;  %4337 = vrsqrt.f32 %v6355_v27  ;;  %v2882_v59 = vrot.slane %v2881_v22, 1  ;;  %v2985_v55 = vmul.f32 0.5, %v6363_v49  ;;  %v3055_v61 = vmul.f32 0.5, %v6381_v25 }
 0xd43   :  { %v3043_v44 = vmul.f32 %v6357_v5, %v6321_v28  ;;  %v2923_v16 = vmul.f32 %v2855_v41, %v6093_v17  ;;  %v2886_v36 = vadd.f32 %v2885_v2, %v2884_v15  ;;  %v6376_v62 = vadd.f32 1e-05, %v2925_v33  ;;  %v6378_v30 = vpop.eup %4335 }
 0xd44   :  { %v3033_v40 = vmul.f32 %v6378_v30, %v6337_v51  ;;  %v2883_v21 = vadd.f32 %v2882_v59, %v2881_v22  ;;  %v2996_v33 = vsub.f32 1.5, %v2995_v57  ;;  %v3056_v25 = vsub.f32 1.5, %v3055_v61 }
 0xd45   :  { %7451 = vst [vmem:[#allocation15_spill] sm:$0xff] %v6376_v62  ;;  %v6383_v39 = vadd.f32 1e-05, %v2923_v16  ;;  %v2887_v3 = vrot.slane %v2886_v36, 2  ;;  %v6386_v15 = vmul.f32 %v6357_v5, %v3043_v44  ;;  %4339 = vrsqrt.f32 %v6376_v62 }
 0xd46   :  { %v2756_v2 = vpop.xlane.xlu0 %2755  ;;  %v2927_v29 = vmul.f32 %v2883_v21, %v6093_v17  ;;  %v2965_v44 = vmul.f32 0.5, %v6317_v0  ;;  %v6400_v19 = vmul.f32 %v6378_v30, %v3033_v40  ;;  %vm3078_vm10 = vweird.f32 %v6355_v27 }
 0xd47   :  { %7452 = vst [vmem:[#allocation16_spill] sm:$0xff] %v6383_v39  ;;  %4341 = vrsqrt.f32 %v6383_v39  ;;  %v2888_v41 = vadd.f32 %v2887_v3, %v2886_v36  ;;  %v2870_v18 = vsel %vm2504_vm8, %v2756_v2, 0.0  ;;  %v2997_v36 = vmul.f32 %v6278_v31, %v2996_v33  ;;  %v6413_v33 = vld [vmem:[%s7368_s3 + $0xd8] sm:$0x1f] }
 0xd48   :  { %v6397_v16 = vpop.eup %4337  ;;  %v2871_v59 = vrot.slane %v2870_v18, 4  ;;  %v6405_v3 = vadd.f32 1e-05, %v2927_v29  ;;  %v2966_v2 = vsub.f32 1.5, %v2965_v44 }
 0xd49   :  { %v2889_v22 = vrot.slane %v2888_v41, 1  ;;  %v3073_v57 = vmul.f32 %v6397_v16, %v6355_v27  ;;  %v3001_v40 = vsel %vm3000_vm11, %v6278_v31, %v2997_v36  ;;  %vm3009_vm11 = vweird.f32 %v6327_v8 }
 0xd4a   :  { %v2765_v21 = vpop.xlane.xlu2 %2764  ;;  %v2872_v37 = vadd.f32 %v2871_v59, %v2870_v18  ;;  %4343 = vrsqrt.f32 %v6405_v3  ;;  %v3158_v44 = vmul.f32 %v3001_v40, %v6099_v35  ;;  %v6428_v59 = vld [vmem:[%s7368_s3 + $0xe0] sm:$0x1f]  ;;  %v2967_v36 = vmul.f32 %v6283_v50, %v2966_v2  ;;  %s4477_s3 = smov [#allocation2]  }
 0xd4b   :  { %v2890_v32 = vadd.f32 %v2889_v22, %v2888_v41  ;;  %v2891_v0 = vsel %vm2504_vm8, %v2765_v21, 0.0  ;;  %v6415_v4 = vpop.eup %4339  ;;  %v2955_v40 = vmul.f32 0.5, %v6330_v54  ;;  %s3865_s28 = sshll.u32 %s4477_s3, 4  ;;  %s3866_s28 = int_to_ptr.vmem [resolvable:$true] %s3865_s28 }
 0xd4c   :  { %v2892_v29 = vrot.slane %v2891_v0, 4  ;;  %v3083_v18 = vmul.f32 %v6415_v4, %v6376_v62  ;;  %v2873_v22 = vrot.slane %v2872_v37, 2  ;;  %v3178_v60 = vmul.f32 %v3158_v44, %v6413_v33 }
 0xd4d   :  { %v6420_v41 = vpop.eup %4341  ;;  %v2928_v31 = vmul.f32 %v2890_v32, %v6093_v17  ;;  %v6438_v32 = vmul.f32 %v6397_v16, %v3073_v57  ;;  %v2971_v62 = vsel %vm2970_vm1, %v6283_v50, %v2967_v36  ;;  %v2956_v57 = vsub.f32 1.5, %v2955_v40  ;;  %vm3010_vm1 = vmor %vm3008_vm14, %vm3009_vm11 }
 0xd4e   :  { %v3063_v35 = vmul.f32 %v6420_v41, %v6383_v39  ;;  %v2893_v21 = vadd.f32 %v2892_v29, %v2891_v0  ;;  %v2874_v46 = vadd.f32 %v2873_v22, %v2872_v37  ;;  %v6444_v2 = vmul.f32 %v6415_v4, %v3083_v18 }
 0xd4f   :  { %v6440_v56 = vadd.f32 1e-05, %v2928_v31  ;;  %v3198_v0 = vadd.f32 %v3178_v60, %v6428_v59  ;;  %v3155_v29 = vmul.f32 %v2971_v62, %v6102_v9  ;;  %v2957_v9 = vmul.f32 %v6300_v12, %v2956_v57 }
 0xd50   :  { %v2894_v39 = vrot.slane %v2893_v21, 2  ;;  %v6449_v44 = vmul.f32 %v6420_v41, %v3063_v35  ;;  %v2875_v54 = vrot.slane %v2874_v46, 1  ;;  %v6452_v31 = vpop.eup %4343  ;;  %v3025_v62 = vmul.f32 0.5, %v6342_v34 }
 0xd51   :  { %4345 = vrsqrt.f32 %v6440_v56  ;;  %v3226_v50 = vsel %vm2443_vm4, %v3198_v0, 0.0  ;;  %v3175_v18 = vmul.f32 %v3155_v29, %v6413_v33  ;;  %v3103_v36 = vmul.f32 %v6452_v31, %v6405_v3 }
 0xd52   :  { %v2895_v37 = vadd.f32 %v2894_v39, %v2893_v21  ;;  %v2876_v22 = vadd.f32 %v2875_v54, %v2874_v46  ;;  %3227 = vadd.xlane.f32.xlu1 %v3226_v50  ;;  %v2961_v46 = vsel %vm2960_vm2, %v6300_v12, %v2957_v9  ;;  %v2975_v12 = vmul.f32 0.5, %v6360_v23 }
 0xd53   :  { %v3195_v39 = vadd.f32 %v3175_v18, %v6428_v59  ;;  %v3154_v29 = vmul.f32 %v2961_v46, %v6107_v20  ;;  %v6483_v46 = vmul.f32 %v6452_v31, %v3103_v36  ;;  %vm3019_vm2 = vweird.f32 %v6333_v26 }
 0xd54   :  { %v2896_v35 = vrot.slane %v2895_v37, 1  ;;  %v2771_v21 = vpop.xlane.xlu1 %2770  ;;  %v2926_v60 = vmul.f32 %v2876_v22, %v6093_v17  ;;  %v3026_v22 = vsub.f32 1.5, %v3025_v62  ;;  %vm3038_vm11 = vweird.f32 %v6337_v51 }
 0xd55   :  { %v2905_v40 = vsel %vm2504_vm8, %v2771_v21, 0.0  ;;  %v2768_v0 = vpop.xlane.xlu0 %2767  ;;  %v3217_v34 = vsel %vm2443_vm4, %v3195_v39, 0.0  ;;  %vm3039_vm14 = vweird.f32 %v6378_v30  ;;  %vm3089_vm15 = vweird.f32 %v6415_v4 }
 0xd56   :  { %v2897_v52 = vadd.f32 %v2896_v35, %v2895_v37  ;;  %v2906_v54 = vrot.slane %v2905_v40, 4  ;;  %v6472_v50 = vadd.f32 1e-05, %v2926_v60  ;;  %3218 = vadd.xlane.f32.xlu0 %v3217_v34  ;;  %v2898_v18 = vsel %vm2504_vm8, %v2768_v0, 0.0  ;;  %vm3040_vm0 = vmor %vm3038_vm11, %vm3039_vm14 }
 0xd57   :  { %v6470_v57 = vpop.eup %4345  ;;  %v3174_v35 = vmul.f32 %v3154_v29, %v6413_v33  ;;  %v2899_v20 = vrot.slane %v2898_v18, 4  ;;  %v3027_v21 = vmul.f32 %v6306_v10, %v3026_v22  ;;  %v2976_v60 = vsub.f32 1.5, %v2975_v12 }
 0xd58   :  { %v3113_v9 = vmul.f32 %v6470_v57, %v6440_v56  ;;  %v2929_v37 = vmul.f32 %v2897_v52, %v6093_v17  ;;  %v2907_v39 = vadd.f32 %v2906_v54, %v2905_v40  ;;  %4347 = vrsqrt.f32 %v6472_v50 }
 0xd59   :  { %v3194_v23 = vadd.f32 %v3174_v35, %v6428_v59  ;;  %v2900_v52 = vadd.f32 %v2899_v20, %v2898_v18  ;;  %v3031_v34 = vsel %vm3030_vm5, %v6306_v10, %v3027_v21  ;;  %v2977_v29 = vmul.f32 %v6314_v43, %v2976_v60 }
 0xd5a   :  { %v6485_v62 = vadd.f32 1e-05, %v2929_v37  ;;  %v2908_v0 = vrot.slane %v2907_v39, 2  ;;  %v6493_v40 = vmul.f32 %v6470_v57, %v3113_v9  ;;  %v3161_v22 = vmul.f32 %v3031_v34, %v6118_v7 }
 0xd5b   :  { %v3214_v36 = vsel %vm2443_vm4, %v3194_v23, 0.0  ;;  %v2901_v12 = vrot.slane %v2900_v52, 2  ;;  %vm2979_vm8 = vweird.f32 %v6314_v43  ;;  %v3005_v9 = vmul.f32 0.5, %v6371_v42 }
 0xd5c   :  { %4349 = vrsqrt.f32 %v6485_v62  ;;  %v2909_v54 = vadd.f32 %v2908_v0, %v2907_v39  ;;  %3215 = vadd.xlane.f32.xlu2 %v3214_v36  ;;  %v3181_v10 = vmul.f32 %v3161_v22, %v6413_v33  ;;  %vm2980_vm9 = vmor %vm2978_vm7, %vm2979_vm8  ;;  %v2986_v39 = vsub.f32 1.5, %v2985_v55 }
 0xd5d   :  { %v2902_v35 = vadd.f32 %v2901_v12, %v2900_v52  ;;  %v2981_v7 = vsel %vm2980_vm9, %v6314_v43, %v2977_v29  ;;  %v3006_v42 = vsub.f32 1.5, %v3005_v9  ;;  %vm3049_vm5 = vweird.f32 %v6357_v5  ;;  %vm3020_vm7 = vmor %vm3018_vm3, %vm3019_vm2 }
 0xd5e   :  { %v2910_v18 = vrot.slane %v2909_v54, 1  ;;  %v6506_v37 = vpop.eup %4347  ;;  %v3201_v20 = vadd.f32 %v3181_v10, %v6428_v59  ;;  %v3156_v21 = vmul.f32 %v2981_v7, %v6122_v58  ;;  %v2987_v23 = vmul.f32 %v6323_v13, %v2986_v39 }
 0xd5f   :  { %v3093_v63 = vmul.f32 %v6506_v37, %v6472_v50  ;;  %v2903_v60 = vrot.slane %v2902_v35, 1  ;;  %v3015_v39 = vmul.f32 0.5, %v6374_v14  ;;  %vm3048_vm8 = vweird.f32 %v6321_v28 }
 0xd60   :  { %v2911_v49 = vadd.f32 %v2910_v18, %v2909_v54  ;;  %v3235_v52 = vsel %vm2443_vm4, %v3201_v20, 0.0  ;;  %v3176_v34 = vmul.f32 %v3156_v21, %v6413_v33  ;;  %v2991_v36 = vsel %vm2990_vm12, %v6323_v13, %v2987_v23  ;;  %vm3050_vm13 = vmor %vm3048_vm8, %vm3049_vm5 }
 0xd61   :  { %v2904_v29 = vadd.f32 %v2903_v60, %v2902_v35  ;;  %3236 = vadd.xlane.f32.xlu1 %v3235_v52  ;;  %v3007_v54 = vmul.f32 %v6327_v8, %v3006_v42  ;;  %v3157_v55 = vmul.f32 %v2991_v36, %v6132_v53  ;;  %v6539_v18 = vmul.f32 %v6506_v37, %v3093_v63 }
 0xd62   :  { %v6516_v0 = vpop.eup %4349  ;;  %v2931_v43 = vmul.f32 %v2911_v49, %v6093_v17  ;;  %v3196_v12 = vadd.f32 %v3176_v34, %v6428_v59  ;;  %v3016_v63 = vsub.f32 1.5, %v3015_v39  ;;  %v3045_v49 = vmul.f32 0.5, %v6386_v15 }
 0xd63   :  { %v3123_v58 = vmul.f32 %v6516_v0, %v6485_v62  ;;  %v2930_v13 = vmul.f32 %v2904_v29, %v6093_v17  ;;  %v3011_v10 = vsel %vm3010_vm1, %v6327_v8, %v3007_v54  ;;  %v3177_v53 = vmul.f32 %v3157_v55, %v6413_v33 }
 0xd64   :  { %v6528_v22 = vadd.f32 1e-05, %v2931_v43  ;;  %v3220_v9 = vsel %vm2443_vm4, %v3196_v12, 0.0  ;;  %v3159_v35 = vmul.f32 %v3011_v10, %v6141_v38  ;;  %v3057_v38 = vmul.f32 %v6339_v48, %v3056_v25 }
 0xd65   :  { %v6536_v6 = vmul.f32 %v6516_v0, %v3123_v58  ;;  %v6547_v7 = vadd.f32 1e-05, %v2930_v13  ;;  %3221 = vadd.xlane.f32.xlu0 %v3220_v9  ;;  %v3197_v17 = vadd.f32 %v3177_v53, %v6428_v59  ;;  %v3017_v14 = vmul.f32 %v6333_v26, %v3016_v63  ;;  %v7453_v9 = vld [vmem:[#allocation15_spill] sm:$0xff] }
 0xd66   :  { %4351 = vrsqrt.f32 %v6528_v22  ;;  %v3179_v8 = vmul.f32 %v3159_v35, %v6413_v33  ;;  %v3061_v24 = vsel %vm3060_vm6, %v6339_v48, %v3057_v38  ;;  %v3046_v60 = vsub.f32 1.5, %v3045_v49 }
 0xd67   :  { %4353 = vrsqrt.f32 %v6547_v7  ;;  %v3223_v20 = vsel %vm2443_vm4, %v3197_v17, 0.0  ;;  %v3075_v23 = vmul.f32 0.5, %v6438_v32  ;;  %v3164_v43 = vmul.f32 %v3061_v24, %v6153_v47 }
 0xd68   :  { %v3199_v21 = vadd.f32 %v3179_v8, %v6428_v59  ;;  %3224 = vadd.xlane.f32.xlu2 %v3223_v20  ;;  %vm3079_vm9 = vweird.f32 %v6397_v16  ;;  %v3021_v48 = vsel %vm3020_vm7, %v6333_v26, %v3017_v14  ;;  %v3047_v32 = vmul.f32 %v6357_v5, %v3046_v60  ;;  %v7455_v20 = vld [vmem:[#allocation5_spill] sm:$0xff]  ;;  %v7456_v60 = vld [vmem:[#allocation7_spill] sm:$0xff] }
 0xd69   :  { %v3076_v52 = vsub.f32 1.5, %v3075_v23  ;;  %v3184_v34 = vmul.f32 %v3164_v43, %v6413_v33  ;;  %v3160_v58 = vmul.f32 %v3021_v48, %v6150_v11  ;;  %v3035_v47 = vmul.f32 0.5, %v6400_v19  ;;  %vm3080_vm12 = vmor %vm3078_vm10, %vm3079_vm9 }
 0xd6a   :  { %v3229_v15 = vsel %vm2443_vm4, %v3199_v21, 0.0  ;;  %v3051_v26 = vsel %vm3050_vm13, %v6357_v5, %v3047_v32  ;;  %v3085_v5 = vmul.f32 0.5, %v6444_v2  ;;  %vm3088_vm1 = vweird.f32 %v7453_v9 }
 0xd6b   :  { %v3077_v36 = vmul.f32 %v6397_v16, %v3076_v52  ;;  %v3204_v54 = vadd.f32 %v3184_v34, %v6428_v59  ;;  %v3180_v27 = vmul.f32 %v3160_v58, %v6413_v33  ;;  %v3163_v19 = vmul.f32 %v3051_v26, %v6169_v45  ;;  %v7454_v45 = vld [vmem:[#allocation6_spill] sm:$0xff]  ;;  %vm3090_vm6 = vmor %vm3088_vm1, %vm3089_vm15  ;;  %v7458_v34 = vld [vmem:[#allocation9_spill] sm:$0xff] }
 0xd6c   :  { %v6565_v42 = vpop.eup %4351  ;;  %v3036_v55 = vsub.f32 1.5, %v3035_v47  ;;  %v3086_v25 = vsub.f32 1.5, %v3085_v5  ;;  %v3105_v17 = vmul.f32 0.5, %v6483_v46  ;;  %vm3109_vm2 = vweird.f32 %v6452_v31 }
 0xd6d   :  { %v3143_v1 = vmul.f32 %v6565_v42, %v6528_v22  ;;  %v6583_v28 = vpop.eup %4353  ;;  %3230 = vadd.xlane.f32.xlu0 %v3229_v15  ;;  %v3081_v12 = vsel %vm3080_vm12, %v6397_v16, %v3077_v36  ;;  %v3244_v61 = vsel %vm2443_vm4, %v3204_v54, 0.0  ;;  %v3200_v13 = vadd.f32 %v3180_v27, %v6428_v59  ;;  %v7459_v54 = vld [vmem:[#allocation8_spill] sm:$0xff] }
 0xd6e   :  { %v3133_v11 = vmul.f32 %v6583_v28, %v6547_v7  ;;  %v3183_v10 = vmul.f32 %v3163_v19, %v6413_v33  ;;  %3245 = vadd.xlane.f32.xlu1 %v3244_v61  ;;  %v3166_v53 = vmul.f32 %v3081_v12, %v7454_v45  ;;  %v3037_v35 = vmul.f32 %v6378_v30, %v3036_v55 }
 0xd6f   :  { %v6586_v29 = vmul.f32 %v6565_v42, %v3143_v1  ;;  %v3232_v2 = vsel %vm2443_vm4, %v3200_v13, 0.0  ;;  %v3087_v63 = vmul.f32 %v6415_v4, %v3086_v25  ;;  %v3106_v51 = vsub.f32 1.5, %v3105_v17 }
 0xd70   :  { %v6609_v16 = vmul.f32 %v6583_v28, %v3133_v11  ;;  %v3203_v39 = vadd.f32 %v3183_v10, %v6428_v59  ;;  %3233 = vadd.xlane.f32.xlu2 %v3232_v2  ;;  %v3186_v8 = vmul.f32 %v3166_v53, %v6413_v33  ;;  %v3041_v38 = vsel %vm3040_vm0, %v6378_v30, %v3037_v35  ;;  %v7460_v10 = vld [vmem:[#allocation10_spill] sm:$0xff]  ;;  %v7461_v35 = vld [vmem:[#allocation12_spill] sm:$0xff] }
 0xd71   :  { %v3162_v21 = vmul.f32 %v3041_v38, %v7455_v20  ;;  %v3065_v24 = vmul.f32 0.5, %v6449_v44  ;;  %v3091_v14 = vsel %vm3090_vm6, %v6415_v4, %v3087_v63  ;;  %vm3108_vm3 = vweird.f32 %v6405_v3  ;;  %v7457_v44 = vld [vmem:[#allocation16_spill] sm:$0xff] }
 0xd72   :  { %v3241_v49 = vsel %vm2443_vm4, %v3203_v39, 0.0  ;;  %v3206_v46 = vadd.f32 %v3186_v8, %v6428_v59  ;;  %vm3069_vm5 = vweird.f32 %v6420_v41  ;;  %v3167_v23 = vmul.f32 %v3091_v14, %v7456_v60  ;;  %vm3110_vm7 = vmor %vm3108_vm3, %vm3109_vm2 }
 0xd73   :  { %v3182_v30 = vmul.f32 %v3162_v21, %v6413_v33  ;;  %v3107_v15 = vmul.f32 %v6452_v31, %v3106_v51  ;;  %v3066_v43 = vsub.f32 1.5, %v3065_v24  ;;  %vm3068_vm8 = vweird.f32 %v7457_v44  ;;  %v7463_v51 = vld [vmem:[#allocation13_spill] sm:$0xff] }
 0xd74   :  { %v3250_v1 = vsel %vm2443_vm4, %v3206_v46, 0.0  ;;  %v3115_v4 = vmul.f32 0.5, %v6493_v40  ;;  %vm3118_vm9 = vweird.f32 %v6440_v56  ;;  %v3187_v48 = vmul.f32 %v3167_v23, %v6413_v33  ;;  %vm3070_vm13 = vmor %vm3068_vm8, %vm3069_vm5 }
 0xd75   :  { %3242 = vadd.xlane.f32.xlu0 %v3241_v49  ;;  %v3202_v3 = vadd.f32 %v3182_v30, %v6428_v59  ;;  %v3111_v32 = vsel %vm3110_vm7, %v6452_v31, %v3107_v15  ;;  %v3067_v52 = vmul.f32 %v6420_v41, %v3066_v43  ;;  %vm3119_vm10 = vweird.f32 %v6470_v57  ;;  %v7462_v49 = vld [vmem:[#allocation11_spill] sm:$0xff]  ;;  %v7464_v15 = vld [vmem:[#allocation14_spill] sm:$0xff] }
 0xd76   :  { %3251 = vadd.xlane.f32.xlu1 %v3250_v1  ;;  %v3169_v58 = vmul.f32 %v3111_v32, %v7458_v34  ;;  %v3116_v47 = vsub.f32 1.5, %v3115_v4  ;;  %v3125_v40 = vmul.f32 0.5, %v6536_v6  ;;  %v3207_v36 = vadd.f32 %v3187_v48, %v6428_v59  ;;  %vm3120_vm12 = vmor %vm3118_vm9, %vm3119_vm10 }
 0xd77   :  { %v3238_v26 = vsel %vm2443_vm4, %v3202_v3, 0.0  ;;  %v3071_v11 = vsel %vm3070_vm13, %v6420_v41, %v3067_v52  ;;  %vm3129_vm11 = vweird.f32 %v6516_v0  ;;  %vm3128_vm14 = vweird.f32 %v6485_v62 }
 0xd78   :  { %3239 = vadd.xlane.f32.xlu2 %v3238_v26  ;;  %v3189_v31 = vmul.f32 %v3169_v58, %v6413_v33  ;;  %v3165_v27 = vmul.f32 %v3071_v11, %v7459_v54  ;;  %v3117_v19 = vmul.f32 %v6470_v57, %v3116_v47  ;;  %v3126_v12 = vsub.f32 1.5, %v3125_v40  ;;  %vm3130_vm15 = vmor %vm3128_vm14, %vm3129_vm11 }
 0xd79   :  { %v3253_v55 = vsel %vm2443_vm4, %v3207_v36, 0.0  ;;  %v3095_v6 = vmul.f32 0.5, %v6539_v18  ;;  %vm3098_vm1 = vweird.f32 %v6472_v50  ;;  %vm3099_vm0 = vweird.f32 %v6506_v37 }
 0xd7a   :  { %v3209_v41 = vadd.f32 %v3189_v31, %v6428_v59  ;;  %v3185_v5 = vmul.f32 %v3165_v27, %v6413_v33  ;;  %v3121_v61 = vsel %vm3120_vm12, %v6470_v57, %v3117_v19  ;;  %v3127_v13 = vmul.f32 %v6516_v0, %v3126_v12  ;;  %vm3100_vm6 = vmor %vm3098_vm1, %vm3099_vm0 }
 0xd7b   :  { %v3170_v9 = vmul.f32 %v3121_v61, %v7460_v10  ;;  %v3096_v56 = vsub.f32 1.5, %v3095_v6  ;;  %v3145_v62 = vmul.f32 0.5, %v6586_v29  ;;  %vm3149_vm2 = vweird.f32 %v6565_v42 }
 0xd7c   :  { %v3259_v18 = vsel %vm2443_vm4, %v3209_v41, 0.0  ;;  %v3205_v45 = vadd.f32 %v3185_v5, %v6428_v59  ;;  %v3131_v53 = vsel %vm3130_vm15, %v6516_v0, %v3127_v13  ;;  %vm3148_vm3 = vweird.f32 %v6528_v22 }
 0xd7d   :  { %3254 = vadd.xlane.f32.xlu0 %v3253_v55  ;;  %v3190_v57 = vmul.f32 %v3170_v9, %v6413_v33  ;;  %v3171_v25 = vmul.f32 %v3131_v53, %v7461_v35  ;;  %v3097_v2 = vmul.f32 %v6506_v37, %v3096_v56  ;;  %v3146_v39 = vsub.f32 1.5, %v3145_v62  ;;  %vm3150_vm5 = vmor %vm3148_vm3, %vm3149_vm2 }
 0xd7e   :  { %3260 = vadd.xlane.f32.xlu1 %v3259_v18  ;;  %v3247_v17 = vsel %vm2443_vm4, %v3205_v45, 0.0  ;;  %v3135_v29 = vmul.f32 0.5, %v6609_v16  ;;  %vm3139_vm7 = vweird.f32 %v6583_v28  ;;  %vm3138_vm8 = vweird.f32 %v6547_v7 }
 0xd7f   :  { %v3210_v0 = vadd.f32 %v3190_v57, %v6428_v59  ;;  %v3191_v8 = vmul.f32 %v3171_v25, %v6413_v33  ;;  %v3101_v38 = vsel %vm3100_vm6, %v6506_v37, %v3097_v2  ;;  %v3147_v63 = vmul.f32 %v6565_v42, %v3146_v39  ;;  %vm3140_vm9 = vmor %vm3138_vm8, %vm3139_vm7 }
 0xd80   :  { %3248 = vadd.xlane.f32.xlu2 %v3247_v17  ;;  %v3168_v20 = vmul.f32 %v3101_v38, %v7462_v49  ;;  %v3136_v50 = vsub.f32 1.5, %v3135_v29  ;;  %v3674_v56 = vlaneseq }
 0xd81   :  { %v3262_v22 = vsel %vm2443_vm4, %v3210_v0, 0.0  ;;  %v3211_v16 = vadd.f32 %v3191_v8, %v6428_v59  ;;  %v3151_v21 = vsel %vm3150_vm5, %v6565_v42, %v3147_v63 }
 0xd82   :  { %v3188_v37 = vmul.f32 %v3168_v20, %v6413_v33  ;;  %v3173_v24 = vmul.f32 %v3151_v21, %v7463_v51  ;;  %v3137_v46 = vmul.f32 %v6583_v28, %v3136_v50  ;;  %v6738_v0 = vand.u32 127, %v3674_v56 }
 0xd83   :  { %v3265_v14 = vsel %vm2443_vm4, %v3211_v16, 0.0 }
 0xd84   :  { %v3208_v30 = vadd.f32 %v3188_v37, %v6428_v59  ;;  %v3193_v60 = vmul.f32 %v3173_v24, %v6413_v33  ;;  %v3141_v23 = vsel %vm3140_vm9, %v6583_v28, %v3137_v46 }
 0xd85   :  { %3263 = vadd.xlane.f32.xlu0 %v3262_v22  ;;  %v3172_v42 = vmul.f32 %v3141_v23, %v7464_v15 }
 0xd86   :  { %3266 = vadd.xlane.f32.xlu1 %v3265_v14  ;;  %v3256_v43 = vsel %vm2443_vm4, %v3208_v30, 0.0  ;;  %v3213_v1 = vadd.f32 %v3193_v60, %v6428_v59 }
 0xd87   :  { %v3192_v44 = vmul.f32 %v3172_v42, %v6413_v33 }
 0xd88   :  { %3257 = vadd.xlane.f32.xlu2 %v3256_v43  ;;  %v3271_v7 = vsel %vm2443_vm4, %v3213_v1, 0.0 }
 0xd89   :  { %v3212_v4 = vadd.f32 %v3192_v44, %v6428_v59 }
 0xd8b   :  { %v3268_v3 = vsel %vm2443_vm4, %v3212_v4, 0.0 }
 0xd8d   :  { %3272 = vadd.xlane.f32.xlu0 %v3271_v7 }
 0xd90   :  { %3269 = vadd.xlane.f32.xlu2 %v3268_v3 }
 0xdc5   :  { %v3228_v48 = vpop.xlane.xlu1 %3227 }
 0xdc6   :  { %v4032_v28 = vmul.f32 -1.442695, %v3228_v48 }
 0xdc8   :  { %4355 = vpow2.f32 %v4032_v28 }
 0xdc9   :  { %v3219_v32 = vpop.xlane.xlu0 %3218 }
 0xdca   :  { %v4029_v52 = vmul.f32 -1.442695, %v3219_v32 }
 0xdcc   :  { %4357 = vpow2.f32 %v4029_v52 }
 0xdce   :  { %v4356_v58 = vpop.eup %4355 }
 0xdcf   :  { %v3216_v34 = vpop.xlane.xlu2 %3215  ;;  %v6707_v33 = vadd.f32 1.0, %v4356_v58 }
 0xdd0   :  { %v4028_v47 = vmul.f32 -1.442695, %v3216_v34 }
 0xdd1   :  { %v3425_v9 = vand.u32 2147483648, %v6707_v33  ;;  %v3423_v17 = vand.u32 2147483647, %v6707_v33  ;;  %vm3419_vm12 = vweird.f32 %v6707_v33 }
 0xdd2   :  { %4359 = vpow2.f32 %v4028_v47  ;;  %v4358_v40 = vpop.eup %4357 }
 0xdd3   :  { %v6709_v36 = vadd.f32 1.0, %v4358_v40  ;;  %4361 = vrcp.f32 %v6707_v33  ;;  %v6736_v29 = vor.u32 1.1754944e-38, %v3425_v9  ;;  %vm6801_vm6 = vcmp.eq.f32.partialorder %v3423_v17, 8.507059e+37 }
 0xdd4   :  { %v3237_v26 = vpop.xlane.xlu1 %3236 }
 0xdd5   :  { %v4035_v59 = vmul.f32 -1.442695, %v3237_v26  ;;  %4363 = vrcp.f32 %v6709_v36  ;;  %v3378_v49 = vand.u32 2147483647, %v6709_v36  ;;  %v3380_v20 = vand.u32 2147483648, %v6709_v36 }
 0xdd6   :  { %vm3374_vm11 = vweird.f32 %v6709_v36 }
 0xdd7   :  { %4365 = vpow2.f32 %v4035_v59  ;;  %vm6766_vm15 = vcmp.eq.f32.partialorder %v3378_v49, 8.507059e+37  ;;  %v3381_v42 = vor.u32 1.1754944e-38, %v3380_v20 }
 0xdd8   :  { %v4360_v11 = vpop.eup %4359  ;;  %v3222_v54 = vpop.xlane.xlu0 %3221 }
 0xdd9   :  { %v6713_v31 = vadd.f32 1.0, %v4360_v11  ;;  %v4030_v27 = vmul.f32 -1.442695, %v3222_v54  ;;  %v6716_v19 = vpop.eup %4361 }
 0xdda   :  { %v3415_v61 = vmul.f32 %v6716_v19, %v6707_v33  ;;  %vm3420_vm13 = vweird.f32 %v6716_v19 }
 0xddb   :  { %4367 = vrcp.f32 %v6713_v31  ;;  %v3225_v12 = vpop.xlane.xlu2 %3224  ;;  %v6718_v55 = vpop.eup %4363  ;;  %v3363_v22 = vand.u32 2147483647, %v6713_v31  ;;  %v3365_v24 = vand.u32 2147483648, %v6713_v31  ;;  %vm3359_vm14 = vweird.f32 %v6713_v31  ;;  %vm6835_vm5 = vmor %vm3419_vm12, %vm3420_vm13 }
 0xddc   :  { %4369 = vpow2.f32 %v4030_v27  ;;  %v4031_v6 = vmul.f32 -1.442695, %v3225_v12  ;;  %v3370_v5 = vmul.f32 %v6718_v55, %v6709_v36  ;;  %v3416_v2 = vsub.f32 1.0, %v3415_v61 }
 0xddd   :  { %v4366_v41 = vpop.eup %4365  ;;  %vm3375_vm4 = vweird.f32 %v6718_v55  ;;  %vm6772_vm0 = vcmp.eq.f32.partialorder %v3363_v22, 8.507059e+37  ;;  %v3366_v32 = vor.u32 1.1754944e-38, %v3365_v24 }
 0xdde   :  { %v6724_v13 = vadd.f32 1.0, %v4366_v41  ;;  %4371 = vpow2.f32 %v4031_v6  ;;  %v3371_v62 = vsub.f32 1.0, %v3370_v5  ;;  %v3417_v51 = vmul.f32 %v6716_v19, %v3416_v2  ;;  %vm6762_vm1 = vmor %vm3374_vm11, %vm3375_vm4 }
 0xde0   :  { %v3231_v18 = vpop.xlane.xlu0 %3230  ;;  %v3372_v35 = vmul.f32 %v6718_v55, %v3371_v62  ;;  %4373 = vrcp.f32 %v6724_v13  ;;  %v6782_v48 = vadd.f32 %v6716_v19, %v3417_v51  ;;  %v3468_v41 = vand.u32 2147483647, %v6724_v13 }
 0xde1   :  { %v6726_v10 = vpop.eup %4367  ;;  %v4033_v57 = vmul.f32 -1.442695, %v3231_v18  ;;  %v3246_v8 = vpop.xlane.xlu1 %3245 }
 0xde2   :  { %v4370_v45 = vpop.eup %4369  ;;  %v3355_v53 = vmul.f32 %v6726_v10, %v6713_v31  ;;  %v4038_v50 = vmul.f32 -1.442695, %v3246_v8  ;;  %v3373_v16 = vadd.f32 %v6718_v55, %v3372_v35  ;;  %vm3360_vm10 = vweird.f32 %v6726_v10 }
 0xde3   :  { %v6733_v25 = vadd.f32 1.0, %v4370_v45  ;;  %4375 = vpow2.f32 %v4033_v57  ;;  %v3234_v37 = vpop.xlane.xlu2 %3233  ;;  %vm6786_vm2 = vmor %vm3359_vm14, %vm3360_vm10  ;;  %v3422_v20 = vsel %vm6835_vm5, %v6716_v19, %v6782_v48 }
 0xde4   :  { %v3356_v39 = vsub.f32 1.0, %v3355_v53  ;;  %v4372_v38 = vpop.eup %4371  ;;  %v4034_v43 = vmul.f32 -1.442695, %v3234_v37  ;;  %v3377_v7 = vsel %vm6762_vm1, %v6718_v55, %v3373_v16 }
 0xde5   :  { %4377 = vrcp.f32 %v6733_v25  ;;  %v6747_v21 = vadd.f32 1.0, %v4372_v38  ;;  %v3395_v34 = vand.u32 2147483648, %v6733_v25  ;;  %v3393_v40 = vand.u32 2147483647, %v6733_v25 }
 0xde6   :  { %v3357_v63 = vmul.f32 %v6726_v10, %v3356_v39  ;;  %4379 = vpow2.f32 %v4038_v50  ;;  %v6752_v46 = vpop.eup %4373  ;;  %v6807_v11 = vsel %vm6766_vm15, %v3381_v42, %v3377_v7  ;;  %vm3389_vm3 = vweird.f32 %v6733_v25 }
 0xde7   :  { %4381 = vrcp.f32 %v6747_v21  ;;  %v6798_v47 = vmul.f32 %v6752_v46, %v6724_v13  ;;  %v3410_v12 = vand.u32 2147483648, %v6747_v21  ;;  %v3677_v9 = vperm.slane %v6807_v11, %v6738_v0 }
 0xde8   :  { %v3358_v14 = vadd.f32 %v6726_v10, %v3357_v63  ;;  %v3243_v30 = vpop.xlane.xlu0 %3242  ;;  %4383 = vpow2.f32 %v4034_v43  ;;  %v3408_v62 = vand.u32 2147483647, %v6747_v21  ;;  %vm3404_vm7 = vweird.f32 %v6747_v21 }
 0xde9   :  { %v4376_v60 = vpop.eup %4375  ;;  %v4037_v3 = vmul.f32 -1.442695, %v3243_v30  ;;  %v3252_v26 = vpop.xlane.xlu1 %3251  ;;  %v3461_v56 = vsub.f32 1.0, %v6798_v47  ;;  %v6842_v8 = vor.u32 1.1754944e-38, %v3410_v12  ;;  %vm6856_vm9 = vcmp.eq.f32.partialorder %v3393_v40, 8.507059e+37 }
 0xdea   :  { %v6779_v4 = vadd.f32 1.0, %v4376_v60  ;;  %v3362_v58 = vsel %vm6786_vm2, %v6726_v10, %v3358_v14  ;;  %v4040_v54 = vmul.f32 -1.442695, %v3252_v26  ;;  %v6823_v10 = vor.u32 1.1754944e-38, %v3395_v34 }
 0xdeb   :  { %v6770_v1 = vpop.eup %4377  ;;  %v3240_v6 = vpop.xlane.xlu2 %3239  ;;  %v6818_v5 = vsel %vm6772_vm0, %v3366_v32, %v3362_v58  ;;  %vm6870_vm13 = vcmp.eq.f32.partialorder %v3408_v62, 8.507059e+37  ;;  %v6881_v7 = vsel %vm6801_vm6, %v6736_v29, %v3422_v20 }
 0xdec   :  { %v3385_v52 = vmul.f32 %v6770_v1, %v6733_v25  ;;  %v4380_v36 = vpop.eup %4379  ;;  %4385 = vrcp.f32 %v6779_v4  ;;  %v4036_v57 = vmul.f32 -1.442695, %v3240_v6  ;;  %v3676_v17 = vperm.slane %v6818_v5, %v6738_v0 }
 0xded   :  { %v6810_v27 = vpop.eup %4381  ;;  %v6813_v55 = vadd.f32 1.0, %v4380_v36  ;;  %4387 = vpow2.f32 %v4037_v3  ;;  %vm3390_vm8 = vweird.f32 %v6770_v1  ;;  %v3440_v38 = vand.u32 2147483648, %v6779_v4 }
 0xdee   :  { %v3386_v31 = vsub.f32 1.0, %v3385_v52  ;;  %v3400_v61 = vmul.f32 %v6810_v27, %v6747_v21  ;;  %4389 = vpow2.f32 %v4040_v54  ;;  %v4384_v2 = vpop.eup %4383  ;;  %vm3405_vm4 = vweird.f32 %v6810_v27  ;;  %vm6892_vm11 = vmor %vm3389_vm3, %vm3390_vm8 }
 0xdef   :  { %4391 = vrcp.f32 %v6813_v55  ;;  %v3513_v49 = vand.u32 2147483647, %v6813_v55  ;;  %v6849_v33 = vadd.f32 1.0, %v4384_v2  ;;  %v3515_v37 = vand.u32 2147483648, %v6813_v55  ;;  %vm6914_vm14 = vmor %vm3404_vm7, %vm3405_vm4 }
 0xdf0   :  { %v3255_v18 = vpop.xlane.xlu0 %3254  ;;  %v3401_v45 = vsub.f32 1.0, %v3400_v61  ;;  %v3387_v53 = vmul.f32 %v6770_v1, %v3386_v31  ;;  %4393 = vpow2.f32 %v4036_v57  ;;  %v6874_v42 = vor.u32 1.1754944e-38, %v3440_v38 }
 0xdf1   :  { %v4041_v35 = vmul.f32 -1.442695, %v3255_v18  ;;  %v3261_v24 = vpop.xlane.xlu1 %3260  ;;  %vm3509_vm10 = vweird.f32 %v6813_v55  ;;  %v3516_v29 = vor.u32 1.1754944e-38, %v3515_v37  ;;  %vm6900_vm12 = vcmp.eq.f32.partialorder %v3513_v49, 8.507059e+37 }
 0xdf2   :  { %v6846_v63 = vpop.eup %4385  ;;  %v3402_v22 = vmul.f32 %v6810_v27, %v3401_v45  ;;  %v3388_v30 = vadd.f32 %v6770_v1, %v3387_v53  ;;  %v4043_v60 = vmul.f32 -1.442695, %v3261_v24  ;;  %v3438_v25 = vand.u32 2147483647, %v6779_v4 }
 0xdf3   :  { %v4388_v50 = vpop.eup %4387  ;;  %v3430_v51 = vmul.f32 %v6846_v63, %v6779_v4  ;;  %4395 = vpow2.f32 %v4041_v35  ;;  %v3249_v44 = vpop.xlane.xlu2 %3248  ;;  %v6925_v18 = vmul.f32 %v6752_v46, %v3461_v56  ;;  %vm3434_vm0 = vweird.f32 %v6779_v4 }
 0xdf4   :  { %v4390_v14 = vpop.eup %4389  ;;  %4397 = vrcp.f32 %v6849_v33  ;;  %v6865_v19 = vadd.f32 1.0, %v4388_v50  ;;  %v4039_v48 = vmul.f32 -1.442695, %v3249_v44  ;;  %v3403_v28 = vadd.f32 %v6810_v27, %v3402_v22 }
 0xdf5   :  { %v6867_v23 = vpop.eup %4391  ;;  %v6876_v43 = vadd.f32 1.0, %v4390_v14  ;;  %v3431_v52 = vsub.f32 1.0, %v3430_v51  ;;  %v3392_v40 = vsel %vm6892_vm11, %v6770_v1, %v3388_v30  ;;  %vm3435_vm6 = vweird.f32 %v6846_v63 }
 0xdf6   :  { %v3505_v3 = vmul.f32 %v6867_v23, %v6813_v55  ;;  %4399 = vrcp.f32 %v6865_v19  ;;  %v4394_v58 = vpop.eup %4393  ;;  %vm3510_vm1 = vweird.f32 %v6867_v23  ;;  %v3407_v53 = vsel %vm6914_vm14, %v6810_v27, %v3403_v28  ;;  %vm7032_vm4 = vmor %vm3434_vm0, %vm3435_vm6 }
 0xdf7   :  { %4401 = vrcp.f32 %v6876_v43  ;;  %v3545_v31 = vand.u32 2147483648, %v6876_v43  ;;  %v6906_v54 = vadd.f32 1.0, %v4394_v58  ;;  %v3432_v21 = vmul.f32 %v6846_v63, %v3431_v52  ;;  %vm6948_vm15 = vmor %vm3509_vm10, %vm3510_vm1 }
 0xdf8   :  { %v3264_v34 = vpop.xlane.xlu0 %3263  ;;  %v3506_v26 = vsub.f32 1.0, %v3505_v3  ;;  %4403 = vpow2.f32 %v4043_v60  ;;  %v6939_v47 = vsel %vm6856_vm9, %v6823_v10, %v3392_v40  ;;  %v3543_v35 = vand.u32 2147483647, %v6876_v43 }
 0xdf9   :  { %v4396_v59 = vpop.eup %4395  ;;  %4405 = vpow2.f32 %v4039_v48  ;;  %v4044_v12 = vmul.f32 -1.442695, %v3264_v34  ;;  %vm3539_vm2 = vweird.f32 %v6876_v43  ;;  %v6954_v27 = vor.u32 1.1754944e-38, %v3545_v31  ;;  %v3267_v10 = vpop.xlane.xlu1 %3266 }
 0xdfa   :  { %v6908_v6 = vpop.eup %4397  ;;  %v3507_v61 = vmul.f32 %v6867_v23, %v3506_v26  ;;  %v6920_v62 = vadd.f32 1.0, %v4396_v59  ;;  %4407 = vrcp.f32 %v6906_v54  ;;  %v6965_v22 = vsel %vm6870_vm13, %v6842_v8, %v3407_v53 }
 0xdfb   :  { %v3445_v45 = vmul.f32 %v6908_v6, %v6849_v33  ;;  %v3258_v38 = vpop.xlane.xlu2 %3257  ;;  %v3433_v14 = vadd.f32 %v6846_v63, %v3432_v21  ;;  %vm6975_vm3 = vcmp.eq.f32.partialorder %v3543_v35, 8.507059e+37  ;;  %v4045_v15 = vmul.f32 -1.442695, %v3267_v10 }
 0xdfc   :  { %v6934_v57 = vpop.eup %4399  ;;  %v3508_v56 = vadd.f32 %v6867_v23, %v3507_v61  ;;  %4409 = vrcp.f32 %v6920_v62  ;;  %v3558_v24 = vand.u32 2147483647, %v6920_v62  ;;  %v3560_v8 = vand.u32 2147483648, %v6920_v62 }
 0xdfd   :  { %v6944_v2 = vpop.eup %4401  ;;  %4411 = vpow2.f32 %v4044_v12  ;;  %v3446_v20 = vsub.f32 1.0, %v3445_v45  ;;  %v6969_v37 = vmul.f32 %v6934_v57, %v6865_v19  ;;  %vm6982_vm5 = vcmp.eq.f32.partialorder %v3438_v25, 8.507059e+37 }
 0xdfe   :  { %v4404_v49 = vpop.eup %4403  ;;  %v3512_v55 = vsel %vm6948_vm15, %v6867_v23, %v3508_v56  ;;  %v3535_v50 = vmul.f32 %v6944_v2, %v6876_v43  ;;  %v4042_v32 = vmul.f32 -1.442695, %v3258_v38  ;;  %vm3540_vm7 = vweird.f32 %v6944_v2 }
 0xdff   :  { %v4406_v16 = vpop.eup %4405  ;;  %v6971_v51 = vadd.f32 1.0, %v4404_v49  ;;  %v6990_v48 = vsel %vm6900_vm12, %v3516_v29, %v3512_v55  ;;  %v3447_v34 = vmul.f32 %v6908_v6, %v3446_v20  ;;  %vm3449_vm8 = vweird.f32 %v6849_v33  ;;  %vm7016_vm9 = vmor %vm3539_vm2, %vm3540_vm7 }
 0xe00   :  { %v3536_v30 = vsub.f32 1.0, %v3535_v50  ;;  %v6979_v23 = vadd.f32 1.0, %v4406_v16  ;;  %v6986_v3 = vpop.eup %4407  ;;  %v3491_v26 = vsub.f32 1.0, %v6969_v37  ;;  %v3273_v59 = vpop.xlane.xlu0 %3272  ;;  %v3686_v31 = vperm.slane %v6990_v48, %v6738_v0 }
 0xe01   :  { %4413 = vrcp.f32 %v6971_v51  ;;  %v3590_v28 = vand.u32 2147483648, %v6971_v51  ;;  %v7003_v29 = vmul.f32 %v6986_v3, %v6906_v54  ;;  %v7012_v1 = vor.u32 1.1754944e-38, %v3560_v8 }
 0xe02   :  { %v6994_v52 = vpop.eup %4409  ;;  %v3537_v58 = vmul.f32 %v6944_v2, %v3536_v30  ;;  %4415 = vrcp.f32 %v6979_v23  ;;  %v3530_v36 = vand.u32 2147483648, %v6979_v23  ;;  %v3528_v21 = vand.u32 2147483647, %v6979_v23 }
 0xe03   :  { %v4412_v40 = vpop.eup %4411  ;;  %v3550_v25 = vmul.f32 %v6994_v52, %v6920_v62  ;;  %4417 = vpow2.f32 %v4045_v15  ;;  %v7020_v45 = vor.u32 1.1754944e-38, %v3590_v28  ;;  %v3270_v56 = vpop.xlane.xlu2 %3269  ;;  %v4047_v38 = vmul.f32 -1.442695, %v3273_v59 }
 0xe04   :  { %v3538_v12 = vadd.f32 %v6944_v2, %v3537_v58  ;;  %4419 = vpow2.f32 %v4042_v32  ;;  %v7026_v39 = vadd.f32 1.0, %v4412_v40  ;;  %v4046_v10 = vmul.f32 -1.442695, %v3270_v56 }
 0xe05   :  { %v3551_v53 = vsub.f32 1.0, %v3550_v25  ;;  %vm3464_vm13 = vweird.f32 %v6724_v13  ;;  %v3476_v55 = vsub.f32 1.0, %v7003_v29  ;;  %vm3524_vm10 = vweird.f32 %v6979_v23 }
 0xe06   :  { %v3542_v35 = vsel %vm7016_vm9, %v6944_v2, %v3538_v12  ;;  %v3531_v2 = vor.u32 1.1754944e-38, %v3530_v36  ;;  %v3437_v50 = vsel %vm7032_vm4, %v6846_v63, %v3433_v14  ;;  %4421 = vrcp.f32 %v7026_v39 }
 0xe07   :  { %v7037_v49 = vpop.eup %4413  ;;  %v3552_v20 = vmul.f32 %v6994_v52, %v3551_v53  ;;  %v3448_v30 = vadd.f32 %v6908_v6, %v3447_v34  ;;  %vm3450_vm11 = vweird.f32 %v6908_v6  ;;  %v7053_v8 = vsel %vm6975_vm3, %v6954_v27, %v3542_v35 }
 0xe08   :  { %v4416_v4 = vpop.eup %4415  ;;  %v3580_v16 = vmul.f32 %v7037_v49, %v6971_v51  ;;  %vm7056_vm12 = vcmp.eq.f32.partialorder %v3528_v21, 8.507059e+37  ;;  %4423 = vpow2.f32 %v4046_v10  ;;  %v7063_v63 = vsel %vm6982_vm5, %v6874_v42, %v3437_v50  ;;  %vm7075_vm1 = vmor %vm3449_vm8, %vm3450_vm11 }
 0xe09   :  { %v3520_v15 = vmul.f32 %v4416_v4, %v6979_v23  ;;  %v4418_v14 = vpop.eup %4417  ;;  %vm3525_vm14 = vweird.f32 %v4416_v4  ;;  %4425 = vpow2.f32 %v4047_v38  ;;  %v3453_v60 = vand.u32 2147483647, %v6849_v33 }
 0xe0a   :  { %v3581_v32 = vsub.f32 1.0, %v3580_v16  ;;  %v4420_v27 = vpop.eup %4419  ;;  %v7067_v58 = vadd.f32 %v6994_v52, %v3552_v20  ;;  %v7069_v40 = vadd.f32 1.0, %v4418_v14  ;;  %v3455_v44 = vand.u32 2147483648, %v6849_v33  ;;  %vm3526_vm3 = vmor %vm3524_vm10, %vm3525_vm14 }
 0xe0b   :  { %v3521_v34 = vsub.f32 1.0, %v3520_v15  ;;  %v7080_v36 = vadd.f32 1.0, %v4420_v27  ;;  %v3452_v25 = vsel %vm7075_vm1, %v6908_v6, %v3448_v30  ;;  %v3463_v59 = vadd.f32 %v6752_v46, %v6925_v18 }
 0xe0c   :  { %vm3465_vm15 = vweird.f32 %v6752_v46  ;;  %v7089_v12 = vmul.f32 %v7037_v49, %v3581_v32  ;;  %4427 = vrcp.f32 %v7069_v40  ;;  %v3456_v21 = vor.u32 1.1754944e-38, %v3455_v44  ;;  %v7092_v53 = vpop.eup %4421 }
 0xe0d   :  { %v3522_v61 = vmul.f32 %v4416_v4, %v3521_v34  ;;  %4429 = vrcp.f32 %v7080_v36  ;;  %v3575_v33 = vand.u32 2147483648, %v7080_v36  ;;  %vm3454_vm0 = vcmp.eq.f32.partialorder %v3453_v60, 8.507059e+37  ;;  %vm7109_vm6 = vmor %vm3464_vm13, %vm3465_vm15 }
 0xe0e   :  { %vm7098_vm2 = vcmp.eq.f32.partialorder %v3468_v41, 8.507059e+37  ;;  %v4424_v18 = vpop.eup %4423  ;;  %v3573_v35 = vand.u32 2147483647, %v7080_v36  ;;  %v3595_v10 = vmul.f32 %v7092_v53, %v7026_v39  ;;  %v3457_v38 = vsel %vm3454_vm0, %v3456_v21, %v3452_v25 }
 0xe0f   :  { %v3523_v56 = vadd.f32 %v4416_v4, %v3522_v61  ;;  %v4426_v41 = vpop.eup %4425  ;;  %v7116_v20 = vor.u32 1.1754944e-38, %v3575_v33  ;;  %v7118_v50 = vadd.f32 1.0, %v4424_v18  ;;  %v3467_v16 = vsel %vm7109_vm6, %v6752_v46, %v3463_v59 }
 0xe10   :  { %v3470_v30 = vand.u32 2147483648, %v6724_v13  ;;  %v3596_v14 = vsub.f32 1.0, %v3595_v10  ;;  %v7124_v32 = vadd.f32 1.0, %v4426_v41  ;;  %v3678_v60 = vperm.slane %v6939_v47, %v6738_v0 }
 0xe11   :  { %v3527_v15 = vsel %vm3526_vm3, %v4416_v4, %v3523_v56  ;;  %vm3555_vm5 = vweird.f32 %v6994_v52  ;;  %4431 = vrcp.f32 %v7118_v50  ;;  %v3679_v46 = vperm.slane %v6965_v22, %v6738_v0 }
 0xe12   :  { %v7130_v23 = vsel %vm7056_vm12, %v3531_v2, %v3527_v15  ;;  %v3471_v27 = vor.u32 1.1754944e-38, %v3470_v30  ;;  %v7136_v13 = vpop.eup %4427  ;;  %v7141_v34 = vmul.f32 %v7092_v53, %v3596_v14  ;;  %4433 = vrcp.f32 %v7124_v32 }
 0xe13   :  { %v3687_v4 = vperm.slane %v7130_v23, %v6738_v0  ;;  %v3680_v47 = vperm.slane %v6881_v7, %v6738_v0  ;;  %v7146_v2 = vpop.eup %4429  ;;  %vm3554_vm7 = vweird.f32 %v6920_v62  ;;  %v7151_v22 = vmul.f32 %v7136_v13, %v7069_v40 }
 0xe14   :  { %v3472_v28 = vsel %vm7098_vm2, %v3471_v27, %v3467_v16  ;;  %v3681_v42 = vperm.slane %v7063_v63, %v6738_v0  ;;  %v3682_v44 = vperm.slane %v3457_v38, %v6738_v0  ;;  %v3565_v25 = vmul.f32 %v7146_v2, %v7080_v36 }
 0xe15   :  { %vm3569_vm8 = vweird.f32 %v7080_v36  ;;  %vm3570_vm9 = vweird.f32 %v7146_v2  ;;  %v3683_v7 = vperm.slane %v3472_v28, %v6738_v0  ;;  %vm7505_vm4 = vcmask 1041409  }
 0xe16   :  { %v3696_v59 = vsel %vm7505_vm4, %v3677_v9, %v3676_v17  ;;  %v3611_v63 = vsub.f32 1.0, %v7151_v22  ;;  %vm3697_vm13 = vcmask 1042434   ;;  %vm3699_vm10 = vcmask 1043459  }
 0xe17   :  { %vm7385_vm11 = vcmask 1044484   ;;  %vm7173_vm12 = vcmp.eq.f32.partialorder %v3558_v24, 8.507059e+37  ;;  %v3566_v21 = vsub.f32 1.0, %v3565_v25  ;;  %v3698_v33 = vsel %vm3697_vm13, %v3678_v60, %v3696_v59  ;;  %v7178_v5 = vpop.eup %4431 }
 0xe18   :  { %vm3703_vm14 = vcmask 1045509   ;;  %vm3705_vm1 = vcmask 1046534   ;;  %vm7180_vm15 = vcmp.eq.f32.partialorder %v3573_v35, 8.507059e+37  ;;  %v3700_v9 = vsel %vm3699_vm10, %v3679_v46, %v3698_v33  ;;  %v7188_v24 = vpop.eup %4433 }
 0xe19   :  { %vm7386_vm0 = vcmask 1047559   ;;  %vm3722_vm2 = vcmask 39936   ;;  %v3477_v17 = vmul.f32 %v6986_v3, %v3476_v55  ;;  %v3567_v6 = vmul.f32 %v7146_v2, %v3566_v21 }
 0xe1a   :  { %v7193_v18 = vmul.f32 %v7178_v5, %v7118_v50  ;;  %v3702_v56 = vsel %vm7385_vm11, %v3680_v47, %v3700_v9  ;;  %vm3479_vm6 = vweird.f32 %v6906_v54  ;;  %vm3584_vm3 = vweird.f32 %v6971_v51 }
 0xe1b   :  { %v7200_v35 = vmul.f32 %v7188_v24, %v7124_v32  ;;  %v3704_v29 = vsel %vm3703_vm14, %v3681_v42, %v3702_v56  ;;  %v3478_v55 = vadd.f32 %v6986_v3, %v3477_v17  ;;  %vm3480_vm4 = vweird.f32 %v6986_v3 }
 0xe1c   :  { %v3568_v10 = vadd.f32 %v7146_v2, %v3567_v6  ;;  %v3626_v38 = vsub.f32 1.0, %v7193_v18  ;;  %v3706_v43 = vsel %vm3705_vm1, %v3682_v44, %v3704_v29  ;;  %vm7208_vm11 = vmor %vm3479_vm6, %vm3480_vm4  ;;  %v3483_v16 = vand.u32 2147483647, %v6906_v54 }
 0xe1d   :  { %v3641_v30 = vsub.f32 1.0, %v7200_v35  ;;  %v3708_v15 = vsel %vm7386_vm0, %v3683_v7, %v3706_v43  ;;  %v3482_v14 = vsel %vm7208_vm11, %v6986_v3, %v3478_v55  ;;  %v3485_v60 = vand.u32 2147483648, %v6906_v54  ;;  %vm7223_vm6 = vmor %vm3554_vm7, %vm3555_vm5 }
 0xe1e   :  { %v3723_v46 = vsel %vm3722_vm2, %v3708_v15, 0.0  ;;  %vm3484_vm4 = vcmp.eq.f32.partialorder %v3483_v16, 8.507059e+37  ;;  %v3492_v47 = vmul.f32 %v6934_v57, %v3491_v26  ;;  %vm3494_vm0 = vweird.f32 %v6865_v19  ;;  %vm7236_vm11 = vmor %vm3569_vm8, %vm3570_vm9 }
 0xe1f   :  { %3724 = vadd.xlane.f32.xlu1 %v3723_v46  ;;  %v3486_v62 = vor.u32 1.1754944e-38, %v3485_v60  ;;  %vm3495_vm5 = vweird.f32 %v6934_v57  ;;  %v3498_v3 = vand.u32 2147483647, %v6865_v19  ;;  %v3500_v37 = vand.u32 2147483648, %v6865_v19 }
 0xe20   :  { %v3493_v26 = vadd.f32 %v6934_v57, %v3492_v47  ;;  %vm3726_vm7 = vcmask 33792   ;;  %v3557_v36 = vsel %vm7223_vm6, %v6994_v52, %v7067_v58  ;;  %v3572_v28 = vsel %vm7236_vm11, %v7146_v2, %v3568_v10  ;;  %vm3496_vm8 = vmor %vm3494_vm0, %vm3495_vm5 }
 0xe21   :  { %v3487_v42 = vsel %vm3484_vm4, %v3486_v62, %v3482_v14  ;;  %vm3499_vm9 = vcmp.eq.f32.partialorder %v3498_v3, 8.507059e+37  ;;  %v3501_v44 = vor.u32 1.1754944e-38, %v3500_v37  ;;  %v3562_v19 = vsel %vm7173_vm12, %v7012_v1, %v3557_v36 }
 0xe22   :  { %v3497_v25 = vsel %vm3496_vm8, %v6934_v57, %v3493_v26  ;;  %v3684_v7 = vperm.slane %v3487_v42, %v6738_v0  ;;  %v3577_v52 = vsel %vm7180_vm15, %v7116_v20, %v3572_v28  ;;  %v3583_v58 = vadd.f32 %v7037_v49, %v7089_v12 }
 0xe23   :  { %v3502_v2 = vsel %vm3499_vm9, %v3501_v44, %v3497_v25  ;;  %vm3585_vm0 = vweird.f32 %v7037_v49  ;;  %v3588_v59 = vand.u32 2147483647, %v6971_v51  ;;  %v3598_v61 = vadd.f32 %v7092_v53, %v7141_v34 }
 0xe24   :  { %v3685_v1 = vperm.slane %v3502_v2, %v6738_v0  ;;  %vm3586_vm12 = vmor %vm3584_vm3, %vm3585_vm0  ;;  %vm3599_vm6 = vweird.f32 %v7026_v39  ;;  %vm3600_vm15 = vweird.f32 %v7092_v53  ;;  %v3603_v57 = vand.u32 2147483647, %v7026_v39 }
 0xe25   :  { %v3587_v12 = vsel %vm3586_vm12, %v7037_v49, %v3583_v58  ;;  %vm3589_vm4 = vcmp.eq.f32.partialorder %v3588_v59, 8.507059e+37  ;;  %vm7272_vm11 = vmor %vm3599_vm6, %vm3600_vm15  ;;  %v3605_v34 = vand.u32 2147483648, %v7026_v39  ;;  %v3612_v51 = vmul.f32 %v7136_v13, %v3611_v63 }
 0xe26   :  { %vm7518_vm3 = vcmask 1041409   ;;  %v3592_v33 = vsel %vm3589_vm4, %v7020_v45, %v3587_v12  ;;  %v3602_v11 = vsel %vm7272_vm11, %v7092_v53, %v3598_v61  ;;  %vm3604_vm5 = vcmp.eq.f32.partialorder %v3603_v57, 8.507059e+37 }
 0xe27   :  { %v3709_v21 = vsel %vm7518_vm3, %v3685_v1, %v3684_v7  ;;  %v3606_v9 = vor.u32 1.1754944e-38, %v3605_v34  ;;  %v3613_v17 = vadd.f32 %v7136_v13, %v3612_v51  ;;  %vm3614_vm8 = vweird.f32 %v7069_v40  ;;  %vm7519_vm6 = vmmov %vm7518_vm3 }
 0xe28   :  { %v3727_v49 = vsel %vm3726_vm7, %v3709_v21, 0.0  ;;  %vm3615_vm9 = vweird.f32 %v7136_v13  ;;  %v3618_v39 = vand.u32 2147483647, %v7069_v40  ;;  %v3620_v22 = vand.u32 2147483648, %v7069_v40 }
 0xe29   :  { %3728 = vadd.xlane.f32.xlu2 %v3727_v49  ;;  %v3688_v45 = vperm.slane %v7053_v8, %v6738_v0  ;;  %v3607_v63 = vsel %vm3604_vm5, %v3606_v9, %v3602_v11  ;;  %vm3616_vm0 = vmor %vm3614_vm8, %vm3615_vm9  ;;  %v3689_v53 = vperm.slane %v3562_v19, %v6738_v0  ;;  %v3690_v6 = vperm.slane %v3577_v52, %v6738_v0 }
 0xe2a   :  { %v3691_v56 = vperm.slane %v3592_v33, %v6738_v0  ;;  %v3617_v29 = vsel %vm3616_vm0, %v7136_v13, %v3613_v17  ;;  %vm3619_vm12 = vcmp.eq.f32.partialorder %v3618_v39, 8.507059e+37  ;;  %v3621_v55 = vor.u32 1.1754944e-38, %v3620_v22 }
 0xe2b   :  { %v3692_v10 = vperm.slane %v3607_v63, %v6738_v0  ;;  %v3710_v8 = vsel %vm7519_vm6, %v3687_v4, %v3686_v31  ;;  %v3627_v40 = vmul.f32 %v7178_v5, %v3626_v38  ;;  %vm3629_vm15 = vweird.f32 %v7118_v50 }
 0xe2c   :  { %vm3630_vm4 = vweird.f32 %v7178_v5  ;;  %v3622_v13 = vsel %vm3619_vm12, %v3621_v55, %v3617_v29  ;;  %v3711_v43 = vsel %vm3697_vm13, %v3688_v45, %v3710_v8  ;;  %v3633_v41 = vand.u32 2147483647, %v7118_v50 }
 0xe2d   :  { %v3635_v48 = vand.u32 2147483648, %v7118_v50  ;;  %v3693_v16 = vperm.slane %v3622_v13, %v6738_v0  ;;  %v3712_v23 = vsel %vm3699_vm10, %v3689_v53, %v3711_v43  ;;  %v3628_v31 = vadd.f32 %v7178_v5, %v3627_v40  ;;  %vm3631_vm3 = vmor %vm3629_vm15, %vm3630_vm4 }
 0xe2e   :  { %v3642_v4 = vmul.f32 %v7188_v24, %v3641_v30  ;;  %vm7520_vm11 = vcmask 1044484   ;;  %vm3634_vm5 = vcmp.eq.f32.partialorder %v3633_v41, 8.507059e+37  ;;  %vm3644_vm13 = vweird.f32 %v7124_v32 }
 0xe2f   :  { %v3713_v18 = vsel %vm7520_vm11, %v3690_v6, %v3712_v23  ;;  %v3636_v38 = vor.u32 1.1754944e-38, %v3635_v48  ;;  %v3632_v50 = vsel %vm3631_vm3, %v7178_v5, %v3628_v31  ;;  %vm3645_vm10 = vweird.f32 %v7188_v24 }
 0xe30   :  { %v3714_v15 = vsel %vm3703_vm14, %v3691_v56, %v3713_v18  ;;  %v3643_v14 = vadd.f32 %v7188_v24, %v3642_v4  ;;  %vm3646_vm8 = vmor %vm3644_vm13, %vm3645_vm10  ;;  %v3648_v30 = vand.u32 2147483647, %v7124_v32  ;;  %v3650_v27 = vand.u32 2147483648, %v7124_v32 }
 0xe31   :  { %v3715_v60 = vsel %vm3705_vm1, %v3692_v10, %v3714_v15  ;;  %v3637_v35 = vsel %vm3634_vm5, %v3636_v38, %v3632_v50  ;;  %vm7521_vm9 = vcmask 1047559   ;;  %vm7522_vm1 = vmmov %vm7519_vm6  ;;  %v7336_v28 = vadd.s32 4294967288, %v6738_v0 }
 0xe32   :  { %v3716_v46 = vsel %vm7521_vm9, %v3693_v16, %v3715_v60  ;;  %v3647_v47 = vsel %vm3646_vm8, %v7188_v24, %v3643_v14  ;;  %v3651_v62 = vor.u32 1.1754944e-38, %v3650_v27  ;;  %vm3649_vm14 = vcmp.eq.f32.partialorder %v3648_v30, 8.507059e+37  ;;  %vm7524_vm12 = vmmov %vm7522_vm1 }
 0xe33   :  { %v3730_v54 = vsel %vm3722_vm2, %v3716_v46, 0.0  ;;  %v3694_v5 = vperm.slane %v3637_v35, %v6738_v0  ;;  %vm3743_vm2 = vcmask 130112   ;;  %vm3750_vm0 = vcmask 74752   ;;  %vm7525_vm8 = vmmov %vm7522_vm1 }
 0xe34   :  { %3731 = vadd.xlane.f32.xlu0 %v3730_v54  ;;  %v3652_v3 = vsel %vm3649_vm14, %v3651_v62, %v3647_v47  ;;  %v4476_v1 = vmov 0  }
 0xe35   :  { %v3695_v37 = vperm.slane %v3652_v3, %v6738_v0  ;;  %4083 = vset.pattern.permute.xlu2 %v4476_v1  ;;  %4082 = vset.pattern.permute.xlu1 %v4476_v1 }
 0xe36   :  { %4081 = vset.pattern.permute.xlu0 %v4476_v1 }
 0xe37   :  { %v3717_v26 = vsel %vm7522_vm1, %v3695_v37, %v3694_v5 }
 0xe38   :  { %v3733_v36 = vsel %vm3726_vm7, %v3717_v26, 0.0  ;;  %vm7523_vm7 = vmmov %vm7522_vm1 }
 0xe39   :  { %3734 = vadd.xlane.f32.xlu1 %v3733_v36 }
 0xe92   :  { %v3725_v32 = vpop.xlane.xlu1 %3724 }
 0xe93   :  { %v3740_v25 = vperm.slane %v3725_v32, %v6738_v0 }
 0xe9c   :  { %v3729_v24 = vpop.xlane.xlu2 %3728 }
 0xe9d   :  { %v3742_v44 = vperm.slane %v3729_v24, %v7336_v28 }
 0xe9f   :  { %v3744_v58 = vsel %vm3743_vm2, %v3742_v44, %v3740_v25 }
 0xea7   :  { %v3732_v42 = vpop.xlane.xlu0 %3731 }
 0xea8   :  { %v3745_v7 = vperm.slane %v3732_v42, %v6738_v0 }
 0xeac   :  { %v3735_v19 = vpop.xlane.xlu1 %3734 }
 0xead   :  { %v3746_v52 = vperm.slane %v3735_v19, %v7336_v28 }
 0xeaf   :  { %v3747_v2 = vsel %vm3743_vm2, %v3746_v52, %v3745_v7 }
 0xeb0   :  { %v3748_v59 = vsel %vm7523_vm7, %v3747_v2, %v3744_v58 }
 0xeb1   :  { %v3751_v61 = vsel %vm3750_vm0, %v3748_v59, -inf }
 0xeb2   :  { %3752 = vmax.xlane.f32.xlu2 %v3751_v61 }
 0xf25   :  { %v3753_v57 = vpop.xlane.xlu2 %3752 }
 0xf26   :  { %v3755_v12 = vperm.slane %v3753_v57, 0  ;;  %v3756_v20 = vperm.slane %v3753_v57, 1 }
 0xf28   :  { %v3759_v34 = vsub.f32 %v3725_v32, %v3755_v12  ;;  %v3760_v51 = vsub.f32 %v3729_v24, %v3755_v12  ;;  %v3761_v21 = vsub.f32 %v3732_v42, %v3756_v20  ;;  %v3762_v9 = vsub.f32 %v3735_v19, %v3756_v20 }
 0xf2a   :  { %v3763_v33 = vmul.f32 1.442695, %v3759_v34  ;;  %v3765_v11 = vmul.f32 1.442695, %v3760_v51  ;;  %v3767_v49 = vmul.f32 1.442695, %v3761_v21 }
 0xf2b   :  { %v3769_v39 = vmul.f32 1.442695, %v3762_v9 }
 0xf2c   :  { %4435 = vpow2.f32 %v3763_v33 }
 0xf2d   :  { %4437 = vpow2.f32 %v3765_v11 }
 0xf2e   :  { %4439 = vpow2.f32 %v3767_v49 }
 0xf2f   :  { %4441 = vpow2.f32 %v3769_v39 }
 0xf32   :  { %v4436_v17 = vpop.eup %4435 }
 0xf33   :  { %v4438_v22 = vpop.eup %4437  ;;  %3776 = vperm.xlu0 %4081, %v4436_v17  }
 0xf34   :  { %v4440_v45 = vpop.eup %4439  ;;  %3779 = vperm.xlu1 %4082, %v4438_v22  }
 0xf35   :  { %3782 = vperm.xlu2 %4083, %v4440_v45   ;;  %v4442_v63 = vpop.eup %4441 }
 0xf3d   :  { %3785 = vperm.xlu2 %4083, %v4442_v63  }
 0xf8f   :  { %v3783_v53 = vpop.permute.xlu2 %3782 }
 0xf90   :  { %v3790_v8 = vperm.slane %v3783_v53, %v6738_v0 }
 0xf97   :  { %v3786_v6 = vpop.permute.xlu2 %3785 }
 0xf98   :  { %v3791_v56 = vperm.slane %v3786_v6, %v7336_v28 }
 0xf9a   :  { %v3792_v43 = vsel %vm3743_vm2, %v3791_v56, %v3790_v8 }
 0xfa5   :  { %v3777_v29 = vpop.permute.xlu0 %3776 }
 0xfa6   :  { %v3780_v55 = vpop.permute.xlu1 %3779  ;;  %v3787_v10 = vperm.slane %v3777_v29, %v6738_v0 }
 0xfa7   :  { %v3788_v40 = vperm.slane %v3780_v55, %v7336_v28 }
 0xfa9   :  { %v3789_v13 = vsel %vm3743_vm2, %v3788_v40, %v3787_v10 }
 0xfaa   :  { %v3793_v41 = vsel %vm7524_vm12, %v3792_v43, %v3789_v13 }
 0xfab   :  { %v3795_v48 = vsel %vm3750_vm0, %v3793_v41, 0.0 }
 0xfac   :  { %3796 = vadd.xlane.f32.xlu1 %v3795_v48 }
0x101f   :  { %v3797_v16 = vpop.xlane.xlu1 %3796 }
0x1020   :  { %v3799_v23 = vperm.slane %v3797_v16, 0  ;;  %v3800_v31 = vperm.slane %v3797_v16, 1 }
0x1022   :  { %4443 = vrcp.f32 %v3799_v23  ;;  %v3814_v60 = vand.u32 2147483648, %v3799_v23  ;;  %v3812_v30 = vand.u32 2147483647, %v3799_v23  ;;  %vm3808_vm15 = vweird.f32 %v3799_v23 }
0x1023   :  { %4445 = vrcp.f32 %v3800_v31  ;;  %v3830_v3 = vand.u32 2147483648, %v3800_v31  ;;  %vm3824_vm5 = vweird.f32 %v3800_v31  ;;  %v3828_v36 = vand.u32 2147483647, %v3800_v31 }
0x1024   :  { %v3815_v47 = vor.u32 1.1754944e-38, %v3814_v60  ;;  %vm3813_vm11 = vcmp.eq.f32.partialorder %v3812_v30, 8.507059e+37 }
0x1025   :  { %v3831_v24 = vor.u32 1.1754944e-38, %v3830_v3  ;;  %vm3829_vm10 = vcmp.eq.f32.partialorder %v3828_v36, 8.507059e+37 }
0x1028   :  { %v4444_v4 = vpop.eup %4443 }
0x1029   :  { %v4446_v18 = vpop.eup %4445  ;;  %v3804_v38 = vmul.f32 %v4444_v4, %v3799_v23  ;;  %vm3809_vm6 = vweird.f32 %v4444_v4 }
0x102a   :  { %v3820_v15 = vmul.f32 %v4446_v18, %v3800_v31  ;;  %vm3810_vm4 = vmor %vm3808_vm15, %vm3809_vm6  ;;  %vm3825_vm3 = vweird.f32 %v4446_v18 }
0x102b   :  { %v3805_v50 = vsub.f32 1.0, %v3804_v38  ;;  %vm3826_vm13 = vmor %vm3824_vm5, %vm3825_vm3 }
0x102c   :  { %v3821_v14 = vsub.f32 1.0, %v3820_v15 }
0x102d   :  { %v3806_v35 = vmul.f32 %v4444_v4, %v3805_v50 }
0x102e   :  { %v3822_v27 = vmul.f32 %v4446_v18, %v3821_v14 }
0x102f   :  { %v3807_v46 = vadd.f32 %v4444_v4, %v3806_v35 }
0x1030   :  { %v3823_v62 = vadd.f32 %v4446_v18, %v3822_v27 }
0x1031   :  { %v3811_v54 = vsel %vm3810_vm4, %v4444_v4, %v3807_v46 }
0x1032   :  { %v3816_v5 = vsel %vm3813_vm11, %v3815_v47, %v3811_v54  ;;  %v3827_v32 = vsel %vm3826_vm13, %v4446_v18, %v3823_v62 }
0x1033   :  { %v3818_v37 = vmul.f32 %v4438_v22, %v3816_v5  ;;  %v3817_v26 = vmul.f32 %v4436_v17, %v3816_v5  ;;  %v3832_v42 = vsel %vm3829_vm10, %v3831_v24, %v3827_v32 }
0x1034   :  { %v3834_v44 = vmul.f32 %v4442_v63, %v3832_v42  ;;  %v3833_v19 = vmul.f32 %v4440_v45, %v3832_v42 }
0x1035   :  { %3843 = vperm.xlu0 %4081, %v3818_v37   ;;  %3840 = vperm.xlu2 %4083, %v3817_v26  }
0x103d   :  { %3849 = vperm.xlu0 %4081, %v3834_v44   ;;  %3846 = vperm.xlu2 %4083, %v3833_v19  }
0x108f   :  { %v3841_v25 = vpop.permute.xlu2 %3840 }
0x1090   :  { %v3851_v59 = vperm.slane %v3841_v25, %v6738_v0 }
0x1097   :  { %v3847_v52 = vpop.permute.xlu2 %3846 }
0x1098   :  { %v3854_v61 = vperm.slane %v3847_v52, %v6738_v0 }
0x10a7   :  { %v3844_v7 = vpop.permute.xlu0 %3843 }
0x10a8   :  { %v3852_v58 = vperm.slane %v3844_v7, %v7336_v28 }
0x10aa   :  { %v3853_v57 = vsel %vm3743_vm2, %v3852_v58, %v3851_v59 }
0x10af   :  { %v3850_v2 = vpop.permute.xlu0 %3849 }
0x10b0   :  { %v3855_v1 = vperm.slane %v3850_v2, %v7336_v28 }
0x10b2   :  { %v3856_v12 = vsel %vm3743_vm2, %v3855_v1, %v3854_v61 }
0x10b3   :  { %v3857_v20 = vsel %vm7525_vm8, %v3856_v12, %v3853_v57 }
0x10b4   :  { %3859 = vst.msk [vmem:[#allocation2] sm:$0x3] %vm3750_vm0, %v3857_v20 }
0x10b5   :  { %3870 = dma.vmem_to_hbm [thread:$0]  %s3866_s28, 32, %s3868_s30, [#allocation3]  }
0x10b6   :  { %4471 = dma.done.wait [#allocation3], 32  }
0x10b7   :  { %4472 = vsyncadd [#allocation3], 4294967264 }
0x10b8   :  { %3875 = vsyncpa [#allocation3], 1 }

</bundles_post_ra>
